<compile_context>
chip_gen: v7x
topology: tpu7x:2x2x1
jax: 0.10.0
libtpu: 0.0.40
codegen_flags: <defaults>
</compile_context>

<pallas_src>
import numpy as np
from functools import partial

import jax
import jax.numpy as jnp
from jax import lax
from jax.experimental import pallas as pl
from jax.experimental.pallas import tpu as pltpu

MAX_TOP_K = 20


def _ota_cost_kernel(gt_ref, goh_ref, pred_ref, pcls_ref, cost_ref, dynk_ref):
    # gt_ref   : (Bt, G, 8)  lanes  [x1, y1, x2, y2, area, valid, 0, 0]
    # goh_ref  : (Bt, G, C)  one-hot gt classes
    # pred_ref : (Bt, 8, P)  rows   [x1, y1, x2, y2, area, obj, valid, 0]
    # pcls_ref : (Bt, C, P)  per-candidate class probabilities
    # cost_ref : (Bt, G, P)  SimOTA cost
    # dynk_ref : (Bt, G, 1)  dynamic_k
    Bt, G, _ = gt_ref.shape
    P = pred_ref.shape[2]

    # ---- class/conf BCE loss (C x P slabs fully consumed before the top-k) --
    #   y = sqrt(p_cls * p_obj), logits = log(y/(1-y))
    #   BCE_with_logits(logits, one_hot).sum(C)
    #     = -( T @ (log y - log(1-y)) + sum_c log(1-y) )
    pobj = pred_ref[:, 5:6, :]                          # (Bt, 1, P)
    pcls = pcls_ref[...]                                # (Bt, C, P)
    prod = jnp.maximum(pcls * pobj, 1e-14)
    y = jnp.minimum(jnp.sqrt(prod), 1.0 - 1e-7)
    log_y = 0.5 * jnp.log(prod)                         # == log(sqrt(prod))
    log_1my = jnp.log(1.0 - y)                          # finite by the clamp
    # one-hot T is exact in bf16; the logit diff tolerates bf16 for a ranking
    # cost.  f32 accumulation on the MXU.
    diff = (log_y - log_1my).astype(jnp.bfloat16)       # (Bt, C, P)
    t = goh_ref[...].astype(jnp.bfloat16)               # (Bt, G, C)
    tlog = jnp.einsum('bgc,bcp->bgp', t, diff,
                      preferred_element_type=jnp.float32)     # (Bt, G, P)
    sum_log_1my = jnp.sum(log_1my, axis=1, keepdims=True)     # (Bt, 1, P)
    cls_loss = -(tlog + sum_log_1my)                    # (Bt, G, P)

    # ---- pairwise IoU (torchvision.ops.box_iou semantics) ----
    gx1 = gt_ref[:, :, 0:1]
    gy1 = gt_ref[:, :, 1:2]
    gx2 = gt_ref[:, :, 2:3]
    gy2 = gt_ref[:, :, 3:4]
    garea = gt_ref[:, :, 4:5]
    gval = gt_ref[:, :, 5:6]
    px1 = pred_ref[:, 0:1, :]
    py1 = pred_ref[:, 1:2, :]
    px2 = pred_ref[:, 2:3, :]
    py2 = pred_ref[:, 3:4, :]
    parea = pred_ref[:, 4:5, :]
    pval = pred_ref[:, 6:7, :]

    inter_w = jnp.maximum(jnp.minimum(gx2, px2) - jnp.maximum(gx1, px1), 0.0)
    inter_h = jnp.maximum(jnp.minimum(gy2, py2) - jnp.maximum(gy1, py1), 0.0)
    inter = inter_w * inter_h                           # (Bt, G, P)
    union = jnp.maximum(garea + parea - inter, 1e-9)
    iou = inter * pl.reciprocal(union, approx=True)     # EUP slot, ~free
    valid2d = jnp.logical_and(gval > 0.5, pval > 0.5)   # (Bt, G, P)
    iou = jnp.where(valid2d, iou, 0.0)                  # padding contributes 0

    # cost stored BEFORE the top-k loop; the host only ever reads the valid
    # [:num_gt, :p_real] slice, so no padding sentinel is needed.
    cost_ref[...] = cls_loss - 3.0 * jnp.log(iou + 1e-5)

    # ---- dynamic_k = clamp(int(sum(top_k(iou, k))), min=1) ----
    # One cross-lane max per iteration; all bit-identical ties masked at once
    # (sum-only use; f32 max returns an exact representative).  max(m, 0)
    # makes the exhausted / all-zero tail contribute exactly 0, matching
    # torch's trailing zero top-k entries.
    k = MAX_TOP_K if P >= MAX_TOP_K else P

    def topk_body(_, carry):
        work, acc = carry
        m = jnp.max(work, axis=-1, keepdims=True)       # (Bt, G, 1)
        acc = acc + jnp.maximum(m, 0.0)
        work = jnp.where(work == m, -1.0, work)
        return work, acc

    _, topk_sum = lax.fori_loop(
        0, k, topk_body,
        (iou, jnp.zeros((Bt, G, 1), jnp.float32)),
        unroll=True)
    dynk_ref[...] = jnp.maximum(topk_sum.astype(jnp.int32), 1)


@partial(jax.jit, static_argnames=("btile",))
def ota_cost(gt_slab, goh, pred_slab, pcls, *, btile=8):
    B, G, _ = gt_slab.shape
    C = goh.shape[2]
    P = pred_slab.shape[2]
    assert B % btile == 0
    assert P % 128 == 0

    def spec(shape):
        return pl.BlockSpec((btile,) + shape, lambda b: (b, 0, 0))

    # Explicit scoped-VMEM request (v5e default is only 16 MiB): roughly
    # 8x the single-buffer per-step footprint, clamped to [16, 48] MiB so it
    # stays within every generation's physical VMEM.
    step_bytes = 4 * btile * (G * 8 + G * C + 8 * P + C * P + G * P + G)
    vmem_limit = int(min(48 << 20, max(16 << 20, 8 * step_bytes)))

    return pl.pallas_call(
        _ota_cost_kernel,
        out_shape=(jax.ShapeDtypeStruct((B, G, P), jnp.float32),
                   jax.ShapeDtypeStruct((B, G, 1), jnp.int32)),
        grid_spec=pltpu.PrefetchScalarGridSpec(
            num_scalar_prefetch=0,
            grid=(B // btile,),
            in_specs=[spec((G, 8)), spec((G, C)),
                      spec((8, P)), spec((C, P))],
            out_specs=[spec((G, P)), spec((G, 1))]),
        compiler_params=pltpu.CompilerParams(
            dimension_semantics=("parallel",),   # v7x: shard batch over 2 TCs
            vmem_limit_bytes=vmem_limit),
    )(gt_slab, goh, pred_slab, pcls)


class YoloSimpleOTATargetPallas:
    """JAX/Pallas port of YoloSimpleOTATarget. Cost matrix + dynamic_k are
    computed on TPU; ragged matching bookkeeping happens host-side (numpy)."""

    def __init__(self, image_size, strides, num_classes,
                 g_max=8, p_max=128, btile=8):
        self.image_size = image_size
        self.strides = strides
        self.num_classes = num_classes
        self.g_max = g_max          # max gts per image (padded)
        self.p_max = p_max          # max candidates per image, multiple of 128
        self.btile = btile          # images per grid step (>=8 fills sublanes)
        self._last_kernel_out = None

    def __call__(self, predictions, targets, indices, anchors):
        # TODO(synk): padding / packing stays host-side (ragged, data-dependent
        # shapes); only the dense cost/dynamic_k hot path runs on TPU.
        preds = [np.asarray(p) for p in predictions]
        targets_np = np.asarray(targets)
        L = len(preds)
        B = preds[0].shape[0]
        C = self.num_classes
        G, P = self.g_max, self.p_max

        # >= 2 grid steps so v7x megacore can shard the batch across both TCs.
        steps = max(2, -(-B // self.btile))
        B_pad = steps * self.btile

        # packed slabs (4 device arrays instead of 12)
        gt_slab = np.zeros((B_pad, G, 8), np.float32)    # x1,y1,x2,y2,area,val
        gt_oh = np.zeros((B_pad, G, C), np.float32)
        pred_slab = np.zeros((B_pad, 8, P), np.float32)  # x1,y1,x2,y2,area,obj,val
        pr_cls_t = np.zeros((B_pad, C, P), np.float32)

        meta = [None] * B
        for batch_idx in range(B):
            sel = targets_np[:, 0] == batch_idx
            this_target = targets_np[sel]
            num_gt = this_target.shape[0]
            if num_gt == 0:
                continue

            cand_boxes, p_obj, p_cls = [], [], []
            layer_mask, all_b, all_a, all_gj, all_gi, all_anc = [], [], [], [], [], []
            for l, pred in enumerate(preds):
                b_arr, a_arr, gj_arr, gi_arr = [np.asarray(x) for x in indices[l]]
                lsel = b_arr == batch_idx
                bs, as_, gjs, gis = b_arr[lsel], a_arr[lsel], gj_arr[lsel], gi_arr[lsel]
                anc = np.asarray(anchors[l])[lsel]
                cand = pred[bs, as_, gjs, gis]                    # (n_l, 5+C)
                pxy = cand[:, :2] * self.strides[l]
                pwh = cand[:, 2:4] * self.strides[l]
                cand_boxes.append(np.concatenate(
                    [pxy - pwh / 2.0, pxy + pwh / 2.0], axis=-1))
                p_obj.append(cand[:, 4:5])
                p_cls.append(cand[:, 5:])
                layer_mask.append(np.full((len(bs),), l, np.int32))
                all_b.append(bs); all_a.append(as_)
                all_gj.append(gjs); all_gi.append(gis); all_anc.append(anc)

            cand_box = np.concatenate(cand_boxes, 0)
            p_real = cand_box.shape[0]
            if p_real == 0:
                continue
            assert num_gt <= G and p_real <= P

            xywh = this_target[:, 2:6] * self.image_size[0]
            gxyxy = np.concatenate(
                [xywh[:, :2] - xywh[:, 2:4] / 2.0,
                 xywh[:, :2] + xywh[:, 2:4] / 2.0], axis=-1)
            gt_slab[batch_idx, :num_gt, 0:4] = gxyxy
            gt_slab[batch_idx, :num_gt, 4] = ((gxyxy[:, 2] - gxyxy[:, 0])
                                              * (gxyxy[:, 3] - gxyxy[:, 1]))
            gt_slab[batch_idx, :num_gt, 5] = 1.0
            cls_ids = this_target[:, 1].astype(np.int64)
            gt_oh[batch_idx, np.arange(num_gt), cls_ids] = 1.0

            pred_slab[batch_idx, 0:4, :p_real] = cand_box.T
            pred_slab[batch_idx, 4, :p_real] = ((cand_box[:, 2] - cand_box[:, 0])
                                                * (cand_box[:, 3] - cand_box[:, 1]))
            pred_slab[batch_idx, 5, :p_real] = np.concatenate(p_obj, 0)[:, 0]
            pred_slab[batch_idx, 6, :p_real] = 1.0
            pr_cls_t[batch_idx, :, :p_real] = np.concatenate(p_cls, 0).T

            meta[batch_idx] = (this_target,
                               np.concatenate(all_b, 0), np.concatenate(all_a, 0),
                               np.concatenate(all_gj, 0), np.concatenate(all_gi, 0),
                               np.concatenate(all_anc, 0),
                               np.concatenate(layer_mask, 0), num_gt, p_real)

        # ---- Pallas hot path: cost matrix + dynamic_k ----
        kernel_out = ota_cost(
            jnp.asarray(gt_slab), jnp.asarray(gt_oh),
            jnp.asarray(pred_slab), jnp.asarray(pr_cls_t),
            btile=self.btile)
        kernel_out = jax.block_until_ready(kernel_out)
        self._last_kernel_out = kernel_out
        cost_all = np.asarray(kernel_out[0])[:B]
        dynk_all = np.asarray(kernel_out[1])[:B]

        # ---- host-side SimOTA matching + ragged per-layer grouping ----
        # TODO(synk): dynamic-k top-k assignment and boolean-mask gathers have
        # data-dependent shapes; kept on host to mirror torch semantics exactly.
        matching = [[[] for _ in range(L)] for _ in range(6)]
        for batch_idx in range(B):
            m = meta[batch_idx]
            if m is None:
                continue
            (this_target, all_b, all_a, all_gj, all_gi,
             all_anc, layer_mask, num_gt, p_real) = m
            c = cost_all[batch_idx, :num_gt, :p_real]
            ks = dynk_all[batch_idx, :num_gt, 0]

            M = np.zeros_like(c)
            for g in range(num_gt):
                pos = np.argsort(c[g], kind="stable")[:ks[g]]
                M[g, pos] = 1.0
            col_sum = M.sum(0)
            conflict = col_sum > 1
            if conflict.sum() > 0:
                argmin = np.argmin(c[:, conflict], axis=0)
                M[:, conflict] = 0.0
                M[argmin, conflict] = 1.0
            fg = M.sum(0) > 0.0
            matched_gt = M[:, fg].argmax(0)

            lm = layer_mask[fg]
            sels = (all_b[fg], all_a[fg], all_gj[fg], all_gi[fg],
                    this_target[matched_gt], all_anc[fg])
            for l in range(L):
                li = lm == l
                for out_i in range(6):
                    matching[out_i][l].append(sels[out_i][li])

        results = []
        for out_i in range(6):
            per_layer = []
            for l in range(L):
                if len(matching[out_i][l]) != 0:
                    per_layer.append(np.concatenate(matching[out_i][l], 0))
                else:
                    per_layer.append(np.zeros((0,), np.float32))
            results.append(per_layer)
        return tuple(results)


if __name__ == "__main__":
    key = jax.random.PRNGKey(0)
    B, A, C = 2, 3, 16
    image_size = (64, 64)
    strides = [8, 16, 32]

    keys = jax.random.split(key, 16)

    predictions = []
    for l, s in enumerate(strides):
        H = W = image_size[0] // s
        kxy, kwh, kconf = jax.random.split(keys[l], 3)
        pxy = jax.random.uniform(kxy, (B, A, H, W, 2)) * H
        pwh = jax.random.uniform(kwh, (B, A, H, W, 2)) * 2.5 + 0.5
        pconf = jax.nn.sigmoid(jax.random.normal(kconf, (B, A, H, W, 1 + C)))
        predictions.append(
            jnp.concatenate([pxy, pwh, pconf], axis=-1).astype(jnp.float32))

    # targets rows: [image_id, class, cx, cy, w, h] (normalized coords)
    k1, k2, k3 = jax.random.split(keys[4], 3)
    img_ids = jnp.array([0, 0, 0, 1, 1, 1], jnp.float32)
    cls = jax.random.randint(k1, (6,), 0, C).astype(jnp.float32)
    xy = jax.random.uniform(k2, (6, 2), minval=0.25, maxval=0.75)
    wh = jax.random.uniform(k3, (6, 2), minval=0.05, maxval=0.3)
    targets = jnp.concatenate(
        [img_ids[:, None], cls[:, None], xy, wh], axis=1).astype(jnp.float32)

    indices, anchors = [], []
    for l, s in enumerate(strides):
        H = W = image_size[0] // s
        kb, ka, kj, ki, kanc = jax.random.split(keys[8 + l], 5)
        n = 10
        indices.append((jax.random.randint(kb, (n,), 0, B),
                        jax.random.randint(ka, (n,), 0, A),
                        jax.random.randint(kj, (n,), 0, H),
                        jax.random.randint(ki, (n,), 0, W)))
        anchors.append(jax.random.uniform(kanc, (n, 2), minval=1.0, maxval=4.0)
                       .astype(jnp.float32))

    model = YoloSimpleOTATargetPallas(image_size, strides, num_classes=C)
    out = model(predictions, targets, indices, anchors)
    jax.block_until_ready(model._last_kernel_out)
    print("KERNEL_OK")
</pallas_src>

<mosaic_0001>
module attributes {stable_mosaic.version = 11 : i64} {
  func.func @_ota_cost_kernel(%arg0: i32, %arg1: memref<8x8x8xf32, #tpu.memory_space<vmem>>, %arg2: memref<8x8x16xf32, #tpu.memory_space<vmem>>, %arg3: memref<8x8x128xf32, #tpu.memory_space<vmem>>, %arg4: memref<8x16x128xf32, #tpu.memory_space<vmem>>, %arg5: memref<8x8x128xf32, #tpu.memory_space<vmem>>, %arg6: memref<8x8x1xi32, #tpu.memory_space<vmem>>) attributes {dimension_semantics = [#tpu.dimension_semantics<parallel>], iteration_bounds = array<i64: 2>, scalar_prefetch = 0 : i64, scratch_operands = 0 : i64, tpu.core_type = #tpu.core_type<tc>, window_params = [{transform_indices = @transform_0, window_bounds = array<i64: 8, 8, 8>}, {transform_indices = @transform_1, window_bounds = array<i64: 8, 8, 16>}, {transform_indices = @transform_2, window_bounds = array<i64: 8, 8, 128>}, {transform_indices = @transform_3, window_bounds = array<i64: 8, 16, 128>}, {transform_indices = @transform_4, window_bounds = array<i64: 8, 8, 128>}, {transform_indices = @transform_5, window_bounds = array<i64: 8, 8, 1>}]} {
    %c0 = arith.constant 0 : index
    %c5 = arith.constant 5 : index
    %c0_0 = arith.constant 0 : index
    %0 = vector.load %arg3[%c0, %c5, %c0_0] : memref<8x8x128xf32, #tpu.memory_space<vmem>>, vector<8x1x128xf32>
    %c0_1 = arith.constant 0 : index
    %c0_2 = arith.constant 0 : index
    %c0_3 = arith.constant 0 : index
    %1 = vector.load %arg4[%c0_1, %c0_2, %c0_3] : memref<8x16x128xf32, #tpu.memory_space<vmem>>, vector<8x16x128xf32>
    %2 = vector.broadcast %0 : vector<8x1x128xf32> to vector<8x16x128xf32>
    %3 = arith.mulf %1, %2 : vector<8x16x128xf32>
    %cst = arith.constant 9.99999982E-15 : f32
    %4 = vector.broadcast %cst : f32 to vector<8x16x128xf32>
    %5 = arith.maximumf %3, %4 : vector<8x16x128xf32>
    %6 = math.sqrt %5 : vector<8x16x128xf32>
    %cst_4 = arith.constant 0.99999988 : f32
    %7 = vector.broadcast %cst_4 : f32 to vector<8x16x128xf32>
    %8 = arith.minimumf %6, %7 : vector<8x16x128xf32>
    %9 = math.log %5 : vector<8x16x128xf32>
    %cst_5 = arith.constant 5.000000e-01 : f32
    %10 = vector.broadcast %cst_5 : f32 to vector<8x16x128xf32>
    %11 = arith.mulf %10, %9 : vector<8x16x128xf32>
    %cst_6 = arith.constant 1.000000e+00 : f32
    %12 = vector.broadcast %cst_6 : f32 to vector<8x16x128xf32>
    %13 = arith.subf %12, %8 : vector<8x16x128xf32>
    %14 = math.log %13 : vector<8x16x128xf32>
    %15 = arith.subf %11, %14 : vector<8x16x128xf32>
    %16 = arith.truncf %15 : vector<8x16x128xf32> to vector<8x16x128xbf16>
    %c0_7 = arith.constant 0 : index
    %c0_8 = arith.constant 0 : index
    %c0_9 = arith.constant 0 : index
    %17 = vector.load %arg2[%c0_7, %c0_8, %c0_9] : memref<8x8x16xf32, #tpu.memory_space<vmem>>, vector<8x8x16xf32>
    %18 = arith.truncf %17 : vector<8x8x16xf32> to vector<8x8x16xbf16>
    "tpu.trace_start"() <{level = 10 : i32, message = "bgc,bcp->bgp"}> : () -> ()
    %cst_10 = arith.constant dense<0.000000e+00> : vector<8x8x128xf32>
    %19 = tpu.matmul %18, %16, %cst_10 {dimension_numbers = #tpu.dot_dimension_numbers<[2], [1], [1], [2], [0, 0, 0, 1, 1, 2], [0], [0]>} : vector<8x8x16xbf16>, vector<8x16x128xbf16>, vector<8x8x128xf32> -> vector<8x8x128xf32>
    "tpu.trace_stop"() : () -> ()
    %cst_11 = arith.constant dense<0.000000e+00> : vector<8x128xf32>
    %20 = vector.multi_reduction <add>, %14, %cst_11 [1] : vector<8x16x128xf32> to vector<8x128xf32>
    %21 = vector.shape_cast %20 : vector<8x128xf32> to vector<8x1x128xf32>
    %22 = vector.broadcast %21 : vector<8x1x128xf32> to vector<8x8x128xf32>
    %23 = arith.addf %19, %22 : vector<8x8x128xf32>
    %cst_12 = arith.constant 0.000000e+00 : f32
    %24 = vector.broadcast %cst_12 : f32 to vector<8x8x128xf32>
    %25 = arith.subf %24, %23 : vector<8x8x128xf32>
    %c0_13 = arith.constant 0 : index
    %c0_14 = arith.constant 0 : index
    %c0_15 = arith.constant 0 : index
    %26 = vector.load %arg1[%c0_13, %c0_14, %c0_15] : memref<8x8x8xf32, #tpu.memory_space<vmem>>, vector<8x8x1xf32>
    %c0_16 = arith.constant 0 : index
    %c0_17 = arith.constant 0 : index
    %c1 = arith.constant 1 : index
    %27 = vector.load %arg1[%c0_16, %c0_17, %c1] : memref<8x8x8xf32, #tpu.memory_space<vmem>>, vector<8x8x1xf32>
    %c0_18 = arith.constant 0 : index
    %c0_19 = arith.constant 0 : index
    %c2 = arith.constant 2 : index
    %28 = vector.load %arg1[%c0_18, %c0_19, %c2] : memref<8x8x8xf32, #tpu.memory_space<vmem>>, vector<8x8x1xf32>
    %c0_20 = arith.constant 0 : index
    %c0_21 = arith.constant 0 : index
    %c3 = arith.constant 3 : index
    %29 = vector.load %arg1[%c0_20, %c0_21, %c3] : memref<8x8x8xf32, #tpu.memory_space<vmem>>, vector<8x8x1xf32>
    %c0_22 = arith.constant 0 : index
    %c0_23 = arith.constant 0 : index
    %c4 = arith.constant 4 : index
    %30 = vector.load %arg1[%c0_22, %c0_23, %c4] : memref<8x8x8xf32, #tpu.memory_space<vmem>>, vector<8x8x1xf32>
    %c0_24 = arith.constant 0 : index
    %c0_25 = arith.constant 0 : index
    %c5_26 = arith.constant 5 : index
    %31 = vector.load %arg1[%c0_24, %c0_25, %c5_26] : memref<8x8x8xf32, #tpu.memory_space<vmem>>, vector<8x8x1xf32>
    %c0_27 = arith.constant 0 : index
    %c0_28 = arith.constant 0 : index
    %c0_29 = arith.constant 0 : index
    %32 = vector.load %arg3[%c0_27, %c0_28, %c0_29] : memref<8x8x128xf32, #tpu.memory_space<vmem>>, vector<8x1x128xf32>
    %c0_30 = arith.constant 0 : index
    %c1_31 = arith.constant 1 : index
    %c0_32 = arith.constant 0 : index
    %33 = vector.load %arg3[%c0_30, %c1_31, %c0_32] : memref<8x8x128xf32, #tpu.memory_space<vmem>>, vector<8x1x128xf32>
    %c0_33 = arith.constant 0 : index
    %c2_34 = arith.constant 2 : index
    %c0_35 = arith.constant 0 : index
    %34 = vector.load %arg3[%c0_33, %c2_34, %c0_35] : memref<8x8x128xf32, #tpu.memory_space<vmem>>, vector<8x1x128xf32>
    %c0_36 = arith.constant 0 : index
    %c3_37 = arith.constant 3 : index
    %c0_38 = arith.constant 0 : index
    %35 = vector.load %arg3[%c0_36, %c3_37, %c0_38] : memref<8x8x128xf32, #tpu.memory_space<vmem>>, vector<8x1x128xf32>
    %c0_39 = arith.constant 0 : index
    %c4_40 = arith.constant 4 : index
    %c0_41 = arith.constant 0 : index
    %36 = vector.load %arg3[%c0_39, %c4_40, %c0_41] : memref<8x8x128xf32, #tpu.memory_space<vmem>>, vector<8x1x128xf32>
    %c0_42 = arith.constant 0 : index
    %c6 = arith.constant 6 : index
    %c0_43 = arith.constant 0 : index
    %37 = vector.load %arg3[%c0_42, %c6, %c0_43] : memref<8x8x128xf32, #tpu.memory_space<vmem>>, vector<8x1x128xf32>
    %38 = vector.broadcast %28 : vector<8x8x1xf32> to vector<8x8x128xf32>
    %39 = vector.broadcast %34 : vector<8x1x128xf32> to vector<8x8x128xf32>
    %40 = arith.minimumf %38, %39 : vector<8x8x128xf32>
    %41 = vector.broadcast %26 : vector<8x8x1xf32> to vector<8x8x128xf32>
    %42 = vector.broadcast %32 : vector<8x1x128xf32> to vector<8x8x128xf32>
    %43 = arith.maximumf %41, %42 : vector<8x8x128xf32>
    %44 = arith.subf %40, %43 : vector<8x8x128xf32>
    %cst_44 = arith.constant 0.000000e+00 : f32
    %45 = vector.broadcast %cst_44 : f32 to vector<8x8x128xf32>
    %46 = arith.maximumf %44, %45 : vector<8x8x128xf32>
    %47 = vector.broadcast %29 : vector<8x8x1xf32> to vector<8x8x128xf32>
    %48 = vector.broadcast %35 : vector<8x1x128xf32> to vector<8x8x128xf32>
    %49 = arith.minimumf %47, %48 : vector<8x8x128xf32>
    %50 = vector.broadcast %27 : vector<8x8x1xf32> to vector<8x8x128xf32>
    %51 = vector.broadcast %33 : vector<8x1x128xf32> to vector<8x8x128xf32>
    %52 = arith.maximumf %50, %51 : vector<8x8x128xf32>
    %53 = arith.subf %49, %52 : vector<8x8x128xf32>
    %cst_45 = arith.constant 0.000000e+00 : f32
    %54 = vector.broadcast %cst_45 : f32 to vector<8x8x128xf32>
    %55 = arith.maximumf %53, %54 : vector<8x8x128xf32>
    %56 = arith.mulf %46, %55 : vector<8x8x128xf32>
    %57 = vector.broadcast %30 : vector<8x8x1xf32> to vector<8x8x128xf32>
    %58 = vector.broadcast %36 : vector<8x1x128xf32> to vector<8x8x128xf32>
    %59 = arith.addf %57, %58 : vector<8x8x128xf32>
    %60 = arith.subf %59, %56 : vector<8x8x128xf32>
    %cst_46 = arith.constant 9.99999971E-10 : f32
    %61 = vector.broadcast %cst_46 : f32 to vector<8x8x128xf32>
    %62 = arith.maximumf %60, %61 : vector<8x8x128xf32>
    %63 = tpu.reciprocal %62 {approx = true} : vector<8x8x128xf32> -> vector<8x8x128xf32>
    %64 = arith.mulf %56, %63 : vector<8x8x128xf32>
    %cst_47 = arith.constant 5.000000e-01 : f32
    %65 = vector.broadcast %cst_47 : f32 to vector<8x8x1xf32>
    %66 = arith.cmpf ogt, %31, %65 : vector<8x8x1xf32>
    %cst_48 = arith.constant 5.000000e-01 : f32
    %67 = vector.broadcast %cst_48 : f32 to vector<8x1x128xf32>
    %68 = arith.cmpf ogt, %37, %67 : vector<8x1x128xf32>
    %69 = vector.broadcast %66 : vector<8x8x1xi1> to vector<8x8x128xi1>
    %70 = vector.broadcast %68 : vector<8x1x128xi1> to vector<8x8x128xi1>
    %71 = arith.andi %69, %70 : vector<8x8x128xi1>
    %cst_49 = arith.constant 0.000000e+00 : f32
    %72 = vector.broadcast %cst_49 : f32 to vector<8x8x128xf32>
    %73 = arith.select %71, %64, %72 : vector<8x8x128xi1>, vector<8x8x128xf32>
    %cst_50 = arith.constant 9.99999974E-6 : f32
    %74 = vector.broadcast %cst_50 : f32 to vector<8x8x128xf32>
    %75 = arith.addf %73, %74 : vector<8x8x128xf32>
    %76 = math.log %75 : vector<8x8x128xf32>
    %cst_51 = arith.constant 3.000000e+00 : f32
    %77 = vector.broadcast %cst_51 : f32 to vector<8x8x128xf32>
    %78 = arith.mulf %77, %76 : vector<8x8x128xf32>
    %79 = arith.subf %25, %78 : vector<8x8x128xf32>
    %c0_52 = arith.constant 0 : index
    %c0_53 = arith.constant 0 : index
    %c0_54 = arith.constant 0 : index
    %80 = vector.load %arg5[%c0_52, %c0_53, %c0_54] : memref<8x8x128xf32, #tpu.memory_space<vmem>>, vector<8x8x128xf32>
    tpu.vector_store %arg5[%c0_52, %c0_53, %c0_54], %79 {strides = array<i32>} : memref<8x8x128xf32, #tpu.memory_space<vmem>>, vector<8x8x128xf32>,
    %cst_55 = arith.constant 0.000000e+00 : f32
    %81 = vector.broadcast %cst_55 : f32 to vector<8x8x1xf32>
    %c0_i32 = arith.constant 0 : i32
    %cst_56 = arith.constant dense<0xFF800000> : vector<8x8xf32>
    %82 = vector.multi_reduction <maximumf>, %73, %cst_56 [2] : vector<8x8x128xf32> to vector<8x8xf32>
    %83 = vector.shape_cast %82 : vector<8x8xf32> to vector<8x8x1xf32>
    %cst_57 = arith.constant 0.000000e+00 : f32
    %84 = vector.broadcast %cst_57 : f32 to vector<8x8x1xf32>
    %85 = arith.maximumf %83, %84 : vector<8x8x1xf32>
    %86 = arith.addf %81, %85 : vector<8x8x1xf32>
    %87 = vector.broadcast %83 : vector<8x8x1xf32> to vector<8x8x128xf32>
    %88 = arith.cmpf oeq, %73, %87 : vector<8x8x128xf32>
    %cst_58 = arith.constant -1.000000e+00 : f32
    %89 = vector.broadcast %cst_58 : f32 to vector<8x8x128xf32>
    %90 = arith.select %88, %89, %73 : vector<8x8x128xi1>, vector<8x8x128xf32>
    %c1_i32 = arith.constant 1 : i32
    %cst_59 = arith.constant dense<0xFF800000> : vector<8x8xf32>
    %91 = vector.multi_reduction <maximumf>, %90, %cst_59 [2] : vector<8x8x128xf32> to vector<8x8xf32>
    %92 = vector.shape_cast %91 : vector<8x8xf32> to vector<8x8x1xf32>
    %cst_60 = arith.constant 0.000000e+00 : f32
    %93 = vector.broadcast %cst_60 : f32 to vector<8x8x1xf32>
    %94 = arith.maximumf %92, %93 : vector<8x8x1xf32>
    %95 = arith.addf %86, %94 : vector<8x8x1xf32>
    %96 = vector.broadcast %92 : vector<8x8x1xf32> to vector<8x8x128xf32>
    %97 = arith.cmpf oeq, %90, %96 : vector<8x8x128xf32>
    %cst_61 = arith.constant -1.000000e+00 : f32
    %98 = vector.broadcast %cst_61 : f32 to vector<8x8x128xf32>
    %99 = arith.select %97, %98, %90 : vector<8x8x128xi1>, vector<8x8x128xf32>
    %c2_i32 = arith.constant 2 : i32
    %cst_62 = arith.constant dense<0xFF800000> : vector<8x8xf32>
    %100 = vector.multi_reduction <maximumf>, %99, %cst_62 [2] : vector<8x8x128xf32> to vector<8x8xf32>
    %101 = vector.shape_cast %100 : vector<8x8xf32> to vector<8x8x1xf32>
    %cst_63 = arith.constant 0.000000e+00 : f32
    %102 = vector.broadcast %cst_63 : f32 to vector<8x8x1xf32>
    %103 = arith.maximumf %101, %102 : vector<8x8x1xf32>
    %104 = arith.addf %95, %103 : vector<8x8x1xf32>
    %105 = vector.broadcast %101 : vector<8x8x1xf32> to vector<8x8x128xf32>
    %106 = arith.cmpf oeq, %99, %105 : vector<8x8x128xf32>
    %cst_64 = arith.constant -1.000000e+00 : f32
    %107 = vector.broadcast %cst_64 : f32 to vector<8x8x128xf32>
    %108 = arith.select %106, %107, %99 : vector<8x8x128xi1>, vector<8x8x128xf32>
    %c3_i32 = arith.constant 3 : i32
    %cst_65 = arith.constant dense<0xFF800000> : vector<8x8xf32>
    %109 = vector.multi_reduction <maximumf>, %108, %cst_65 [2] : vector<8x8x128xf32> to vector<8x8xf32>
    %110 = vector.shape_cast %109 : vector<8x8xf32> to vector<8x8x1xf32>
    %cst_66 = arith.constant 0.000000e+00 : f32
    %111 = vector.broadcast %cst_66 : f32 to vector<8x8x1xf32>
    %112 = arith.maximumf %110, %111 : vector<8x8x1xf32>
    %113 = arith.addf %104, %112 : vector<8x8x1xf32>
    %114 = vector.broadcast %110 : vector<8x8x1xf32> to vector<8x8x128xf32>
    %115 = arith.cmpf oeq, %108, %114 : vector<8x8x128xf32>
    %cst_67 = arith.constant -1.000000e+00 : f32
    %116 = vector.broadcast %cst_67 : f32 to vector<8x8x128xf32>
    %117 = arith.select %115, %116, %108 : vector<8x8x128xi1>, vector<8x8x128xf32>
    %c4_i32 = arith.constant 4 : i32
    %cst_68 = arith.constant dense<0xFF800000> : vector<8x8xf32>
    %118 = vector.multi_reduction <maximumf>, %117, %cst_68 [2] : vector<8x8x128xf32> to vector<8x8xf32>
    %119 = vector.shape_cast %118 : vector<8x8xf32> to vector<8x8x1xf32>
    %cst_69 = arith.constant 0.000000e+00 : f32
    %120 = vector.broadcast %cst_69 : f32 to vector<8x8x1xf32>
    %121 = arith.maximumf %119, %120 : vector<8x8x1xf32>
    %122 = arith.addf %113, %121 : vector<8x8x1xf32>
    %123 = vector.broadcast %119 : vector<8x8x1xf32> to vector<8x8x128xf32>
    %124 = arith.cmpf oeq, %117, %123 : vector<8x8x128xf32>
    %cst_70 = arith.constant -1.000000e+00 : f32
    %125 = vector.broadcast %cst_70 : f32 to vector<8x8x128xf32>
    %126 = arith.select %124, %125, %117 : vector<8x8x128xi1>, vector<8x8x128xf32>
    %c5_i32 = arith.constant 5 : i32
    %cst_71 = arith.constant dense<0xFF800000> : vector<8x8xf32>
    %127 = vector.multi_reduction <maximumf>, %126, %cst_71 [2] : vector<8x8x128xf32> to vector<8x8xf32>
    %128 = vector.shape_cast %127 : vector<8x8xf32> to vector<8x8x1xf32>
    %cst_72 = arith.constant 0.000000e+00 : f32
    %129 = vector.broadcast %cst_72 : f32 to vector<8x8x1xf32>
    %130 = arith.maximumf %128, %129 : vector<8x8x1xf32>
    %131 = arith.addf %122, %130 : vector<8x8x1xf32>
    %132 = vector.broadcast %128 : vector<8x8x1xf32> to vector<8x8x128xf32>
    %133 = arith.cmpf oeq, %126, %132 : vector<8x8x128xf32>
    %cst_73 = arith.constant -1.000000e+00 : f32
    %134 = vector.broadcast %cst_73 : f32 to vector<8x8x128xf32>
    %135 = arith.select %133, %134, %126 : vector<8x8x128xi1>, vector<8x8x128xf32>
    %c6_i32 = arith.constant 6 : i32
    %cst_74 = arith.constant dense<0xFF800000> : vector<8x8xf32>
    %136 = vector.multi_reduction <maximumf>, %135, %cst_74 [2] : vector<8x8x128xf32> to vector<8x8xf32>
    %137 = vector.shape_cast %136 : vector<8x8xf32> to vector<8x8x1xf32>
    %cst_75 = arith.constant 0.000000e+00 : f32
    %138 = vector.broadcast %cst_75 : f32 to vector<8x8x1xf32>
    %139 = arith.maximumf %137, %138 : vector<8x8x1xf32>
    %140 = arith.addf %131, %139 : vector<8x8x1xf32>
    %141 = vector.broadcast %137 : vector<8x8x1xf32> to vector<8x8x128xf32>
    %142 = arith.cmpf oeq, %135, %141 : vector<8x8x128xf32>
    %cst_76 = arith.constant -1.000000e+00 : f32
    %143 = vector.broadcast %cst_76 : f32 to vector<8x8x128xf32>
    %144 = arith.select %142, %143, %135 : vector<8x8x128xi1>, vector<8x8x128xf32>
    %c7_i32 = arith.constant 7 : i32
    %cst_77 = arith.constant dense<0xFF800000> : vector<8x8xf32>
    %145 = vector.multi_reduction <maximumf>, %144, %cst_77 [2] : vector<8x8x128xf32> to vector<8x8xf32>
    %146 = vector.shape_cast %145 : vector<8x8xf32> to vector<8x8x1xf32>
    %cst_78 = arith.constant 0.000000e+00 : f32
    %147 = vector.broadcast %cst_78 : f32 to vector<8x8x1xf32>
    %148 = arith.maximumf %146, %147 : vector<8x8x1xf32>
    %149 = arith.addf %140, %148 : vector<8x8x1xf32>
    %150 = vector.broadcast %146 : vector<8x8x1xf32> to vector<8x8x128xf32>
    %151 = arith.cmpf oeq, %144, %150 : vector<8x8x128xf32>
    %cst_79 = arith.constant -1.000000e+00 : f32
    %152 = vector.broadcast %cst_79 : f32 to vector<8x8x128xf32>
    %153 = arith.select %151, %152, %144 : vector<8x8x128xi1>, vector<8x8x128xf32>
    %c8_i32 = arith.constant 8 : i32
    %cst_80 = arith.constant dense<0xFF800000> : vector<8x8xf32>
    %154 = vector.multi_reduction <maximumf>, %153, %cst_80 [2] : vector<8x8x128xf32> to vector<8x8xf32>
    %155 = vector.shape_cast %154 : vector<8x8xf32> to vector<8x8x1xf32>
    %cst_81 = arith.constant 0.000000e+00 : f32
    %156 = vector.broadcast %cst_81 : f32 to vector<8x8x1xf32>
    %157 = arith.maximumf %155, %156 : vector<8x8x1xf32>
    %158 = arith.addf %149, %157 : vector<8x8x1xf32>
    %159 = vector.broadcast %155 : vector<8x8x1xf32> to vector<8x8x128xf32>
    %160 = arith.cmpf oeq, %153, %159 : vector<8x8x128xf32>
    %cst_82 = arith.constant -1.000000e+00 : f32
    %161 = vector.broadcast %cst_82 : f32 to vector<8x8x128xf32>
    %162 = arith.select %160, %161, %153 : vector<8x8x128xi1>, vector<8x8x128xf32>
    %c9_i32 = arith.constant 9 : i32
    %cst_83 = arith.constant dense<0xFF800000> : vector<8x8xf32>
    %163 = vector.multi_reduction <maximumf>, %162, %cst_83 [2] : vector<8x8x128xf32> to vector<8x8xf32>
    %164 = vector.shape_cast %163 : vector<8x8xf32> to vector<8x8x1xf32>
    %cst_84 = arith.constant 0.000000e+00 : f32
    %165 = vector.broadcast %cst_84 : f32 to vector<8x8x1xf32>
    %166 = arith.maximumf %164, %165 : vector<8x8x1xf32>
    %167 = arith.addf %158, %166 : vector<8x8x1xf32>
    %168 = vector.broadcast %164 : vector<8x8x1xf32> to vector<8x8x128xf32>
    %169 = arith.cmpf oeq, %162, %168 : vector<8x8x128xf32>
    %cst_85 = arith.constant -1.000000e+00 : f32
    %170 = vector.broadcast %cst_85 : f32 to vector<8x8x128xf32>
    %171 = arith.select %169, %170, %162 : vector<8x8x128xi1>, vector<8x8x128xf32>
    %c10_i32 = arith.constant 10 : i32
    %cst_86 = arith.constant dense<0xFF800000> : vector<8x8xf32>
    %172 = vector.multi_reduction <maximumf>, %171, %cst_86 [2] : vector<8x8x128xf32> to vector<8x8xf32>
    %173 = vector.shape_cast %172 : vector<8x8xf32> to vector<8x8x1xf32>
    %cst_87 = arith.constant 0.000000e+00 : f32
    %174 = vector.broadcast %cst_87 : f32 to vector<8x8x1xf32>
    %175 = arith.maximumf %173, %174 : vector<8x8x1xf32>
    %176 = arith.addf %167, %175 : vector<8x8x1xf32>
    %177 = vector.broadcast %173 : vector<8x8x1xf32> to vector<8x8x128xf32>
    %178 = arith.cmpf oeq, %171, %177 : vector<8x8x128xf32>
    %cst_88 = arith.constant -1.000000e+00 : f32
    %179 = vector.broadcast %cst_88 : f32 to vector<8x8x128xf32>
    %180 = arith.select %178, %179, %171 : vector<8x8x128xi1>, vector<8x8x128xf32>
    %c11_i32 = arith.constant 11 : i32
    %cst_89 = arith.constant dense<0xFF800000> : vector<8x8xf32>
    %181 = vector.multi_reduction <maximumf>, %180, %cst_89 [2] : vector<8x8x128xf32> to vector<8x8xf32>
    %182 = vector.shape_cast %181 : vector<8x8xf32> to vector<8x8x1xf32>
    %cst_90 = arith.constant 0.000000e+00 : f32
    %183 = vector.broadcast %cst_90 : f32 to vector<8x8x1xf32>
    %184 = arith.maximumf %182, %183 : vector<8x8x1xf32>
    %185 = arith.addf %176, %184 : vector<8x8x1xf32>
    %186 = vector.broadcast %182 : vector<8x8x1xf32> to vector<8x8x128xf32>
    %187 = arith.cmpf oeq, %180, %186 : vector<8x8x128xf32>
    %cst_91 = arith.constant -1.000000e+00 : f32
    %188 = vector.broadcast %cst_91 : f32 to vector<8x8x128xf32>
    %189 = arith.select %187, %188, %180 : vector<8x8x128xi1>, vector<8x8x128xf32>
    %c12_i32 = arith.constant 12 : i32
    %cst_92 = arith.constant dense<0xFF800000> : vector<8x8xf32>
    %190 = vector.multi_reduction <maximumf>, %189, %cst_92 [2] : vector<8x8x128xf32> to vector<8x8xf32>
    %191 = vector.shape_cast %190 : vector<8x8xf32> to vector<8x8x1xf32>
    %cst_93 = arith.constant 0.000000e+00 : f32
    %192 = vector.broadcast %cst_93 : f32 to vector<8x8x1xf32>
    %193 = arith.maximumf %191, %192 : vector<8x8x1xf32>
    %194 = arith.addf %185, %193 : vector<8x8x1xf32>
    %195 = vector.broadcast %191 : vector<8x8x1xf32> to vector<8x8x128xf32>
    %196 = arith.cmpf oeq, %189, %195 : vector<8x8x128xf32>
    %cst_94 = arith.constant -1.000000e+00 : f32
    %197 = vector.broadcast %cst_94 : f32 to vector<8x8x128xf32>
    %198 = arith.select %196, %197, %189 : vector<8x8x128xi1>, vector<8x8x128xf32>
    %c13_i32 = arith.constant 13 : i32
    %cst_95 = arith.constant dense<0xFF800000> : vector<8x8xf32>
    %199 = vector.multi_reduction <maximumf>, %198, %cst_95 [2] : vector<8x8x128xf32> to vector<8x8xf32>
    %200 = vector.shape_cast %199 : vector<8x8xf32> to vector<8x8x1xf32>
    %cst_96 = arith.constant 0.000000e+00 : f32
    %201 = vector.broadcast %cst_96 : f32 to vector<8x8x1xf32>
    %202 = arith.maximumf %200, %201 : vector<8x8x1xf32>
    %203 = arith.addf %194, %202 : vector<8x8x1xf32>
    %204 = vector.broadcast %200 : vector<8x8x1xf32> to vector<8x8x128xf32>
    %205 = arith.cmpf oeq, %198, %204 : vector<8x8x128xf32>
    %cst_97 = arith.constant -1.000000e+00 : f32
    %206 = vector.broadcast %cst_97 : f32 to vector<8x8x128xf32>
    %207 = arith.select %205, %206, %198 : vector<8x8x128xi1>, vector<8x8x128xf32>
    %c14_i32 = arith.constant 14 : i32
    %cst_98 = arith.constant dense<0xFF800000> : vector<8x8xf32>
    %208 = vector.multi_reduction <maximumf>, %207, %cst_98 [2] : vector<8x8x128xf32> to vector<8x8xf32>
    %209 = vector.shape_cast %208 : vector<8x8xf32> to vector<8x8x1xf32>
    %cst_99 = arith.constant 0.000000e+00 : f32
    %210 = vector.broadcast %cst_99 : f32 to vector<8x8x1xf32>
    %211 = arith.maximumf %209, %210 : vector<8x8x1xf32>
    %212 = arith.addf %203, %211 : vector<8x8x1xf32>
    %213 = vector.broadcast %209 : vector<8x8x1xf32> to vector<8x8x128xf32>
    %214 = arith.cmpf oeq, %207, %213 : vector<8x8x128xf32>
    %cst_100 = arith.constant -1.000000e+00 : f32
    %215 = vector.broadcast %cst_100 : f32 to vector<8x8x128xf32>
    %216 = arith.select %214, %215, %207 : vector<8x8x128xi1>, vector<8x8x128xf32>
    %c15_i32 = arith.constant 15 : i32
    %cst_101 = arith.constant dense<0xFF800000> : vector<8x8xf32>
    %217 = vector.multi_reduction <maximumf>, %216, %cst_101 [2] : vector<8x8x128xf32> to vector<8x8xf32>
    %218 = vector.shape_cast %217 : vector<8x8xf32> to vector<8x8x1xf32>
    %cst_102 = arith.constant 0.000000e+00 : f32
    %219 = vector.broadcast %cst_102 : f32 to vector<8x8x1xf32>
    %220 = arith.maximumf %218, %219 : vector<8x8x1xf32>
    %221 = arith.addf %212, %220 : vector<8x8x1xf32>
    %222 = vector.broadcast %218 : vector<8x8x1xf32> to vector<8x8x128xf32>
    %223 = arith.cmpf oeq, %216, %222 : vector<8x8x128xf32>
    %cst_103 = arith.constant -1.000000e+00 : f32
    %224 = vector.broadcast %cst_103 : f32 to vector<8x8x128xf32>
    %225 = arith.select %223, %224, %216 : vector<8x8x128xi1>, vector<8x8x128xf32>
    %c16_i32 = arith.constant 16 : i32
    %cst_104 = arith.constant dense<0xFF800000> : vector<8x8xf32>
    %226 = vector.multi_reduction <maximumf>, %225, %cst_104 [2] : vector<8x8x128xf32> to vector<8x8xf32>
    %227 = vector.shape_cast %226 : vector<8x8xf32> to vector<8x8x1xf32>
    %cst_105 = arith.constant 0.000000e+00 : f32
    %228 = vector.broadcast %cst_105 : f32 to vector<8x8x1xf32>
    %229 = arith.maximumf %227, %228 : vector<8x8x1xf32>
    %230 = arith.addf %221, %229 : vector<8x8x1xf32>
    %231 = vector.broadcast %227 : vector<8x8x1xf32> to vector<8x8x128xf32>
    %232 = arith.cmpf oeq, %225, %231 : vector<8x8x128xf32>
    %cst_106 = arith.constant -1.000000e+00 : f32
    %233 = vector.broadcast %cst_106 : f32 to vector<8x8x128xf32>
    %234 = arith.select %232, %233, %225 : vector<8x8x128xi1>, vector<8x8x128xf32>
    %c17_i32 = arith.constant 17 : i32
    %cst_107 = arith.constant dense<0xFF800000> : vector<8x8xf32>
    %235 = vector.multi_reduction <maximumf>, %234, %cst_107 [2] : vector<8x8x128xf32> to vector<8x8xf32>
    %236 = vector.shape_cast %235 : vector<8x8xf32> to vector<8x8x1xf32>
    %cst_108 = arith.constant 0.000000e+00 : f32
    %237 = vector.broadcast %cst_108 : f32 to vector<8x8x1xf32>
    %238 = arith.maximumf %236, %237 : vector<8x8x1xf32>
    %239 = arith.addf %230, %238 : vector<8x8x1xf32>
    %240 = vector.broadcast %236 : vector<8x8x1xf32> to vector<8x8x128xf32>
    %241 = arith.cmpf oeq, %234, %240 : vector<8x8x128xf32>
    %cst_109 = arith.constant -1.000000e+00 : f32
    %242 = vector.broadcast %cst_109 : f32 to vector<8x8x128xf32>
    %243 = arith.select %241, %242, %234 : vector<8x8x128xi1>, vector<8x8x128xf32>
    %c18_i32 = arith.constant 18 : i32
    %cst_110 = arith.constant dense<0xFF800000> : vector<8x8xf32>
    %244 = vector.multi_reduction <maximumf>, %243, %cst_110 [2] : vector<8x8x128xf32> to vector<8x8xf32>
    %245 = vector.shape_cast %244 : vector<8x8xf32> to vector<8x8x1xf32>
    %cst_111 = arith.constant 0.000000e+00 : f32
    %246 = vector.broadcast %cst_111 : f32 to vector<8x8x1xf32>
    %247 = arith.maximumf %245, %246 : vector<8x8x1xf32>
    %248 = arith.addf %239, %247 : vector<8x8x1xf32>
    %249 = vector.broadcast %245 : vector<8x8x1xf32> to vector<8x8x128xf32>
    %250 = arith.cmpf oeq, %243, %249 : vector<8x8x128xf32>
    %cst_112 = arith.constant -1.000000e+00 : f32
    %251 = vector.broadcast %cst_112 : f32 to vector<8x8x128xf32>
    %252 = arith.select %250, %251, %243 : vector<8x8x128xi1>, vector<8x8x128xf32>
    %c19_i32 = arith.constant 19 : i32
    %cst_113 = arith.constant dense<0xFF800000> : vector<8x8xf32>
    %253 = vector.multi_reduction <maximumf>, %252, %cst_113 [2] : vector<8x8x128xf32> to vector<8x8xf32>
    %254 = vector.shape_cast %253 : vector<8x8xf32> to vector<8x8x1xf32>
    %cst_114 = arith.constant 0.000000e+00 : f32
    %255 = vector.broadcast %cst_114 : f32 to vector<8x8x1xf32>
    %256 = arith.maximumf %254, %255 : vector<8x8x1xf32>
    %257 = arith.addf %248, %256 : vector<8x8x1xf32>
    %258 = vector.broadcast %254 : vector<8x8x1xf32> to vector<8x8x128xf32>
    %259 = arith.cmpf oeq, %252, %258 : vector<8x8x128xf32>
    %cst_115 = arith.constant -1.000000e+00 : f32
    %260 = vector.broadcast %cst_115 : f32 to vector<8x8x128xf32>
    %261 = arith.select %259, %260, %252 : vector<8x8x128xi1>, vector<8x8x128xf32>
    %262 = arith.fptosi %257 : vector<8x8x1xf32> to vector<8x8x1xi32>
    %c1_i32_116 = arith.constant 1 : i32
    %263 = vector.broadcast %c1_i32_116 : i32 to vector<8x8x1xi32>
    %264 = arith.maxsi %262, %263 : vector<8x8x1xi32>
    %c0_117 = arith.constant 0 : index
    %c0_118 = arith.constant 0 : index
    %c0_119 = arith.constant 0 : index
    %265 = vector.load %arg6[%c0_117, %c0_118, %c0_119] : memref<8x8x1xi32, #tpu.memory_space<vmem>>, vector<8x8x1xi32>
    tpu.vector_store %arg6[%c0_117, %c0_118, %c0_119], %264 {strides = array<i32>} : memref<8x8x1xi32, #tpu.memory_space<vmem>>, vector<8x8x1xi32>,
    return
  }
  func.func @transform_0(%arg0: i32) -> (i32, i32, i32) {
    %c0_i32 = arith.constant 0 : i32
    %c0_i32_0 = arith.constant 0 : i32
    %c0_i32_1 = arith.constant 0 : i32
    return %arg0, %c0_i32, %c0_i32_0 : i32, i32, i32
  }
  func.func @transform_1(%arg0: i32) -> (i32, i32, i32) {
    %c0_i32 = arith.constant 0 : i32
    %c0_i32_0 = arith.constant 0 : i32
    %c0_i32_1 = arith.constant 0 : i32
    return %arg0, %c0_i32, %c0_i32_0 : i32, i32, i32
  }
  func.func @transform_2(%arg0: i32) -> (i32, i32, i32) {
    %c0_i32 = arith.constant 0 : i32
    %c0_i32_0 = arith.constant 0 : i32
    %c0_i32_1 = arith.constant 0 : i32
    return %arg0, %c0_i32, %c0_i32_0 : i32, i32, i32
  }
  func.func @transform_3(%arg0: i32) -> (i32, i32, i32) {
    %c0_i32 = arith.constant 0 : i32
    %c0_i32_0 = arith.constant 0 : i32
    %c0_i32_1 = arith.constant 0 : i32
    return %arg0, %c0_i32, %c0_i32_0 : i32, i32, i32
  }
  func.func @transform_4(%arg0: i32) -> (i32, i32, i32) {
    %c0_i32 = arith.constant 0 : i32
    %c0_i32_0 = arith.constant 0 : i32
    %c0_i32_1 = arith.constant 0 : i32
    return %arg0, %c0_i32, %c0_i32_0 : i32, i32, i32
  }
  func.func @transform_5(%arg0: i32) -> (i32, i32, i32) {
    %c0_i32 = arith.constant 0 : i32
    %c0_i32_0 = arith.constant 0 : i32
    %c0_i32_1 = arith.constant 0 : i32
    return %arg0, %c0_i32, %c0_i32_0 : i32, i32, i32
  }
}

</mosaic_0001>

<bundles_post_ra>
// kernel: ota_cost.1
= control target key start
LH: loop header
LB: loop body
LE: loop exit
PB: predicated region body
PF: predicated region fallthrough
CT: control target
= control target key end

     0   :  { %11 = vsyncpa [#allocation3], 0  ;;  %s4878_s0 = inlined_call_operand.vmem [shape: f32[16,8,8], index: 0, kind: input, shape index: {}]   ;;  %s4879_s1 = inlined_call_operand.vmem [shape: f32[16,8,16], index: 1, kind: input, shape index: {}]   ;;  %s4880_s2 = inlined_call_operand.hbm [shape: f32[16,8,128], index: 2, kind: input, shape index: {}]   ;;  %s4881_s3 = inlined_call_operand.hbm [shape: f32[16,16,128], index: 3, kind: input, shape index: {}]   ;;  %s4882_s4 = inlined_call_operand.hbm [shape: f32[16,8,128], index: 4, kind: output, shape index: {0}]   ;;  %s4883_s5 = inlined_call_operand.vmem [shape: s32[16,8,1], index: 5, kind: output, shape index: {1}]  }
   0x1   :  { %13 = vsyncpa [#allocation3 + $0x1], 0 }
   0x2   :  { %14 = vsyncpa [#allocation6], 0 }
   0x3   :  { %16 = vsyncpa [#allocation6 + $0x1], 0 }
   0x4   :  { %17 = vsyncpa [#allocation4], 0 }
   0x5   :  { %19 = vsyncpa [#allocation4 + $0x1], 0  ;;  %s3461_s18 = smov 0   ;;  %s3463_s19 = smov 0  }
   0x6   :  { %s3465_s20 = smov 0   ;;  %s3467_s21 = smov 0  }
   0x7 LB: > { %s3482_s22 = sadd.s32 4294967295, %s3414_s21   ;;  %s2916_s23 = sadd.s32 4294967294, %s3414_s21   ;;  %s3414_s21 = sphi %s3467_s21, %s5022_s21   ;;  %s3410_s20 = sphi %s3465_s20, %s5021_s20   ;;  %s3406_s19 = sphi %s3463_s19, %s5020_s19   ;;  %s3402_s18 = sphi %s3461_s18, %s5019_s18  }
   0x8   : > { %s3486_s24 = sadd.s32 1, %s3414_s21   ;;  %s84_s25 = sadd.s32 1, %s3410_s20 }
   0x9   : > { %s81_s26 = ssub.s32 %s3414_s21, %s3486_s24  ;;  %p91_p0 = scmp.ne.s32.totalorder %s3410_s20, %s3406_s19 }
   0xa   : > { %p82_p1 = scmp.eq.s32.totalorder %s81_s26, 0  ;;  %p92_p2 = scmp.eq.s32.totalorder %s3414_s21, 0 }
   0xb   : > { %p97_p3 = scmp.ne.s32.totalorder %s3406_s19, %s3402_s18  ;;  %p98_p4 = scmp.eq.s32.totalorder %s3482_s22, 0 }
   0xc   : > { %s3498_s27 = scalar_select %p82_p1, %s3410_s20, %s84_s25  }
   0xd   : > { %p3500_p5 = por %p92_p2, %p91_p0  ;;  %p3504_p6 = por %p98_p4, %p97_p3 }
   0xe   : > { %p147_p7 = scmp.eq.s32.totalorder %s3482_s22, 1  ;;  %p153_p8 = scmp.eq.s32.totalorder %s2916_s23, 1 }
   0xf   : > { %s4931_s29 = scalar_select %p3504_p6, 1, 0 }
  0x10   : > { %p3098_p10 = scmp.lt.s32.totalorder %s3414_s21, 2  ;;  %p3511_p11 = por %p147_p7, %p91_p0 }
  0x11   : > { %p3515_p12 = por %p153_p8, %p97_p3  ;;  %s3520_s7 = sand.u32 1, %s3410_s20  }
  0x12   : > { %s4932_s30 = scalar_select %p3511_p11, 1, 0 }
  0x13   : > { %s4933_s6 = scalar_select %p3515_p12, 1, 0 }
  0x14   : > { %s2997_s8 = sshll.u32 %s3414_s21, 10  ;;  %s2919_s9 = sshll.u32 %s3520_s7, 6 }
  0x15   : > { %s3527_s12 = scalar_lea.hbm %s4880_s2, %s2997_s8  ;;  %s221_s13 = scalar_lea.vmem [#allocation2], %s2919_s9 }
  0x16   : > { %s228_s14 = sshll.u32 %s221_s13, 4  ;;  %p3531_p13 = pnand %p3098_p10, %p3500_p5  ;;  %s3535_s14 = int_to_ptr.vmem [resolvable:$true] %s228_s14 }
  0x17   : > { %s218_s16 = scalar_lea.sflag [#allocation3], %s3520_s7  ;;  %s3284_s17 = scalar_lea.hbm %s3527_s12, 1024 }
  0x18   : > { %p3285_p0 = scmp.ne.s32.totalorder %s3527_s12, %s3284_s17  ;;  %p3286_p1 = pneg %p3531_p13 }
  0x19   : > { %s3289_s26 = scalar_lea.hbm %s4880_s2, 2048  ;;  %p3290_p4 = scmp.lt.u32.totalorder %s3527_s12, %s4880_s2 }
  0x1a   : > { %p3287_p2 = pnand %p3286_p1, %p3285_p0  ;;  %p3291_p5 = scmp.lt.u32.totalorder %s3289_s26, %s3284_s17 }
  0x1b   : > { %p3293_p8 = scmp.lt.u32.totalorder %s3284_s17, %s3527_s12 }
  0x1c   : > { %p3288_p3 = pneg %p3287_p2  ;;  %p3292_p7 = por %p3291_p5, %p3290_p4 }
  0x1e   : > { %p3294_p10 = por %p3293_p8, %p3292_p7 }
  0x20   : > { %p3295_p9 = pnand %p3294_p10, %p3288_p3 }
  0x22   : > { %3298 = shalt.err (!%p3295_p9)
}
  0x23   : > { %s3299_s9 = scalar_lea.vmem %s3535_s14, 1024  ;;  %s3416_s10 = smov [#allocation2]  }
  0x24   : > { %p3300_p0 = scmp.ne.s32.totalorder %s3535_s14, %s3299_s9  ;;  %s3304_s11 = sshll.u32 %s3416_s10, 4  ;;  %s3305_s11 = int_to_ptr.vmem [resolvable:$false] %s3304_s11 }
  0x25   : > { %s3306_s13 = scalar_lea.vmem %s3305_s11, 2048  ;;  %p3307_p11 = scmp.lt.s32.totalorder %s3535_s14, %s3305_s11 }
  0x26   : > { %p3302_p2 = pnand %p3300_p0, %p3286_p1  ;;  %p3308_p4 = scmp.lt.s32.totalorder %s3306_s13, %s3299_s9 }
  0x28   : > { %p3303_p12 = pneg %p3302_p2  ;;  %p3309_p5 = por %p3308_p4, %p3307_p11 }
  0x2a   : > { %p3310_p7 = pnand %p3309_p5, %p3303_p12 }
  0x2c   : > { %3313 = shalt.err (!%p3310_p7)
}
  0x2d   : > { %s3417_s17 = smov 128   ;;  %s3418_s23 = smov 8  }
  0x2e   : > { %3090 = dma.hbm_to_vmem [thread:$0]  (!%p3531_p13), %s3527_s12, 1024, %s3535_s14, %s218_s16, %s3417_s17, %s3417_s17, %s3418_s23  }
  0x2f   : > { %p2926_p9 = scmp.ge.s32.totalorder %s3414_s21, 1  ;;  %p258_p11 = scmp.lt.s32.totalorder %s3414_s21, 3 }
  0x30   : > { %s2922_s25 = sshll.u32 %s3520_s7, 7  ;;  %s2999_s28 = sshll.u32 %s3414_s21, 11 }
  0x31   : > { %p3571_p12 = pnand %p2926_p9, %p258_p11  ;;  %s242_s8 = scalar_lea.vmem [#allocation5], %s2922_s25 }
  0x32   : > { %s250_s9 = sshll.u32 %s242_s8, 4  ;;  %s3579_s13 = scalar_lea.hbm %s4881_s3, %s2999_s28  ;;  %s3581_s9 = int_to_ptr.vmem [resolvable:$true] %s250_s9 }
  0x33   : > { %s239_s12 = scalar_lea.sflag [#allocation6], %s3520_s7  ;;  %s3314_s14 = scalar_lea.hbm %s3579_s13, 2048 }
  0x34   : > { %p3315_p3 = scmp.ne.s32.totalorder %s3579_s13, %s3314_s14  ;;  %s3319_s8 = scalar_lea.hbm %s4881_s3, 4096 }
  0x35   : > { %p3320_p0 = scmp.lt.u32.totalorder %s3579_s13, %s4881_s3  ;;  %p3321_p2 = scmp.lt.u32.totalorder %s3319_s8, %s3314_s14 }
  0x36   : > { %p3317_p8 = pnand %p3315_p3, %p3286_p1  ;;  %p3323_p5 = scmp.lt.u32.totalorder %s3314_s14, %s3579_s13 }
  0x37   : > { %p3322_p4 = por %p3321_p2, %p3320_p0 }
  0x38   : > { %p3318_p10 = pneg %p3317_p8 }
  0x39   : > { %p3324_p7 = por %p3323_p5, %p3322_p4 }
  0x3b   : > { %p3325_p9 = pnand %p3324_p7, %p3318_p10 }
  0x3d   : > { %3328 = shalt.err (!%p3325_p9)
}
  0x3e   : > { %s3329_s11 = scalar_lea.vmem %s3581_s9, 2048  ;;  %s3419_s16 = smov [#allocation5]  }
  0x3f   : > { %p3330_p11 = scmp.ne.s32.totalorder %s3581_s9, %s3329_s11  ;;  %s3334_s25 = sshll.u32 %s3419_s16, 4  ;;  %s3335_s25 = int_to_ptr.vmem [resolvable:$false] %s3334_s25 }
  0x40   : > { %s3336_s10 = scalar_lea.vmem %s3335_s25, 4096  ;;  %p3337_p6 = scmp.lt.s32.totalorder %s3581_s9, %s3335_s25 }
  0x41   : > { %p3332_p3 = pnand %p3330_p11, %p3286_p1  ;;  %p3338_p0 = scmp.lt.s32.totalorder %s3336_s10, %s3329_s11 }
  0x43   : > { %p3333_p8 = pneg %p3332_p3  ;;  %p3339_p2 = por %p3338_p0, %p3337_p6 }
  0x45   : > { %p3340_p4 = pnand %p3339_p2, %p3333_p8 }
  0x47   : > { %3343 = shalt.err (!%p3340_p4)
}
  0x48   : > { %3093 = dma.hbm_to_vmem [thread:$0]  (!%p3531_p13), %s3579_s13, 2048, %s3581_s9, %s239_s12, %s3417_s17, %s3417_s17, %s3418_s23  }
  0x49   : > { %262 = sbr.rel (%p3571_p12) target bundleno = 3220 (0xc94), region = 36 }
  0x50   : > { %s3615_s14 = sand.u32 1, %s3406_s19   ;;  %p4936_p6 = scmp.ne.s32.totalorder %s4931_s29, 0 }
  0x51   : > { %s2927_s8 = sshll.u32 %s3615_s14, 6  ;;  %s265_s15 = scalar_lea.sflag [#allocation3], %s3615_s14 }
  0x52   : > { %s3621_s28 = scalar_lea.vmem [#allocation2], %s2927_s8 }
  0x53   : > { %3389 = dma.done.wait (%p4936_p6), %s265_s15, 1024  }
  0x54   : > { %3391 = vsyncadd (%p4936_p6), %s265_s15, 4294966272  ;;  %s2928_s7 = sshll.u32 %s3615_s14, 7  ;;  %s274_s17 = scalar_lea.sflag [#allocation6], %s3615_s14 }
  0x55   : > { %s3629_s23 = scalar_lea.vmem [#allocation5], %s2928_s7 }
  0x56   : > { %3393 = dma.done.wait (%p4936_p6), %s274_s17, 2048  }
  0x57   : > { %3395 = vsyncadd (%p4936_p6), %s274_s17, 4294965248  ;;  %s2930_s26 = sshll.u32 %s3482_s22, 3  ;;  %v3420_v0 = vmov 2   ;;  %v3421_v1 = vmov 0.0   ;;  %vm3422_vm0 = vmmov 0   ;;  %v354_v7 = vld [vmem:[%s3629_s23] sm:$0xff] }
  0x58   : > { %3145 = vset.pattern.permute.xlu1 %v3420_v0  ;;  %3144 = vset.pattern.permute.xlu0 %v3420_v0  ;;  %p325_p13 = scmp.lt.s32.totalorder %s2930_s26, 15  ;;  %v2936_v6 = vld [vmem:[%s3621_s28 + $0x5] ss:$0 sm:$0xff]  ;;  %v355_v8 = vld [vmem:[%s3629_s23 + $0x8] sm:$0xff]  ;;  %v356_v12 = vld [vmem:[%s3629_s23 + $0x10] sm:$0xff]  ;;  %v4886_v42 = vmov 0  }
  0x59   : > { %3017 = vmatprep.subr.bf16.mxu0 %v3421_v1  ;;  %3023 = vmatprep.subr.bf16.mxu1 %v3421_v1  ;;  %v2937_v9 = vld [vmem:[%s3621_s28 + $0xd] ss:$0 sm:$0xff]  ;;  %v402_v10 = vmul.f32 %v2936_v6, %v354_v7  ;;  %v403_v11 = vmul.f32 %v2936_v6, %v355_v8  ;;  %v357_v13 = vld [vmem:[%s3629_s23 + $0x18] sm:$0xff]  ;;  %v2938_v17 = vld [vmem:[%s3621_s28 + $0x15] ss:$0 sm:$0xff]  ;;  %s4336_s10 = scalar_lea.vmem [#allocation7], %s2927_s8 }
  0x5a   : > { %s5024_s26 = smov (!%p325_p13, %s2930_s26), 15  ;;  %3019 = vmatprep.mubr.msk.bf16.mxu0 %vm3422_vm0, %v3421_v1  ;;  %3025 = vmatprep.mubr.msk.bf16.mxu1 %vm3422_vm0, %v3421_v1  ;;  %v404_v15 = vmul.f32 %v2937_v9, %v356_v12  ;;  %v405_v16 = vmul.f32 %v2937_v9, %v357_v13  ;;  %v358_v18 = vld [vmem:[%s3629_s23 + $0x20] sm:$0xff]  ;;  %v359_v22 = vld [vmem:[%s3629_s23 + $0x28] sm:$0xff]  ;;  %v2939_v27 = vld [vmem:[%s3621_s28 + $0x1d] ss:$0 sm:$0xff]  ;;  %s2767_s8 = sshll.u32 %s4336_s10, 4  ;;  %s4762_s8 = int_to_ptr.vmem [resolvable:$true] %s2767_s8 }
  0x5b   : > { %s3642_s29 = sshll.u32 %s5024_s26, 3  ;;  %v3680_v20 = vmax.f32 %v402_v10, 1e-14  ;;  %v3682_v21 = vmax.f32 %v403_v11, 1e-14  ;;  %v406_v24 = vmul.f32 %v2938_v17, %v358_v18  ;;  %v407_v26 = vmul.f32 %v2938_v17, %v359_v22  ;;  %v360_v28 = vld [vmem:[%s3629_s23 + $0x30] sm:$0xff] }
  0x5c   : > { %s3648_s12 = scalar_lea.vmem %s4878_s0, %s3642_s29  ;;  %v3686_v23 = vmax.f32 %v404_v15, 1e-14  ;;  %v3691_v25 = vmax.f32 %v405_v16, 1e-14  ;;  %v361_v31 = vld [vmem:[%s3629_s23 + $0x38] sm:$0xff]  ;;  %s3709_s25 = scalar_lea.vmem %s4879_s1, %s3642_s29  ;;  %v408_v33 = vmul.f32 %v2939_v27, %v360_v28  ;;  %v362_v38 = vld [vmem:[%s3629_s23 + $0x40] sm:$0xff] }
  0x5d   : > { %v3651_v2 = vld [vmem:[%s3648_s12 + $0x10] sm:$0xff]  ;;  %v3654_v3 = vld [vmem:[%s3648_s12] sm:$0xff]  ;;  %v3659_v4 = vld [vmem:[%s3648_s12 + $0x18] sm:$0xff]  ;;  %3156 = vrsqrt.f32 %v3680_v20  ;;  %v3711_v32 = vmax.f32 %v406_v24, 1e-14  ;;  %v409_v35 = vmul.f32 %v2939_v27, %v361_v31  ;;  %vm436_vm1 = vcmp.eq.f32.partialorder %v3680_v20, inf }
  0x5e   : > { %1175 = vperm.xlu1 %3145, %v3651_v2   ;;  %1165 = vperm.xlu0 %3144, %v3654_v3   ;;  %v3662_v5 = vld [vmem:[%s3648_s12 + $0x8] sm:$0xff]  ;;  %v3678_v19 = vld [vmem:[%s3648_s12 + $0x20] sm:$0xff]  ;;  %3158 = vrsqrt.f32 %v3682_v21  ;;  %v3696_v29 = vld [vmem:[%s3648_s12 + $0x38] sm:$0xff]  ;;  %v3716_v34 = vmax.f32 %v407_v26, 1e-14  ;;  %vm438_vm2 = vcmp.eq.f32.partialorder %v3680_v20, 0.0 }
  0x5f   : > { %v3673_v14 = vld [vmem:[%s3648_s12 + $0x28] sm:$0xff]  ;;  %v3699_v30 = vld [vmem:[%s3648_s12 + $0x30] sm:$0xff]  ;;  %3160 = vlog2.f32 %v3680_v20  ;;  %v439_v36 = vand.u32 2147483648, %v3680_v20  ;;  %v2940_v37 = vld [vmem:[%s3621_s28 + $0x25] ss:$0 sm:$0xff]  ;;  %vm443_vm3 = vcmp.eq.f32.partialorder %v3682_v21, inf }
  0x60   : > { %3162 = vlog2.f32 %v3682_v21  ;;  %vm445_vm4 = vcmp.eq.f32.partialorder %v3682_v21, 0.0  ;;  %v446_v39 = vand.u32 2147483648, %v3682_v21  ;;  %v3729_v40 = vld [vmem:[%s3709_s25] sm:$0xff]  ;;  %vm450_vm5 = vcmp.eq.f32.partialorder %v3686_v23, inf  ;;  %v363_v45 = vld [vmem:[%s3629_s23 + $0x48] sm:$0xff]  ;;  %v364_v51 = vld [vmem:[%s3629_s23 + $0x50] sm:$0xff] }
  0x61   : > { %3164 = vrsqrt.f32 %v3686_v23  ;;  %vm452_vm6 = vcmp.eq.f32.partialorder %v3686_v23, 0.0  ;;  %v3734_v41 = vmax.f32 %v408_v33, 1e-14  ;;  %v453_v43 = vand.u32 2147483648, %v3686_v23  ;;  %v2941_v50 = vld [vmem:[%s3621_s28 + $0x2d] ss:$0 sm:$0xff] }
  0x62   : > { %1180 = vperm.xlu1 %3145, %v3659_v4   ;;  %1170 = vperm.xlu0 %3144, %v3662_v5   ;;  %3166 = vrsqrt.f32 %v3691_v25  ;;  %v3740_v44 = vmax.f32 %v409_v35, 1e-14  ;;  %v410_v46 = vmul.f32 %v2940_v37, %v362_v38  ;;  %vm457_vm7 = vcmp.eq.f32.partialorder %v3691_v25, inf  ;;  %v365_v55 = vld [vmem:[%s3629_s23 + $0x58] sm:$0xff]  ;;  %s3000_s15 = sshll.u32 %s3482_s22, 10  ;;  %s3344_s26 = scalar_lea.vmem %s4762_s8, 1024 }
  0x63   : > { %3168 = vlog2.f32 %v3686_v23  ;;  %vm459_vm8 = vcmp.eq.f32.partialorder %v3691_v25, 0.0  ;;  %v460_v48 = vand.u32 2147483648, %v3691_v25  ;;  %v690_v49 = vpack.c.bf16 %v3729_v40, %v3729_v40  ;;  %s4768_s17 = scalar_lea.hbm %s4882_s4, %s3000_s15  ;;  %p3345_p1 = scmp.ne.s32.totalorder %s4762_s8, %s3344_s26 }
  0x64   : > { %3170 = vlog2.f32 %v3691_v25  ;;  %vm464_vm9 = vcmp.eq.f32.partialorder %v3711_v32, inf  ;;  %v467_v54 = vand.u32 2147483648, %v3711_v32  ;;  %vm466_vm10 = vcmp.eq.f32.partialorder %v3711_v32, 0.0  ;;  %p4998_p12 = scmp.ne.s32.totalorder %s4932_s30, 0  ;;  %s3428_s9 = smov [#allocation7]  }
  0x65   : > { %3172 = vrsqrt.f32 %v3711_v32  ;;  %vm471_vm11 = vcmp.eq.f32.partialorder %v3716_v34, inf  ;;  %v474_v58 = vand.u32 2147483648, %v3716_v34  ;;  %v411_v59 = vmul.f32 %v2940_v37, %v363_v45  ;;  %s3348_s13 = sshll.u32 %s3428_s9, 4  ;;  %s3349_s13 = int_to_ptr.vmem [resolvable:$false] %s3348_s13 }
  0x66   : > { %1190 = vperm.xlu1 %3145, %v3673_v14   ;;  %1185 = vperm.xlu0 %3144, %v3678_v19   ;;  %3174 = vrsqrt.f32 %v3716_v34  ;;  %vm473_vm12 = vcmp.eq.f32.partialorder %v3716_v34, 0.0  ;;  %v3767_v62 = vmax.f32 %v410_v46, 1e-14  ;;  %v3769_v63 = vmul.f32 %v2941_v50, %v364_v51  ;;  %p3346_p10 = pnand %p3345_p1, %p4998_p12  ;;  %s3350_s12 = scalar_lea.vmem %s3349_s13, 2048 }
  0x67   : > { %v3157_v47 = vpop.eup %3156  ;;  %3176 = vlog2.f32 %v3711_v32  ;;  %v3779_v8 = vmul.f32 %v2941_v50, %v365_v55  ;;  %v481_v13 = vand.u32 2147483648, %v3734_v41  ;;  %vm478_vm13 = vcmp.eq.f32.partialorder %v3734_v41, inf  ;;  %p3351_p7 = scmp.lt.s32.totalorder %s4762_s8, %s3349_s13  ;;  %p3352_p9 = scmp.lt.s32.totalorder %s3350_s12, %s3344_s26 }
  0x68   : > { %v3159_v52 = vpop.eup %3158  ;;  %v435_v53 = vmul.f32 %v3157_v47, %v3680_v20  ;;  %3178 = vrsqrt.f32 %v3734_v41  ;;  %vm485_vm14 = vcmp.eq.f32.partialorder %v3740_v44, inf  ;;  %vm480_vm15 = vcmp.eq.f32.partialorder %v3734_v41, 0.0  ;;  %p3347_p5 = pneg %p3346_p10 }
  0x69   : > { %v3161_v56 = vpop.eup %3160  ;;  %v442_v57 = vmul.f32 %v3159_v52, %v3682_v21  ;;  %3180 = vrsqrt.f32 %v3740_v44  ;;  %v488_v22 = vand.u32 2147483648, %v3740_v44  ;;  %v3809_v50 = vmax.f32 %v411_v59, 1e-14  ;;  %p3353_p11 = por %p3352_p9, %p3351_p7 }
  0x6a   : > { %1200 = vperm.xlu1 %3145, %v3696_v29   ;;  %1195 = vperm.xlu0 %3144, %v3699_v30   ;;  %v3163_v60 = vpop.eup %3162  ;;  %v437_v61 = vsel %vm436_vm1, %v3680_v20, %v435_v53  ;;  %3182 = vlog2.f32 %v3716_v34  ;;  %vm487_vm1 = vcmp.eq.f32.partialorder %v3740_v44, 0.0  ;;  %v563_v26 = vmul.f32 0.6931472, %v3161_v56 }
  0x6b   : > { %v3165_v0 = vpop.eup %3164  ;;  %v440_v6 = vsel %vm438_vm2, %v439_v36, %v437_v61  ;;  %v444_v7 = vsel %vm443_vm3, %v3682_v21, %v442_v57  ;;  %3184 = vlog2.f32 %v3734_v41  ;;  %v565_v35 = vmul.f32 0.6931472, %v3163_v60  ;;  %p3354_p3 = pnand %p3353_p11, %p3347_p5 }
  0x6c   : > { %v3167_v9 = vpop.eup %3166  ;;  %v447_v10 = vsel %vm445_vm4, %v446_v39, %v444_v7  ;;  %v546_v11 = vmin.f32 %v440_v6, 0.9999999  ;;  %v449_v12 = vmul.f32 %v3165_v0, %v3686_v23  ;;  %3186 = vrsqrt.f32 %v3767_v62 }
  0x6d   : > { %v3169_v15 = vpop.eup %3168  ;;  %v547_v16 = vmin.f32 %v447_v10, 0.9999999  ;;  %v456_v17 = vmul.f32 %v3167_v9, %v3691_v25  ;;  %v3819_v55 = vmul.f32 0.5, %v565_v35  ;;  %v3424_v10 = vmov 3  }
  0x6e   : > { %3147 = vset.pattern.permute.xlu1 %v4886_v42  ;;  %3146 = vset.pattern.permute.xlu0 %v4886_v42  ;;  %v3171_v18 = vpop.eup %3170  ;;  %v610_v20 = vsub.f32 1.0, %v546_v11  ;;  %v451_v21 = vsel %vm450_vm5, %v3686_v23, %v449_v12  ;;  %v567_v39 = vmul.f32 0.6931472, %v3169_v15  ;;  %vm492_vm2 = vcmp.eq.f32.partialorder %v3767_v62, inf }
  0x6f   : > { %1248 = vperm.xlu1 %3147, %v3662_v5   ;;  %1244 = vperm.xlu0 %3146, %v3654_v3   ;;  %v3173_v24 = vpop.eup %3172  ;;  %v611_v27 = vsub.f32 1.0, %v547_v16  ;;  %v454_v28 = vsel %vm452_vm6, %v453_v43, %v451_v21  ;;  %v458_v31 = vsel %vm457_vm7, %v3691_v25, %v456_v17  ;;  %v569_v47 = vmul.f32 0.6931472, %v3171_v18 }
  0x70   : > { %v3175_v33 = vpop.eup %3174  ;;  %3188 = vlog2.f32 %v610_v20  ;;  %v461_v36 = vsel %vm459_vm8, %v460_v48, %v458_v31  ;;  %v548_v37 = vmin.f32 %v454_v28, 0.9999999  ;;  %v463_v45 = vmul.f32 %v3173_v24, %v3711_v32 }
  0x71   : > { %3190 = vlog2.f32 %v611_v27  ;;  %v549_v38 = vmin.f32 %v461_v36, 0.9999999  ;;  %v3177_v46 = vpop.eup %3176  ;;  %v470_v43 = vmul.f32 %v3175_v33, %v3716_v34  ;;  %v3813_v25 = vmul.f32 0.5, %v563_v26 }
  0x72   : > { %v612_v23 = vsub.f32 1.0, %v548_v37  ;;  %v3179_v51 = vpop.eup %3178  ;;  %v465_v52 = vsel %vm464_vm9, %v3711_v32, %v463_v45  ;;  %3192 = vlog2.f32 %v3740_v44  ;;  %v3828_v60 = vmul.f32 0.5, %v567_v39 }
  0x73   : > { %1252 = vperm.xlu1 %3147, %v3651_v2   ;;  %1256 = vperm.xlu0 %3146, %v3659_v4   ;;  %v613_v48 = vsub.f32 1.0, %v549_v38  ;;  %v3181_v53 = vpop.eup %3180  ;;  %v468_v56 = vsel %vm466_vm10, %v467_v54, %v465_v52  ;;  %v472_v57 = vsel %vm471_vm11, %v3716_v34, %v470_v43  ;;  %v3834_v6 = vmul.f32 0.5, %v569_v47 }
  0x74   : > { %3194 = vlog2.f32 %v612_v23  ;;  %v3183_v59 = vpop.eup %3182  ;;  %v475_v61 = vsel %vm473_vm12, %v474_v58, %v472_v57  ;;  %v550_v0 = vmin.f32 %v468_v56, 0.9999999  ;;  %v477_v32 = vmul.f32 %v3179_v51, %v3734_v41 }
  0x75   : > { %3196 = vlog2.f32 %v613_v48  ;;  %v551_v7 = vmin.f32 %v475_v61, 0.9999999  ;;  %v484_v54 = vmul.f32 %v3181_v53, %v3740_v44  ;;  %v3185_v9 = vpop.eup %3184  ;;  %v571_v11 = vmul.f32 0.6931472, %v3177_v46  ;;  %v3892_v61 = vld [vmem:[%s3709_s25 + $0x10] sm:$0xff] }
  0x76   : > { %v614_v12 = vsub.f32 1.0, %v550_v0  ;;  %3198 = vrsqrt.f32 %v3809_v50  ;;  %v3187_v34 = vpop.eup %3186  ;;  %v573_v58 = vmul.f32 0.6931472, %v3183_v59  ;;  %v479_v16 = vsel %vm478_vm13, %v3734_v41, %v477_v32  ;;  %v683_v59 = vld [vmem:[%s3709_s25 + $0x8] sm:$0xff] }
  0x77   : > { %1260 = vperm.xlu1 %3147, %v3678_v19   ;;  %1264 = vperm.xlu0 %3146, %v3673_v14   ;;  %v615_v15 = vsub.f32 1.0, %v551_v7  ;;  %v486_v17 = vsel %vm485_vm14, %v3740_v44, %v484_v54  ;;  %v482_v18 = vsel %vm480_vm15, %v481_v13, %v479_v16  ;;  %vm494_vm3 = vcmp.eq.f32.partialorder %v3767_v62, 0.0  ;;  %v2942_v54 = vld [vmem:[%s3621_s28 + $0x35] ss:$0 sm:$0xff] }
  0x78   : > { %3200 = vlog2.f32 %v614_v12  ;;  %v489_v20 = vsel %vm487_vm1, %v488_v22, %v486_v17  ;;  %vm754_vm4 = vcmask 130048   ;;  %v552_v24 = vmin.f32 %v482_v18, 0.9999999 }
  0x79   : > { %3202 = vlog2.f32 %v615_v15  ;;  %v553_v26 = vmin.f32 %v489_v20, 0.9999999  ;;  %v495_v27 = vand.u32 2147483648, %v3767_v62  ;;  %v3856_v33 = vmul.f32 0.5, %v571_v11  ;;  %v367_v15 = vld [vmem:[%s3629_s23 + $0x68] sm:$0xff] }
  0x7a   : > { %v3189_v21 = vpop.eup %3188  ;;  %v3858_v35 = vmul.f32 0.6931472, %v3185_v9  ;;  %v491_v41 = vmul.f32 %v3187_v34, %v3767_v62  ;;  %v616_v13 = vsub.f32 1.0, %v552_v24  ;;  %vm499_vm5 = vcmp.eq.f32.partialorder %v3809_v50, inf  ;;  %v366_v9 = vld [vmem:[%s3629_s23 + $0x60] sm:$0xff] }
  0x7b   : > { %1268 = vperm.xlu1 %3147, %v3699_v30   ;;  %1272 = vperm.xlu0 %3146, %v3696_v29   ;;  %v3191_v28 = vpop.eup %3190  ;;  %v627_v31 = vmul.f32 0.6931472, %v3189_v21  ;;  %v617_v22 = vsub.f32 1.0, %v553_v26  ;;  %3204 = vlog2.f32 %v3767_v62  ;;  %v3870_v39 = vmax.f32 %v3769_v63, 1e-14 }
  0x7c   : > { %v629_v44 = vmul.f32 0.6931472, %v3191_v28  ;;  %v3193_v36 = vpop.eup %3192  ;;  %v493_v38 = vsel %vm492_vm2, %v3767_v62, %v491_v41  ;;  %3206 = vlog2.f32 %v616_v13  ;;  %v3878_v48 = vmax.f32 %v3779_v8, 1e-14 }
  0x7d   : > { %v658_v37 = vsub.f32 %v3813_v25, %v627_v31  ;;  %v496_v23 = vsel %vm494_vm3, %v495_v27, %v493_v38  ;;  %3208 = vlog2.f32 %v617_v22  ;;  %vm501_vm6 = vcmp.eq.f32.partialorder %v3809_v50, 0.0 }
  0x7e   : > { %v3195_v45 = vpop.eup %3194  ;;  %v659_v46 = vsub.f32 %v3819_v55, %v629_v44  ;;  %v3873_v47 = vadd.f32 %v629_v44, %v627_v31  ;;  %v554_v25 = vmin.f32 %v496_v23, 0.9999999  ;;  %3210 = vrsqrt.f32 %v3870_v39 }
  0x7f   : > { %3148 = vset.pattern.permute.xlu1 %v3424_v10  ;;  %3149 = vset.pattern.permute.xlu0 %v3424_v10  ;;  %v3197_v43 = vpop.eup %3196  ;;  %v631_v51 = vmul.f32 0.6931472, %v3195_v45  ;;  %v502_v55 = vand.u32 2147483648, %v3809_v50  ;;  %3212 = vlog2.f32 %v3809_v50  ;;  %v599_v7 = vmul.f32 0.5, %v573_v58 }
  0x80   : > { %1332 = vperm.xlu1 %3148, %v3654_v3   ;;  %1336 = vperm.xlu0 %3149, %v3662_v5   ;;  %v674_v63 = vpack.c.bf16 %v659_v46, %v658_v37  ;;  %v633_v52 = vmul.f32 0.6931472, %v3197_v43  ;;  %v3199_v62 = vpop.eup %3198  ;;  %v618_v8 = vsub.f32 1.0, %v554_v25  ;;  %3214 = vrsqrt.f32 %v3878_v48  ;;  %v369_v46 = vld [vmem:[%s3629_s23 + $0x78] sm:$0xff] }
  0x81   : > { %v660_v53 = vsub.f32 %v3828_v60, %v631_v51  ;;  %v498_v0 = vmul.f32 %v3199_v62, %v3809_v50  ;;  %v577_v32 = vmul.f32 0.6931472, %v3193_v36  ;;  %v3425_v11 = vmov 1   ;;  %v368_v36 = vld [vmem:[%s3629_s23 + $0x70] sm:$0xff]  ;;  %s2749_s23 = scalar_lea.sflag [#allocation4], %s3615_s14 }
  0x82   : > { %3018 = vmatpush3.bf16.msra.mxu0 %v674_v63  ;;  %v661_v56 = vsub.f32 %v3834_v6, %v633_v52  ;;  %v3888_v57 = vadd.f32 %v633_v52, %v631_v51  ;;  %v3201_v60 = vpop.eup %3200  ;;  %3216 = vlog2.f32 %v618_v8  ;;  %v691_v58 = vpack.c.bf16 %v683_v59, %v683_v59  ;;  %v685_v52 = vld [vmem:[%s3709_s25 + $0x18] sm:$0xff] }
  0x83   : > { %3029 = vmatprep.subr.bf16.mxu0 %v3421_v1  ;;  %v3203_v10 = vpop.eup %3202  ;;  %v3900_v12 = vmul.f32 0.6931472, %v3201_v60  ;;  %v500_v34 = vsel %vm499_vm5, %v3809_v50, %v498_v0  ;;  %v692_v17 = vpack.c.bf16 %v3892_v61, %v3892_v61  ;;  %v600_v21 = vmul.f32 0.5, %v3858_v35  ;;  %v2943_v35 = vld [vmem:[%s3621_s28 + $0x3d] ss:$0 sm:$0xff] }
  0x84   : > { %1340 = vperm.xlu1 %3148, %v3651_v2   ;;  %1348 = vperm.xlu0 %3149, %v3678_v19   ;;  %v675_v6 = vpack.c.bf16 %v661_v56, %v660_v53  ;;  %v3911_v16 = vmul.f32 0.6931472, %v3203_v10  ;;  %v503_v18 = vsel %vm501_vm6, %v502_v55, %v500_v34  ;;  %v601_v27 = vmul.f32 0.5, %v577_v32 }
  0x85   : > { %3020 = vmatmul.mubr.msk.bf16.vlgmr.msra.gmra.mrb[0].mxu0 %vm754_vm4, %v690_v49  ;;  %v662_v20 = vsub.f32 %v3856_v33, %v3900_v12  ;;  %v555_v40 = vmin.f32 %v503_v18, 0.9999999  ;;  %v414_v49 = vmul.f32 %v2942_v54, %v366_v9  ;;  %v3205_v24 = vpop.eup %3204  ;;  %vm506_vm7 = vcmp.eq.f32.partialorder %v3870_v39, inf }
  0x86   : > { %3024 = vmatpush3.bf16.msra.mxu1 %v675_v6  ;;  %3031 = vmatprep.mubr.msk.bf16.mxu0 %vm3422_vm0, %v3421_v1  ;;  %v663_v26 = vsub.f32 %v599_v7, %v3911_v16  ;;  %v415_v50 = vmul.f32 %v2942_v54, %v367_v15  ;;  %v3207_v28 = vpop.eup %3206  ;;  %vm508_vm8 = vcmp.eq.f32.partialorder %v3870_v39, 0.0  ;;  %3218 = vlog2.f32 %v3870_v39 }
  0x87   : > { %3035 = vmatprep.subr.bf16.mxu1 %v3421_v1  ;;  %v619_v31 = vsub.f32 1.0, %v555_v40  ;;  %v3928_v33 = vmax.f32 %v414_v49, 1e-14  ;;  %v3209_v41 = vpop.eup %3208  ;;  %v3932_v13 = vmul.f32 0.6931472, %v3207_v28  ;;  %3220 = vlog2.f32 %v3878_v48 }
  0x88   : > { %1344 = vperm.xlu1 %3148, %v3659_v4   ;;  %1356 = vperm.xlu0 %3149, %v3699_v30   ;;  %v676_v44 = vpack.c.bf16 %v663_v26, %v662_v20  ;;  %v3936_v22 = vmax.f32 %v415_v50, 1e-14  ;;  %v3211_v37 = vpop.eup %3210  ;;  %v3939_v38 = vmul.f32 0.6931472, %v3209_v41  ;;  %v509_v45 = vand.u32 2147483648, %v3870_v39 }
  0x89   : > { %3026 = vmatmul.mubr.msk.bf16.vlgmr.msra.gmra.mrb[0].mxu1 %vm754_vm4, %v691_v58  ;;  %3222 = vlog2.f32 %v619_v31  ;;  %vm513_vm9 = vcmp.eq.f32.partialorder %v3878_v48, inf  ;;  %v3213_v23 = vpop.eup %3212  ;;  %v664_v43 = vsub.f32 %v600_v21, %v3932_v13  ;;  %v505_v51 = vmul.f32 %v3211_v37, %v3870_v39 }
  0x8a   : > { %3037 = vmatprep.mubr.msk.bf16.mxu1 %vm3422_vm0, %v3421_v1  ;;  %3030 = vmatpush3.bf16.msra.mxu0 %v676_v44  ;;  %vm515_vm10 = vcmp.eq.f32.partialorder %v3878_v48, 0.0  ;;  %3224 = vrsqrt.f32 %v3928_v33  ;;  %v3215_v25 = vpop.eup %3214  ;;  %v665_v63 = vsub.f32 %v601_v27, %v3939_v38  ;;  %v516_v62 = vand.u32 2147483648, %v3878_v48 }
  0x8b   : > { %3041 = vmatprep.subr.bf16.mxu0 %v3421_v1  ;;  %3226 = vrsqrt.f32 %v3936_v22  ;;  %v416_v53 = vmul.f32 %v2943_v35, %v368_v36  ;;  %v579_v8 = vmul.f32 0.6931472, %v3205_v24  ;;  %v507_v56 = vsel %vm506_vm7, %v3870_v39, %v505_v51  ;;  %v686_v36 = vld [vmem:[%s3709_s25 + $0x20] sm:$0xff] }
  0x8c   : > { %1352 = vperm.xlu1 %3148, %v3673_v14   ;;  %3150 = vset.pattern.permute.xlu0 %v3425_v11  ;;  %v3217_v55 = vpop.eup %3216  ;;  %v512_v59 = vmul.f32 %v3215_v25, %v3878_v48  ;;  %v417_v61 = vmul.f32 %v2943_v35, %v369_v46  ;;  %v677_v0 = vpack.c.bf16 %v665_v63, %v664_v43  ;;  %v581_v32 = vmul.f32 0.6931472, %v3213_v23 }
  0x8d   : > { %1404 = vperm.xlu0 %3150, %v3654_v3   ;;  %3032 = vmatmul.mubr.msk.bf16.vlgmr.msra.gmra.mrb[4].mxu0 %vm754_vm4, %v692_v17  ;;  %v510_v60 = vsel %vm508_vm8, %v509_v45, %v507_v56  ;;  %v693_v7 = vpack.c.bf16 %v685_v52, %v685_v52  ;;  %v3969_v10 = vmul.f32 0.6931472, %v3217_v55  ;;  %v602_v39 = vmul.f32 0.5, %v579_v8 }
  0x8e   : > { %v514_v54 = vsel %vm513_vm9, %v3878_v48, %v512_v59  ;;  %v556_v9 = vmin.f32 %v510_v60, 0.9999999  ;;  %3043 = vmatprep.mubr.msk.bf16.mxu0 %vm3422_vm0, %v3421_v1  ;;  %3036 = vmatpush3.bf16.msra.mxu1 %v677_v0  ;;  %v3977_v58 = vmax.f32 %v417_v61, 1e-14  ;;  %v603_v48 = vmul.f32 0.5, %v581_v32 }
  0x8f   : > { %v517_v6 = vsel %vm515_vm10, %v516_v62, %v514_v54  ;;  %3047 = vmatprep.subr.bf16.mxu1 %v3421_v1  ;;  %vm520_vm11 = vcmp.eq.f32.partialorder %v3928_v33, inf  ;;  %vm522_vm12 = vcmp.eq.f32.partialorder %v3928_v33, 0.0  ;;  %v523_v40 = vand.u32 2147483648, %v3928_v33 }
  0x90   : > { %1360 = vperm.xlu1 %3148, %v3696_v29   ;;  %v557_v34 = vmin.f32 %v517_v6, 0.9999999  ;;  %v620_v15 = vsub.f32 1.0, %v556_v9  ;;  %v3219_v17 = vpop.eup %3218  ;;  %vm527_vm13 = vcmp.eq.f32.partialorder %v3936_v22, inf  ;;  %v666_v26 = vsub.f32 %v602_v39, %v3969_v10 }
  0x91   : > { %1416 = vperm.xlu0 %3150, %v3659_v4   ;;  %v3221_v18 = vpop.eup %3220  ;;  %3038 = vmatmul.mubr.msk.bf16.vlgmr.msra.gmra.mrb[4].mxu1 %vm754_vm4, %v693_v7  ;;  %vm529_vm14 = vcmp.eq.f32.partialorder %v3936_v22, 0.0  ;;  %v583_v50 = vmul.f32 0.6931472, %v3219_v17  ;;  %v3426_v28 = vmov 4   ;;  %v530_v35 = vand.u32 2147483648, %v3936_v22 }
  0x92   : > { %v621_v20 = vsub.f32 1.0, %v557_v34  ;;  %3049 = vmatprep.mubr.msk.bf16.mxu1 %vm3422_vm0, %v3421_v1  ;;  %v585_v44 = vmul.f32 0.6931472, %v3221_v18  ;;  %v694_v51 = vpack.c.bf16 %v686_v36, %v686_v36  ;;  %vm1603_vm15 = vcmp.gt.f32.partialorder %v3654_v3, 0.5 }
  0x93   : > { %v3223_v21 = vpop.eup %3222  ;;  %v604_v52 = vmul.f32 0.5, %v583_v50  ;;  %vm541_vm3 = vcmp.eq.f32.partialorder %v3977_v58, inf  ;;  %v544_v60 = vand.u32 2147483648, %v3977_v58  ;;  %vm543_vm5 = vcmp.eq.f32.partialorder %v3977_v58, 0.0 }
  0x94   : > { %3151 = vset.pattern.permute.xlu1 %v3425_v11  ;;  %v3973_v11 = vmax.f32 %v416_v53, 1e-14  ;;  %v3225_v49 = vpop.eup %3224  ;;  %v3989_v24 = vmul.f32 0.6931472, %v3223_v21  ;;  %v605_v62 = vmul.f32 0.5, %v585_v44  ;;  %v687_v21 = vld [vmem:[%s3709_s25 + $0x28] sm:$0xff] }
  0x95   : > { %1408 = vperm.xlu1 %3151, %v3662_v5   ;;  %1424 = vperm.xlu0 %3150, %v3673_v14   ;;  %v3227_v27 = vpop.eup %3226  ;;  %v519_v31 = vmul.f32 %v3225_v49, %v3928_v33  ;;  %vm1606_vm6 = vcmp.gt.f32.partialorder %v3659_v4, 0.5  ;;  %vm1608_vm7 = vcmp.gt.f32.partialorder %v3673_v14, 0.5  ;;  %vm1610_vm8 = vcmp.gt.f32.partialorder %v3696_v29, 0.5 }
  0x96   : > { %3228 = vrsqrt.f32 %v3973_v11  ;;  %v667_v41 = vsub.f32 %v603_v48, %v3989_v24  ;;  %v526_v37 = vmul.f32 %v3227_v27, %v3936_v22  ;;  %vm534_vm1 = vcmp.eq.f32.partialorder %v3973_v11, inf }
  0x97   : > { %3230 = vlog2.f32 %v620_v15  ;;  %v521_v45 = vsel %vm520_vm11, %v3928_v33, %v519_v31  ;;  %v537_v8 = vand.u32 2147483648, %v3973_v11  ;;  %vm536_vm2 = vcmp.eq.f32.partialorder %v3973_v11, 0.0 }
  0x98   : > { %3232 = vrsqrt.f32 %v3977_v58  ;;  %v678_v46 = vpack.c.bf16 %v667_v41, %v666_v26  ;;  %v524_v23 = vsel %vm522_vm12, %v523_v40, %v521_v45  ;;  %v528_v43 = vsel %vm527_vm13, %v3936_v22, %v526_v37 }
  0x99   : > { %1412 = vperm.xlu1 %3151, %v3651_v2   ;;  %1432 = vperm.xlu0 %3150, %v3696_v29   ;;  %3234 = vlog2.f32 %v621_v20  ;;  %v531_v25 = vsel %vm529_vm14, %v530_v35, %v528_v43  ;;  %v558_v63 = vmin.f32 %v524_v23, 0.9999999  ;;  %v1619_v48 = vsel %vm1603_vm15, 1, %v4886_v42 }
  0x9a   : > { %3236 = vlog2.f32 %v3928_v33  ;;  %3042 = vmatpush3.bf16.msra.mxu0 %v678_v46  ;;  %v559_v53 = vmin.f32 %v531_v25, 0.9999999  ;;  %v3427_v27 = vmov 5   ;;  %v1624_v23 = vsel %vm1608_vm7, 1, %v4886_v42 }
  0x9b   : > { %3238 = vlog2.f32 %v3936_v22  ;;  %3053 = vmatprep.subr.bf16.mxu0 %v3421_v1  ;;  %v622_v55 = vsub.f32 1.0, %v558_v63  ;;  %vm1604_vm9 = vcmp.gt.f32.partialorder %v3662_v5, 0.5  ;;  %vm1607_vm10 = vcmp.gt.f32.partialorder %v3678_v19, 0.5 }
  0x9c   : > { %3240 = vlog2.f32 %v3973_v11  ;;  %v623_v56 = vsub.f32 1.0, %v559_v53  ;;  %vm1609_vm11 = vcmp.gt.f32.partialorder %v3699_v30, 0.5 }
  0x9d   : > { %1420 = vperm.xlu1 %3151, %v3678_v19   ;;  %3153 = vset.pattern.permute.xlu0 %v3426_v28  ;;  %3242 = vlog2.f32 %v3977_v58 }
  0x9e   : > { %1504 = vperm.xlu0 %3153, %v3662_v5   ;;  %3044 = vmatmul.mubr.msk.bf16.vlgmr.msra.gmra.mrb[8].mxu0 %vm754_vm4, %v694_v51  ;;  %3244 = vlog2.f32 %v622_v55 }
  0x9f   : > { %3246 = vlog2.f32 %v623_v56  ;;  %3055 = vmatprep.mubr.msk.bf16.mxu0 %vm3422_vm0, %v3421_v1 }
  0xa0   : > { %v3229_v33 = vpop.eup %3228 }
  0xa1   : > { %1428 = vperm.xlu1 %3151, %v3699_v30   ;;  %v3231_v22 = vpop.eup %3230  ;;  %v533_v59 = vmul.f32 %v3229_v33, %v3973_v11 }
  0xa2   : > { %1516 = vperm.xlu0 %3153, %v3678_v19   ;;  %v3233_v61 = vpop.eup %3232  ;;  %v4022_v0 = vmul.f32 0.6931472, %v3231_v22  ;;  %v1620_v22 = vsel %vm1604_vm9, 1, %v4886_v42 }
  0xa3   : > { %v3235_v7 = vpop.eup %3234  ;;  %v535_v32 = vsel %vm534_vm1, %v3973_v11, %v533_v59  ;;  %v540_v54 = vmul.f32 %v3233_v61, %v3977_v58  ;;  %v689_v61 = vld [vmem:[%s3709_s25 + $0x38] sm:$0xff] }
  0xa4   : > { %v3237_v9 = vpop.eup %3236  ;;  %v4036_v6 = vmul.f32 0.6931472, %v3235_v7  ;;  %v668_v39 = vsub.f32 %v604_v52, %v4022_v0  ;;  %v538_v34 = vsel %vm536_vm2, %v537_v8, %v535_v32  ;;  %v688_v52 = vld [vmem:[%s3709_s25 + $0x30] sm:$0xff]  ;;  %v697_v32 = vpack.c.bf16 %v689_v61, %v689_v61 }
  0xa5   : > { %3152 = vset.pattern.permute.xlu1 %v3426_v28  ;;  %v3239_v15 = vpop.eup %3238  ;;  %v542_v17 = vsel %vm541_vm3, %v3977_v58, %v540_v54  ;;  %v560_v18 = vmin.f32 %v538_v34, 0.9999999  ;;  %v587_v49 = vmul.f32 0.6931472, %v3237_v9  ;;  %v695_v28 = vpack.c.bf16 %v687_v21, %v687_v21 }
  0xa6   : > { %1500 = vperm.xlu1 %3152, %v3654_v3   ;;  %1524 = vperm.xlu0 %3153, %v3699_v30   ;;  %4937 = vst [vmem:[#allocation11_spill] sm:$0xff] %v4036_v6  ;;  %v669_v20 = vsub.f32 %v605_v62, %v4036_v6  ;;  %v545_v40 = vsel %vm543_vm5, %v544_v60, %v542_v17  ;;  %v589_v58 = vmul.f32 0.6931472, %v3239_v15  ;;  %v1622_v3 = vsel %vm1606_vm6, 1, %v4886_v42  ;;  %v3241_v35 = vpop.eup %3240 }
  0xa7   : > { %v561_v26 = vmin.f32 %v545_v40, 0.9999999  ;;  %v624_v11 = vsub.f32 1.0, %v560_v18  ;;  %v3243_v41 = vpop.eup %3242  ;;  %v606_v44 = vmul.f32 0.5, %v587_v49  ;;  %v1626_v62 = vsel %vm1610_vm8, 1, %v4886_v42 }
  0xa8   : > { %v679_v50 = vpack.c.bf16 %v669_v20, %v668_v39  ;;  %v3245_v36 = vpop.eup %3244  ;;  %v607_v37 = vmul.f32 0.5, %v589_v58  ;;  %v593_v63 = vmul.f32 0.6931472, %v3243_v41  ;;  %v1625_v54 = vsel %vm1609_vm11, 1, %v4886_v42 }
  0xa9   : > { %v625_v31 = vsub.f32 1.0, %v561_v26  ;;  %3248 = vlog2.f32 %v624_v11  ;;  %v3247_v45 = vpop.eup %3246  ;;  %v4054_v46 = vmul.f32 0.6931472, %v3245_v36 }
  0xaa   : > { %1508 = vperm.xlu1 %3152, %v3651_v2   ;;  %3154 = vset.pattern.permute.xlu0 %v3427_v27  ;;  %v4057_v43 = vmul.f32 0.6931472, %v3247_v45  ;;  %v609_v55 = vmul.f32 0.5, %v593_v63  ;;  %v2977_v45 = vld [vmem:[%s3621_s28 + $0x9] ss:$0 sm:$0xff] }
  0xab   : > { %1628 = vperm.xlu0 %3154, %v1619_v48   ;;  %3048 = vmatpush3.bf16.msra.mxu1 %v679_v50  ;;  %3250 = vlog2.f32 %v625_v31  ;;  %4938 = vst [vmem:[#allocation12_spill] sm:$0xff] %v4054_v46  ;;  %v670_v51 = vsub.f32 %v606_v44, %v4054_v46  ;;  %v2960_v63 = vld [vmem:[%s3621_s28] ss:$0 sm:$0xff] }
  0xac   : > { %3059 = vmatprep.subr.bf16.mxu1 %v3421_v1  ;;  %4939 = vst [vmem:[#allocation13_spill] sm:$0xff] %v4057_v43  ;;  %v671_v25 = vsub.f32 %v607_v37, %v4057_v43 }
  0xae   : > { %1512 = vperm.xlu1 %3152, %v3659_v4   ;;  %3050 = vmatmul.mubr.msk.bf16.vlgmr.msra.gmra.mrb[8].mxu1 %vm754_vm4, %v695_v28  ;;  %v591_v4 = vmul.f32 0.6931472, %v3241_v35  ;;  %v680_v53 = vpack.c.bf16 %v671_v25, %v670_v51  ;;  %v1667_v51 = vlaneseq  ;;  %v2961_v25 = vld [vmem:[%s3621_s28 + $0x8] ss:$0 sm:$0xff] }
  0xaf   : > { %1637 = vperm.xlu0 %3154, %v1622_v3   ;;  %3061 = vmatprep.mubr.msk.bf16.mxu1 %vm3422_vm0, %v3421_v1  ;;  %vm1605_vm0 = vcmp.gt.f32.partialorder %v3651_v2, 0.5  ;;  %v1623_v2 = vsel %vm1607_vm10, 1, %v4886_v42 }
  0xb0   : > { %v608_v33 = vmul.f32 0.5, %v591_v4  ;;  %3054 = vmatpush3.bf16.msra.mxu0 %v680_v53  ;;  %v1621_v60 = vsel %vm1605_vm0, 1, %v4886_v42  ;;  %v2976_v53 = vld [vmem:[%s3621_s28 + $0x1] ss:$0 sm:$0xff]  ;;  %v2972_v42 = vld [vmem:[%s3621_s28 + $0x23] ss:$0 sm:$0xff] }
  0xb2   : > { %1520 = vperm.xlu1 %3152, %v3673_v14   ;;  %v696_v14 = vpack.c.bf16 %v688_v52, %v688_v52  ;;  %v2969_v52 = vld [vmem:[%s3621_s28 + $0xb] ss:$0 sm:$0xff] }
  0xb3   : > { %1643 = vperm.xlu0 %3154, %v1624_v23   ;;  %v3249_v1 = vpop.eup %3248 }
  0xb4   : > { %v4069_v8 = vmul.f32 0.6931472, %v3249_v1  ;;  %3056 = vmatmul.mubr.msk.bf16.vlgmr.msra.gmra.mrb[12].mxu0 %vm754_vm4, %v696_v14  ;;  %v2952_v1 = vld [vmem:[%s3621_s28 + $0x2] ss:$0 sm:$0xff]  ;;  %v2953_v14 = vld [vmem:[%s3621_s28 + $0xa] ss:$0 sm:$0xff] }
  0xb5   : > { %v3251_v56 = vpop.eup %3250 }
  0xb6   : > { %1528 = vperm.xlu1 %3152, %v3696_v29   ;;  %4940 = vst [vmem:[#allocation14_spill] sm:$0xff] %v4069_v8  ;;  %v4073_v5 = vmul.f32 0.6931472, %v3251_v56  ;;  %v672_v59 = vsub.f32 %v608_v33, %v4069_v8 }
  0xb7   : > { %1649 = vperm.xlu0 %3154, %v1626_v62   ;;  %v1155_v62 = vld [vmem:[%s3621_s28 + $0x6] sm:$0x1] }
  0xb8   : > { %4941 = vst [vmem:[#allocation15_spill] sm:$0xff] %v4073_v5  ;;  %v673_v29 = vsub.f32 %v609_v55, %v4073_v5 }
  0xba   : > { %3155 = vset.pattern.permute.xlu1 %v3427_v27  ;;  %v681_v7 = vpack.c.bf16 %v673_v29, %v672_v59  ;;  %v2968_v29 = vld [vmem:[%s3621_s28 + $0x3] ss:$0 sm:$0xff] }
  0xbb   : > { %1631 = vperm.xlu1 %3155, %v1620_v22   ;;  %v1668_v22 = vshrl.u32 %v1667_v51, 7  ;;  %v2963_v51 = vld [vmem:[%s3621_s28 + $0x18] ss:$0 sm:$0xff] }
  0xbc   : > { %3060 = vmatpush3.bf16.msra.mxu1 %v681_v7  ;;  %v2954_v7 = vld [vmem:[%s3621_s28 + $0x12] ss:$0 sm:$0xff] }
  0xbf   : > { %1634 = vperm.xlu1 %3155, %v1621_v60   ;;  %3062 = vmatmul.mubr.msk.bf16.vlgmr.msra.gmra.mrb[12].mxu1 %vm754_vm4, %v697_v32  ;;  %vm1611_vm4 = vcmp.gt.f32.partialorder %v1155_v62, 0.5  ;;  %v2955_v32 = vld [vmem:[%s3621_s28 + $0x1a] ss:$0 sm:$0xff] }
  0xc3   : > { %1640 = vperm.xlu1 %3155, %v1623_v2  }
  0xc7   : > { %1646 = vperm.xlu1 %3155, %v1625_v54   ;;  %v2980_v54 = vld [vmem:[%s3621_s28 + $0x21] ss:$0 sm:$0xff] }
  0xdd   : > { %v4085_v9 = vpop.permute.xlu1 %1175  ;;  %v4087_v39 = vpop.permute.xlu0 %1165 }
  0xe1   : > { %v4089_v34 = vpop.permute.xlu1 %1180  ;;  %v4091_v19 = vpop.permute.xlu0 %1170 }
  0xe5   : > { %v4093_v15 = vpop.permute.xlu1 %1190  ;;  %v4095_v17 = vpop.permute.xlu0 %1185 }
  0xe9   : > { %v4097_v18 = vpop.permute.xlu1 %1200  ;;  %v4099_v30 = vpop.permute.xlu0 %1195 }
  0xee   : > { %v1249_v48 = vpop.permute.xlu1 %1248  ;;  %v1245_v20 = vpop.permute.xlu0 %1244 }
  0xef   : > { %v1308_v56 = vmax.f32 %v1249_v48, %v2961_v25  ;;  %v1307_v59 = vmax.f32 %v1245_v20, %v2960_v63  ;;  %v4146_v48 = vld [vmem:[%s3621_s28 + $0x2a] ss:$0 sm:$0xff]  ;;  %v2962_v20 = vld [vmem:[%s3621_s28 + $0x10] ss:$0 sm:$0xff]  ;;  %v2978_v25 = vld [vmem:[%s3621_s28 + $0x11] ss:$0 sm:$0xff] }
  0xf0   : > { %v2964_v63 = vld [vmem:[%s3621_s28 + $0x20] ss:$0 sm:$0xff] }
  0xf2   : > { %v4101_v21 = vpop.permute.xlu1 %1252  ;;  %v4103_v40 = vpop.permute.xlu0 %1256 }
  0xf3   : > { %v1309_v62 = vmax.f32 %v4101_v21, %v2962_v20 }
  0xf6   : > { %v4105_v49 = vpop.permute.xlu1 %1260  ;;  %v4107_v26 = vpop.permute.xlu0 %1264 }
  0xfa   : > { %v4109_v11 = vpop.permute.xlu1 %1268  ;;  %v4111_v27 = vpop.permute.xlu0 %1272 }
  0xff   : > { %v1333_v50 = vpop.permute.xlu1 %1332  ;;  %v1337_v58 = vpop.permute.xlu0 %1336 }
 0x100   : > { %v1396_v61 = vmin.f32 %v1337_v58, %v2969_v52  ;;  %v1395_v52 = vmin.f32 %v1333_v50, %v2968_v29  ;;  %v1238_v29 = vmin.f32 %v4089_v34, %v2955_v32  ;;  %v1240_v34 = vmin.f32 %v4093_v15, %v4146_v48  ;;  %v2966_v32 = vld [vmem:[%s3621_s28 + $0x30] ss:$0 sm:$0xff] }
 0x103   : > { %v4113_v28 = vpop.permute.xlu1 %1340  ;;  %v4115_v31 = vpop.permute.xlu0 %1348 }
 0x107   : > { %v4117_v3 = vpop.permute.xlu1 %1344  ;;  %v4119_v35 = vpop.permute.xlu0 %1356 }
 0x10b   : > { %v4121_v41 = vpop.permute.xlu1 %1352 }
 0x10c   : > { %v1405_v44 = vpop.permute.xlu0 %1404 }
 0x10d   : > { %v1467_v2 = vmax.f32 %v1405_v44, %v2976_v53  ;;  %v4942_v44 = vmov 0  }
 0x10e   : > { %v4155_v53 = vsel %vm1611_vm4, 1, %v4942_v44 }
 0x10f   : > { %v4123_v36 = vpop.permute.xlu1 %1360  ;;  %v1475_v43 = vsub.f32 %v1395_v52, %v1467_v2 }
 0x110   : > { %v4125_v37 = vpop.permute.xlu0 %1416 }
 0x114   : > { %v1409_v23 = vpop.permute.xlu1 %1408  ;;  %v4128_v4 = vpop.permute.xlu0 %1424 }
 0x115   : > { %v1468_v33 = vmax.f32 %v1409_v23, %v2977_v45  ;;  %v1235_v45 = vmin.f32 %v4087_v39, %v2952_v1  ;;  %v1236_v23 = vmin.f32 %v4091_v19, %v2953_v14  ;;  %v4157_v39 = vsub.s32 0, %v1668_v22  ;;  %v2956_v1 = vld [vmem:[%s3621_s28 + $0x22] ss:$0 sm:$0xff]  ;;  %v2985_v22 = vld [vmem:[%s3621_s28 + $0xc] ss:$0 sm:$0xff] }
 0x116   : > { %v1237_v19 = vmin.f32 %v4085_v9, %v2954_v7  ;;  %v1310_v9 = vmax.f32 %v4103_v40, %v2963_v51  ;;  %v2971_v7 = vld [vmem:[%s3621_s28 + $0x1b] ss:$0 sm:$0xff]  ;;  %v1239_v21 = vmin.f32 %v4095_v17, %v2956_v1  ;;  %v1483_v17 = vmax.f32 %v1475_v43, 0.0  ;;  %v4183_v1 = vld [vmem:[%s3621_s28 + $0xe] sm:$0x1] }
 0x117   : > { %v1476_v58 = vsub.f32 %v1396_v61, %v1468_v33  ;;  %v1316_v14 = vsub.f32 %v1236_v23, %v1308_v56  ;;  %v1315_v8 = vsub.f32 %v1235_v45, %v1307_v59  ;;  %v2970_v33 = vld [vmem:[%s3621_s28 + $0x13] ss:$0 sm:$0xff]  ;;  %v2979_v61 = vld [vmem:[%s3621_s28 + $0x19] ss:$0 sm:$0xff]  ;;  %v1311_v56 = vmax.f32 %v4105_v49, %v2964_v63  ;;  %v2981_v23 = vld [vmem:[%s3621_s28 + $0x29] ss:$0 sm:$0xff] }
 0x118   : > { %v1413_v55 = vpop.permute.xlu1 %1412  ;;  %v4138_v60 = vpop.permute.xlu0 %1432  ;;  %v1399_v59 = vmin.f32 %v4115_v31, %v2972_v42  ;;  %v1397_v2 = vmin.f32 %v4113_v28, %v2970_v33  ;;  %v1470_v40 = vmax.f32 %v4125_v37, %v2979_v61  ;;  %v2974_v31 = vld [vmem:[%s3621_s28 + $0x33] ss:$0 sm:$0xff]  ;;  %v1317_v28 = vsub.f32 %v1237_v19, %v1309_v62  ;;  %v2965_v61 = vld [vmem:[%s3621_s28 + $0x28] ss:$0 sm:$0xff] }
 0x119   : > { %v1469_v46 = vmax.f32 %v1413_v55, %v2978_v25  ;;  %v1484_v45 = vmax.f32 %v1476_v58, 0.0  ;;  %v2958_v55 = vld [vmem:[%s3621_s28 + $0x32] ss:$0 sm:$0xff]  ;;  %v1324_v49 = vmax.f32 %v1316_v14, 0.0  ;;  %v1323_v42 = vmax.f32 %v1315_v8, 0.0 }
 0x11a   : > { %v1398_v58 = vmin.f32 %v4117_v3, %v2971_v7  ;;  %v2973_v25 = vld [vmem:[%s3621_s28 + $0x2b] ss:$0 sm:$0xff]  ;;  %v1318_v33 = vsub.f32 %v1238_v29, %v1310_v9  ;;  %v1319_v37 = vsub.f32 %v1239_v21, %v1311_v56  ;;  %v2984_v8 = vld [vmem:[%s3621_s28 + $0x4] ss:$0 sm:$0xff]  ;;  %v1401_v3 = vmin.f32 %v4119_v35, %v2974_v31  ;;  %v2983_v35 = vld [vmem:[%s3621_s28 + $0x39] ss:$0 sm:$0xff] }
 0x11b   : > { %v1477_v63 = vsub.f32 %v1397_v2, %v1469_v46  ;;  %v4185_v14 = vmul.f32 %v1484_v45, %v1324_v49  ;;  %v1472_v46 = vmax.f32 %v4128_v4, %v2981_v23  ;;  %v1241_v43 = vmin.f32 %v4099_v30, %v2958_v55  ;;  %v2988_v7 = vld [vmem:[%s3621_s28 + $0x24] ss:$0 sm:$0xff]  ;;  %v2986_v55 = vld [vmem:[%s3621_s28 + $0x14] ss:$0 sm:$0xff]  ;;  %v2967_v2 = vld [vmem:[%s3621_s28 + $0x38] ss:$0 sm:$0xff] }
 0x11c   : > { %v1421_v5 = vpop.permute.xlu1 %1420  ;;  %v1400_v19 = vmin.f32 %v4121_v41, %v2973_v25  ;;  %vm1612_vm12 = vcmp.gt.f32.partialorder %v4183_v1, 0.5  ;;  %v4199_v4 = vmul.f32 %v1483_v17, %v1323_v42  ;;  %v1325_v45 = vmax.f32 %v1317_v28, 0.0  ;;  %v2991_v1 = vld [vmem:[%s3621_s28 + $0x3c] ss:$0 sm:$0xff] }
 0x11d   : > { %v1471_v50 = vmax.f32 %v1421_v5, %v2980_v54  ;;  %v1505_v6 = vpop.permute.xlu0 %1504  ;;  %v2982_v5 = vld [vmem:[%s3621_s28 + $0x31] ss:$0 sm:$0xff]  ;;  %v1485_v56 = vmax.f32 %v1477_v63, 0.0  ;;  %v1326_v41 = vmax.f32 %v1318_v33, 0.0  ;;  %v1312_v21 = vmax.f32 %v4107_v26, %v2965_v61  ;;  %v2987_v61 = vld [vmem:[%s3621_s28 + $0x1c] ss:$0 sm:$0xff] }
 0x11e   : > { %v1564_v51 = vadd.f32 %v2985_v22, %v1505_v6  ;;  %v1313_v6 = vmax.f32 %v4109_v11, %v2966_v32  ;;  %v2959_v11 = vld [vmem:[%s3621_s28 + $0x3a] ss:$0 sm:$0xff]  ;;  %v1480_v49 = vsub.f32 %v1400_v19, %v1472_v46  ;;  %v1474_v23 = vmax.f32 %v4138_v60, %v2983_v35 }
 0x11f   : > { %v1479_v20 = vsub.f32 %v1399_v59, %v1471_v50  ;;  %v1478_v50 = vsub.f32 %v1398_v58, %v1470_v40  ;;  %v2975_v40 = vld [vmem:[%s3621_s28 + $0x3b] ss:$0 sm:$0xff]  ;;  %v4209_v26 = vmul.f32 %v1485_v56, %v1325_v45  ;;  %v1320_v28 = vsub.f32 %v1240_v34, %v1312_v21  ;;  %v2989_v56 = vld [vmem:[%s3621_s28 + $0x2c] ss:$0 sm:$0xff] }
 0x120   : > { %v1429_v54 = vpop.permute.xlu1 %1428  ;;  %v1572_v62 = vsub.f32 %v1564_v51, %v4185_v14  ;;  %v1321_v32 = vsub.f32 %v1241_v43, %v1313_v6  ;;  %v1314_v33 = vmax.f32 %v4111_v27, %v2967_v2  ;;  %v1402_v60 = vmin.f32 %v4123_v36, %v2975_v40  ;;  %v1158_v27 = vld [vmem:[%s3621_s28 + $0x1e] sm:$0x1] }
 0x121   : > { %v1473_v52 = vmax.f32 %v1429_v54, %v2982_v5  ;;  %v1487_v29 = vmax.f32 %v1479_v20, 0.0  ;;  %v1517_v22 = vpop.permute.xlu0 %1516  ;;  %v1327_v5 = vmax.f32 %v1319_v37, 0.0  ;;  %v1486_v54 = vmax.f32 %v1478_v50, 0.0  ;;  %v2990_v37 = vld [vmem:[%s3621_s28 + $0x34] ss:$0 sm:$0xff] }
 0x122   : > { %v1580_v42 = vmax.f32 %v1572_v62, 1e-09  ;;  %v1567_v51 = vadd.f32 %v2988_v7, %v1517_v22  ;;  %v1329_v6 = vmax.f32 %v1321_v32, 0.0  ;;  %v1482_v46 = vsub.f32 %v1402_v60, %v1474_v23  ;;  %v1162_v60 = vld [vmem:[%s3621_s28 + $0x3e] sm:$0x1] }
 0x123   : > { %v1481_v59 = vsub.f32 %v1401_v3, %v1473_v52  ;;  %v4207_v20 = vmul.f32 %v1487_v29, %v1327_v5  ;;  %v1242_v52 = vmin.f32 %v4097_v18, %v2959_v11  ;;  %v4220_v50 = vmul.f32 %v1486_v54, %v1326_v41  ;;  %v1157_v29 = vld [vmem:[%s3621_s28 + $0x16] sm:$0x1] }
 0x124   : > { %v1488_v18 = vmax.f32 %v1480_v49, 0.0  ;;  %v1328_v62 = vmax.f32 %v1320_v28, 0.0  ;;  %vm1614_vm13 = vcmp.gt.f32.partialorder %v1158_v27, 0.5  ;;  %v1490_v7 = vmax.f32 %v1482_v46, 0.0  ;;  %v1159_v49 = vld [vmem:[%s3621_s28 + $0x26] sm:$0x1] }
 0x125   : > { %v1501_v9 = vpop.permute.xlu1 %1500  ;;  %v1489_v25 = vmax.f32 %v1481_v59, 0.0  ;;  %v1575_v15 = vsub.f32 %v1567_v51, %v4207_v20  ;;  %v1322_v22 = vsub.f32 %v1242_v52, %v1314_v33  ;;  %v1660_v59 = vsel %vm1612_vm12, 1, %v4942_v44 }
 0x126   : > { %v1563_v30 = vadd.f32 %v2984_v8, %v1501_v9  ;;  %v1525_v8 = vpop.permute.xlu0 %1524  ;;  %v1670_v9 = vrot.slane %v4155_v53, %v4157_v39  ;;  %v4234_v41 = vmul.f32 %v1488_v18, %v1328_v62  ;;  %vm1613_vm14 = vcmp.gt.f32.partialorder %v1157_v29, 0.5 }
 0x127   : > { %v4224_v34 = vmul.f32 %v1489_v25, %v1329_v6  ;;  %v1569_v36 = vadd.f32 %v2990_v37, %v1525_v8  ;;  %v1330_v32 = vmax.f32 %v1322_v22, 0.0  ;;  %v1662_v54 = vsel %vm1614_vm13, 1, %v4942_v44 }
 0x128   : > { %v1571_v31 = vsub.f32 %v1563_v30, %v4199_v4  ;;  %v1583_v30 = vmax.f32 %v1575_v15, 1e-09  ;;  %vm4238_vm15 = vcmp.eq.s32.totalorder %v1670_v9, 1  ;;  %v1674_v51 = vrot.slane %v1660_v59, %v4157_v39 }
 0x129   : > { %v1509_v58 = vpop.permute.xlu1 %1508  ;;  %v1577_v5 = vsub.f32 %v1569_v36, %v4224_v34  ;;  %vm1615_vm5 = vcmp.gt.f32.partialorder %v1159_v49, 0.5  ;;  %v1682_v37 = vrot.slane %v1662_v54, %v4157_v39  ;;  %vm1618_vm7 = vcmp.gt.f32.partialorder %v1162_v60, 0.5 }
 0x12a   : > { %v1579_v17 = vmax.f32 %v1571_v31, 1e-09  ;;  %v1565_v63 = vadd.f32 %v2986_v55, %v1509_v58  ;;  %v1629_v11 = vpop.permute.xlu0 %1628  ;;  %v1160_v55 = vld [vmem:[%s3621_s28 + $0x2e] sm:$0x1]  ;;  %v1661_v58 = vsel %vm1613_vm14, 1, %v4942_v44  ;;  %vm4262_vm6 = vcmp.eq.s32.totalorder %v1674_v51, 1 }
 0x12b   : > { %vm1651_vm1 = vcmp.eq.s32.totalorder %v1629_v11, 1  ;;  %vm1616_vm2 = vcmp.gt.f32.partialorder %v1160_v55, 0.5  ;;  %v1678_v46 = vrot.slane %v1661_v58, %v4157_v39  ;;  %vm1702_vm0 = vcmp.eq.s32.totalorder %v1682_v37, 1 }
 0x12c   : > { %3252 = vrcp.f32 %v1579_v17  ;;  %v1573_v3 = vsub.f32 %v1565_v63, %v4209_v26  ;;  %v1585_v17 = vmax.f32 %v1577_v5, 1e-09  ;;  %vm1707_vm3 = vmand %vm1651_vm1, %vm4238_vm15  ;;  %v1664_v6 = vsel %vm1616_vm2, 1, %v4942_v44 }
 0x12d   : > { %3254 = vrcp.f32 %v1580_v42  ;;  %v1513_v48 = vpop.permute.xlu1 %1512  ;;  %v4247_v42 = vmul.f32 %v1490_v7, %v1330_v32  ;;  %v1666_v29 = vsel %vm1618_vm7, 1, %v4942_v44  ;;  %vm4276_vm4 = vcmp.eq.s32.totalorder %v1678_v46, 1 }
 0x12e   : > { %v1581_v43 = vmax.f32 %v1573_v3, 1e-09  ;;  %v1566_v19 = vadd.f32 %v2987_v61, %v1513_v48  ;;  %v1638_v31 = vpop.permute.xlu0 %1637  ;;  %v1161_v61 = vld [vmem:[%s3621_s28 + $0x36] sm:$0x1]  ;;  %v1663_v48 = vsel %vm1615_vm5, 1, %v4942_v44  ;;  %v706_v58 = vrot.slane %v3888_v57, 4 }
 0x12f   : > { %vm1617_vm9 = vcmp.gt.f32.partialorder %v1161_v61, 0.5  ;;  %vm1654_vm10 = vcmp.eq.s32.totalorder %v1638_v31, 1 }
 0x130   : > { %v1574_v35 = vsub.f32 %v1566_v19, %v4220_v50  ;;  %3256 = vrcp.f32 %v1581_v43  ;;  %v1690_v19 = vrot.slane %v1664_v6, %v4157_v39  ;;  %vm1710_vm12 = vmand %vm1654_vm10, %vm1702_vm0 }
 0x131   : > { %v1521_v45 = vpop.permute.xlu1 %1520 }
 0x132   : > { %v1582_v53 = vmax.f32 %v1574_v35, 1e-09  ;;  %v1568_v21 = vadd.f32 %v2989_v56, %v1521_v45  ;;  %v1644_v27 = vpop.permute.xlu0 %1643  ;;  %v1665_v56 = vsel %vm1617_vm9, 1, %v4942_v44  ;;  %vm1704_vm14 = vcmp.eq.s32.totalorder %v1690_v19, 1 }
 0x133   : > { %vm1656_vm15 = vcmp.eq.s32.totalorder %v1644_v27, 1 }
 0x134   : > { %3258 = vrcp.f32 %v1582_v53  ;;  %v1576_v40 = vsub.f32 %v1568_v21, %v4234_v41 }
 0x135   : > { %v1529_v23 = vpop.permute.xlu1 %1528  ;;  %3260 = vrcp.f32 %v1583_v30  ;;  %v1698_v30 = vrot.slane %v1666_v29, %v4157_v39 }
 0x136   : > { %v3253_v25 = vpop.eup %3252  ;;  %v1584_v63 = vmax.f32 %v1576_v40, 1e-09  ;;  %v1570_v52 = vadd.f32 %v2991_v1, %v1529_v23  ;;  %v1650_v45 = vpop.permute.xlu0 %1649  ;;  %v699_v23 = vrot.slane %v3873_v47, 4 }
 0x137   : > { %v3255_v28 = vpop.eup %3254  ;;  %v1595_v33 = vmul.f32 %v3253_v25, %v4199_v4  ;;  %vm1658_vm7 = vcmp.eq.s32.totalorder %v1650_v45, 1 }
 0x138   : > { %3262 = vrcp.f32 %v1584_v63  ;;  %v1578_v8 = vsub.f32 %v1570_v52, %v4247_v42  ;;  %v1596_v36 = vmul.f32 %v3255_v28, %v4185_v14  ;;  %v1686_v14 = vrot.slane %v1663_v48, %v4157_v39 }
 0x139   : > { %v4266_v18 = vsel %vm1707_vm3, %v1595_v33, 0.0  ;;  %3264 = vrcp.f32 %v1585_v17  ;;  %vm1712_vm3 = vmand %vm1656_vm15, %vm1704_vm14  ;;  %v700_v51 = vadd.f32 %v699_v23, %v3873_v47  ;;  %v707_v17 = vadd.f32 %v706_v58, %v3888_v57 }
 0x13a   : > { %v1586_v4 = vmax.f32 %v1578_v8, 1e-09  ;;  %v1632_v15 = vpop.permute.xlu1 %1631  ;;  %1771 = vmax.xlane.f32.xlu1 %v4266_v18  ;;  %v3257_v43 = vpop.eup %3256  ;;  %vm4290_vm2 = vcmp.eq.s32.totalorder %v1686_v14, 1  ;;  %v1723_v25 = vadd.f32 1e-05, %v4266_v18  ;;  %v719_v28 = vadd.f32 %v3939_v38, %v3932_v13 }
 0x13b   : > { %vm1652_vm8 = vcmp.eq.s32.totalorder %v1632_v15, 1  ;;  %v1597_v35 = vmul.f32 %v3257_v43, %v4209_v26  ;;  %v1694_v26 = vrot.slane %v1665_v56, %v4157_v39  ;;  %v708_v60 = vrot.slane %v707_v17, 2 }
 0x13c   : > { %3266 = vrcp.f32 %v1586_v4  ;;  %vm1708_vm11 = vmand %vm1652_vm8, %vm4262_vm6  ;;  %vm1706_vm6 = vcmp.eq.s32.totalorder %v1698_v30, 1  ;;  %v720_v8 = vrot.slane %v719_v28, 4  ;;  %v726_v13 = vadd.f32 %v3989_v24, %v3969_v10 }
 0x13d   : > { %v4280_v22 = vsel %vm1708_vm11, %v1596_v36, 0.0  ;;  %vm1705_vm9 = vcmp.eq.s32.totalorder %v1694_v26, 1  ;;  %vm1714_vm0 = vmand %vm1658_vm7, %vm1706_vm6  ;;  %3268 = vlog2.f32 %v1723_v25  ;;  %v709_v6 = vadd.f32 %v708_v60, %v707_v17 }
 0x13e   : > { %v3259_v9 = vpop.eup %3258  ;;  %v1635_v11 = vpop.permute.xlu1 %1634  ;;  %1773 = vmax.xlane.f32.xlu0 %v4280_v22  ;;  %v1724_v63 = vadd.f32 1e-05, %v4280_v22 }
 0x13f   : > { %vm1653_vm13 = vcmp.eq.s32.totalorder %v1635_v11, 1  ;;  %v1598_v59 = vmul.f32 %v3259_v9, %v4220_v50  ;;  %v3261_v7 = vpop.eup %3260  ;;  %v710_v4 = vrot.slane %v709_v6, 1  ;;  %v727_v9 = vrot.slane %v726_v13, 4 }
 0x140   : > { %vm1709_vm1 = vmand %vm1653_vm13, %vm4276_vm4  ;;  %v1599_v55 = vmul.f32 %v3261_v7, %v4207_v20  ;;  %3270 = vlog2.f32 %v1724_v63 }
 0x141   : > { %v4294_v44 = vsel %vm1709_vm1, %v1597_v35, 0.0  ;;  %v4296_v53 = vsel %vm1710_vm12, %v1598_v59, 0.0  ;;  %v711_v19 = vadd.f32 %v710_v4, %v709_v6 }
 0x142   : > { %v3263_v50 = vpop.eup %3262  ;;  %v1641_v21 = vpop.permute.xlu1 %1640  ;;  %1775 = vmax.xlane.f32.xlu0 %v4294_v44  ;;  %1777 = vmax.xlane.f32.xlu1 %v4296_v53  ;;  %v1725_v37 = vadd.f32 1e-05, %v4294_v44  ;;  %v1726_v3 = vadd.f32 1e-05, %v4296_v53 }
 0x143   : > { %vm1655_vm5 = vcmp.eq.s32.totalorder %v1641_v21, 1  ;;  %v1600_v32 = vmul.f32 %v3263_v50, %v4234_v41  ;;  %v3265_v2 = vpop.eup %3264  ;;  %v728_v21 = vadd.f32 %v727_v9, %v726_v13 }
 0x144   : > { %vm1711_vm8 = vmand %vm1655_vm5, %vm4290_vm2  ;;  %v1601_v20 = vmul.f32 %v3265_v2, %v4224_v34  ;;  %v712_v34 = vadd.f32 %v3911_v16, %v3900_v12  ;;  %3272 = vlog2.f32 %v1725_v37  ;;  %v721_v16 = vadd.f32 %v720_v8, %v719_v28 }
 0x145   : > { %v4305_v39 = vsel %vm1711_vm8, %v1599_v55, 0.0  ;;  %v4307_v1 = vsel %vm1712_vm3, %v1600_v32, 0.0  ;;  %3274 = vlog2.f32 %v1726_v3  ;;  %v729_v17 = vrot.slane %v728_v21, 2 }
 0x146   : > { %v3267_v40 = vpop.eup %3266  ;;  %v1647_v54 = vpop.permute.xlu1 %1646  ;;  %1779 = vmax.xlane.f32.xlu0 %v4305_v39  ;;  %1781 = vmax.xlane.f32.xlu1 %v4307_v1  ;;  %v713_v52 = vrot.slane %v712_v34, 4  ;;  %v722_v48 = vrot.slane %v721_v16, 2  ;;  %v1727_v55 = vadd.f32 1e-05, %v4305_v39 }
 0x147   : > { %vm1657_vm10 = vcmp.eq.s32.totalorder %v1647_v54, 1  ;;  %v1602_v41 = vmul.f32 %v3267_v40, %v4247_v42  ;;  %v701_v42 = vrot.slane %v700_v51, 2  ;;  %v3269_v57 = vpop.eup %3268  ;;  %v730_v6 = vadd.f32 %v729_v17, %v728_v21 }
 0x148   : > { %vm1713_vm11 = vmand %vm1657_vm10, %vm1705_vm9  ;;  %v714_v47 = vadd.f32 %v713_v52, %v712_v34  ;;  %v1732_v38 = vmul.f32 0.6931472, %v3269_v57  ;;  %v723_v7 = vadd.f32 %v722_v48, %v721_v16  ;;  %3276 = vlog2.f32 %v1727_v55  ;;  %v4952_v48 = vld [vmem:[#allocation12_spill] sm:$0xff] }
 0x149   : > { %v4313_v49 = vsel %vm1713_vm11, %v1601_v20, 0.0  ;;  %v4315_v31 = vsel %vm1714_vm0, %v1602_v41, 0.0  ;;  %v702_v33 = vadd.f32 %v701_v42, %v700_v51  ;;  %v4951_v51 = vld [vmem:[#allocation11_spill] sm:$0xff]  ;;  %v731_v13 = vrot.slane %v730_v6, 1 }
 0x14a   : > { %1783 = vmax.xlane.f32.xlu0 %v4313_v49  ;;  %1785 = vmax.xlane.f32.xlu1 %v4315_v31  ;;  %v715_v12 = vrot.slane %v714_v47, 2  ;;  %v3271_v27 = vpop.eup %3270  ;;  %v1747_v56 = vmul.f32 3.0, %v1732_v38  ;;  %v724_v54 = vrot.slane %v723_v7, 1  ;;  %v733_v58 = vadd.f32 %v4951_v51, %v4022_v0 }
 0x14b   : > { %v703_v61 = vrot.slane %v702_v33, 1  ;;  %v1734_v35 = vmul.f32 0.6931472, %v3271_v27  ;;  %v4953_v27 = vld [vmem:[#allocation13_spill] sm:$0xff]  ;;  %v1730_v51 = vadd.f32 1e-05, %v4315_v31 }
 0x14c   : > { %v716_v15 = vadd.f32 %v715_v12, %v714_v47  ;;  %v725_v63 = vadd.f32 %v724_v54, %v723_v7  ;;  %v734_v37 = vrot.slane %v733_v58, 4 }
 0x14d   : > { %v704_v46 = vadd.f32 %v703_v61, %v702_v33  ;;  %v1748_v2 = vmul.f32 3.0, %v1734_v35 }
 0x14e   : > { %v717_v14 = vrot.slane %v716_v15, 1  ;;  %v3273_v45 = vpop.eup %3272  ;;  %v735_v4 = vadd.f32 %v734_v37, %v733_v58 }
 0x14f   : > { %v1736_v20 = vmul.f32 0.6931472, %v3273_v45  ;;  %v3275_v25 = vpop.eup %3274  ;;  %v4955_v45 = vld [vmem:[#allocation15_spill] sm:$0xff] }
 0x150   : > { %v718_v50 = vadd.f32 %v717_v14, %v716_v15  ;;  %v1738_v47 = vmul.f32 0.6931472, %v3275_v25  ;;  %v1728_v15 = vadd.f32 1e-05, %v4307_v1 }
 0x151   : > { %v1749_v33 = vmul.f32 3.0, %v1736_v20 }
 0x152   : > { %v1750_v3 = vmul.f32 3.0, %v1738_v47  ;;  %3278 = vlog2.f32 %v1728_v15 }
 0x158   : > { %v792_v36 = vpop.f32.mrb[0].mxu0 }
 0x159   : > { %v793_v43 = vadd.f32 %v792_v36, %v704_v46  ;;  %v3021_v29 = vpop.f32.mrb[1].mxu0  ;;  %v740_v36 = vadd.f32 %v4953_v27, %v4952_v48 }
 0x15a   : > { %v795_v62 = vpop.f32.mrb[2].mxu0  ;;  %v732_v29 = vadd.f32 %v731_v13, %v730_v6 }
 0x15b   : > { %v1099_v11 = vsub.f32 0.0, %v793_v43  ;;  %v3022_v59 = vpop.f32.mrb[3].mxu0  ;;  %v3277_v43 = vpop.eup %3276  ;;  %v741_v62 = vrot.slane %v740_v36, 4 }
 0x15c   : > { %v835_v30 = vpop.f32.mrb[0].mxu1  ;;  %v1740_v14 = vmul.f32 0.6931472, %v3277_v43 }
 0x15d   : > { %v1755_v10 = vsub.f32 %v1099_v11, %v1747_v56  ;;  %v836_v24 = vadd.f32 %v835_v30, %v711_v19  ;;  %v3027_v5 = vpop.f32.mrb[1].mxu1  ;;  %v736_v19 = vrot.slane %v735_v4, 2  ;;  %v742_v7 = vadd.f32 %v741_v62, %v740_v36  ;;  %v4954_v30 = vld [vmem:[#allocation14_spill] sm:$0xff] }
 0x15e   : > { %v838_v26 = vpop.f32.mrb[2].mxu1 }
 0x15f   : > { %1763 = vst [vmem:[%s4336_s10] sm:$0xff] %v1755_v10  ;;  %v1100_v32 = vsub.f32 0.0, %v836_v24  ;;  %v3028_v40 = vpop.f32.mrb[3].mxu1  ;;  %v737_v11 = vadd.f32 %v736_v19, %v735_v4  ;;  %v747_v10 = vadd.f32 %v4955_v45, %v4954_v30  ;;  %v1729_v24 = vadd.f32 1e-05, %v4313_v49 }
 0x160   : > { %v878_v23 = vpop.f32.mrb[4].mxu0  ;;  %v1751_v26 = vmul.f32 3.0, %v1740_v14  ;;  %v3279_v40 = vpop.eup %3278 }
 0x161   : > { %v1756_v41 = vsub.f32 %v1100_v32, %v1748_v2  ;;  %v879_v34 = vadd.f32 %v878_v23, %v718_v50  ;;  %v3033_v42 = vpop.f32.mrb[5].mxu0  ;;  %v738_v21 = vrot.slane %v737_v11, 1  ;;  %v743_v32 = vrot.slane %v742_v7, 2 }
 0x162   : > { %v881_v52 = vpop.f32.mrb[6].mxu0  ;;  %v748_v2 = vrot.slane %v747_v10, 4  ;;  %3280 = vlog2.f32 %v1729_v24  ;;  %v1742_v20 = vmul.f32 0.6931472, %v3279_v40 }
 0x163   : > { %1764 = vst [vmem:[%s4336_s10 + $0x8] sm:$0xff] %v1756_v41  ;;  %v1101_v28 = vsub.f32 0.0, %v879_v34  ;;  %v3034_v60 = vpop.f32.mrb[7].mxu0  ;;  %v739_v54 = vadd.f32 %v738_v21, %v737_v11  ;;  %v744_v41 = vadd.f32 %v743_v32, %v742_v7  ;;  %3282 = vlog2.f32 %v1730_v51 }
 0x164   : > { %v921_v61 = vpop.f32.mrb[4].mxu1  ;;  %v749_v23 = vadd.f32 %v748_v2, %v747_v10 }
 0x165   : > { %v1757_v8 = vsub.f32 %v1101_v28, %v1749_v33  ;;  %v922_v12 = vadd.f32 %v921_v61, %v725_v63  ;;  %v3039_v0 = vpop.f32.mrb[5].mxu1  ;;  %v1752_v63 = vmul.f32 3.0, %v1742_v20  ;;  %v745_v28 = vrot.slane %v744_v41, 1 }
 0x166   : > { %v924_v16 = vpop.f32.mrb[6].mxu1  ;;  %v750_v33 = vrot.slane %v749_v23, 2 }
 0x167   : > { %1765 = vst [vmem:[%s4336_s10 + $0x10] sm:$0xff] %v1757_v8  ;;  %v1102_v57 = vsub.f32 0.0, %v922_v12  ;;  %v3040_v46 = vpop.f32.mrb[7].mxu1  ;;  %v746_v37 = vadd.f32 %v745_v28, %v744_v41 }
 0x168   : > { %v751_v8 = vadd.f32 %v750_v33, %v749_v23 }
 0x169   : > { %v1758_v38 = vsub.f32 %v1102_v57, %v1750_v3 }
 0x16a   : > { %v752_v0 = vrot.slane %v751_v8, 1 }
 0x16b   : > { %1766 = vst [vmem:[%s4336_s10 + $0x18] sm:$0xff] %v1758_v38 }
 0x16c   : > { %v3281_v47 = vpop.eup %3280  ;;  %v753_v38 = vadd.f32 %v752_v0, %v751_v8 }
 0x16d   : > { %v1744_v61 = vmul.f32 0.6931472, %v3281_v47  ;;  %v3283_v15 = vpop.eup %3282 }
 0x16e   : > { %v1746_v48 = vmul.f32 0.6931472, %v3283_v15 }
 0x16f   : > { %v1753_v46 = vmul.f32 3.0, %v1744_v61 }
 0x170   : > { %v1754_v62 = vmul.f32 3.0, %v1746_v48 }
 0x171   : > { %v964_v9 = vpop.f32.mrb[8].mxu0 }
 0x172   : > { %v965_v56 = vadd.f32 %v964_v9, %v732_v29  ;;  %v3045_v35 = vpop.f32.mrb[9].mxu0 }
 0x173   : > { %v967_v59 = vpop.f32.mrb[10].mxu0 }
 0x174   : > { %v1103_v5 = vsub.f32 0.0, %v965_v56  ;;  %v3046_v50 = vpop.f32.mrb[11].mxu0 }
 0x176   : > { %v1759_v55 = vsub.f32 %v1103_v5, %v1751_v26 }
 0x178   : > { %1767 = vst [vmem:[%s4336_s10 + $0x20] sm:$0xff] %v1759_v55 }
 0x181   : > { %v1007_v58 = vpop.f32.mrb[8].mxu1 }
 0x182   : > { %v1008_v25 = vadd.f32 %v1007_v58, %v739_v54  ;;  %v3051_v34 = vpop.f32.mrb[9].mxu1 }
 0x183   : > { %v1010_v42 = vpop.f32.mrb[10].mxu1 }
 0x184   : > { %v1104_v17 = vsub.f32 0.0, %v1008_v25  ;;  %v3052_v52 = vpop.f32.mrb[11].mxu1 }
 0x186   : > { %v1760_v60 = vsub.f32 %v1104_v17, %v1752_v63 }
 0x187   : > { %v1050_v6 = vpop.f32.mrb[12].mxu0 }
 0x188   : > { %1768 = vst [vmem:[%s4336_s10 + $0x28] sm:$0xff] %v1760_v60  ;;  %v1051_v12 = vadd.f32 %v1050_v6, %v746_v37  ;;  %v3057_v16 = vpop.f32.mrb[13].mxu0 }
 0x189   : > { %v1053_v57 = vpop.f32.mrb[14].mxu0 }
 0x18a   : > { %v1105_v3 = vsub.f32 0.0, %v1051_v12  ;;  %v3058_v4 = vpop.f32.mrb[15].mxu0 }
 0x18c   : > { %v1761_v13 = vsub.f32 %v1105_v3, %v1753_v46 }
 0x18e   : > { %1769 = vst [vmem:[%s4336_s10 + $0x30] sm:$0xff] %v1761_v13 }
 0x192   : > { %v1093_v27 = vpop.f32.mrb[12].mxu1 }
 0x193   : > { %v1094_v36 = vadd.f32 %v1093_v27, %v753_v38  ;;  %v3063_v43 = vpop.f32.mrb[13].mxu1 }
 0x194   : > { %v1096_v19 = vpop.f32.mrb[14].mxu1 }
 0x195   : > { %v1106_v29 = vsub.f32 0.0, %v1094_v36  ;;  %v3064_v14 = vpop.f32.mrb[15].mxu1 }
 0x197   : > { %v1762_v9 = vsub.f32 %v1106_v29, %v1754_v62 }
 0x199   : > { %1770 = vst [vmem:[%s4336_s10 + $0x38] sm:$0xff] %v1762_v9 }
 0x1c7   : > { %v4355_v11 = vpop.xlane.xlu1 %1771 }
 0x1c8   : > { %vm1803_vm4 = vcmp.eq.f32.partialorder %v4266_v18, %v4355_v11 }
 0x1c9   : > { %v1811_v56 = vsel %vm1803_vm4, -1.0, %v4266_v18 }
 0x1ca   : > { %1819 = vmax.xlane.f32.xlu0 %v1811_v56 }
 0x1cb   : > { %v4360_v35 = vpop.xlane.xlu0 %1773 }
 0x1cc   : > { %vm1804_vm12 = vcmp.eq.f32.partialorder %v4280_v22, %v4360_v35 }
 0x1cd   : > { %v1812_v59 = vsel %vm1804_vm12, -1.0, %v4280_v22 }
 0x1ce   : > { %1821 = vmax.xlane.f32.xlu1 %v1812_v59 }
 0x1cf   : > { %v4365_v7 = vpop.xlane.xlu1 %1777  ;;  %v4367_v30 = vpop.xlane.xlu0 %1775 }
 0x1d0   : > { %vm1806_vm13 = vcmp.eq.f32.partialorder %v4296_v53, %v4365_v7  ;;  %vm1805_vm14 = vcmp.eq.f32.partialorder %v4294_v44, %v4367_v30 }
 0x1d1   : > { %v1814_v18 = vsel %vm1806_vm13, -1.0, %v4296_v53  ;;  %v1813_v45 = vsel %vm1805_vm14, -1.0, %v4294_v44 }
 0x1d2   : > { %1825 = vmax.xlane.f32.xlu1 %v1814_v18  ;;  %1823 = vmax.xlane.f32.xlu0 %v1813_v45 }
 0x1d3   : > { %v4375_v10 = vpop.xlane.xlu1 %1781  ;;  %v4377_v22 = vpop.xlane.xlu0 %1779 }
 0x1d4   : > { %vm1808_vm15 = vcmp.eq.f32.partialorder %v4307_v1, %v4375_v10  ;;  %vm1807_vm1 = vcmp.eq.f32.partialorder %v4305_v39, %v4377_v22 }
 0x1d5   : > { %v1816_v24 = vsel %vm1808_vm15, -1.0, %v4307_v1  ;;  %v1815_v5 = vsel %vm1807_vm1, -1.0, %v4305_v39 }
 0x1d6   : > { %1829 = vmax.xlane.f32.xlu1 %v1816_v24  ;;  %1827 = vmax.xlane.f32.xlu0 %v1815_v5 }
 0x1d7   : > { %v4385_v53 = vpop.xlane.xlu1 %1785  ;;  %v4387_v44 = vpop.xlane.xlu0 %1783 }
 0x1d8   : > { %4956 = vst [vmem:[#allocation11_spill] sm:$0xff] %v4385_v53  ;;  %4957 = vst [vmem:[#allocation12_spill] sm:$0xff] %v4387_v44  ;;  %vm1810_vm2 = vcmp.eq.f32.partialorder %v4315_v31, %v4385_v53  ;;  %vm1809_vm3 = vcmp.eq.f32.partialorder %v4313_v49, %v4387_v44 }
 0x1d9   : > { %v1818_v26 = vsel %vm1810_vm2, -1.0, %v4315_v31  ;;  %v1817_v50 = vsel %vm1809_vm3, -1.0, %v4313_v49 }
 0x1da   : > { %1833 = vmax.xlane.f32.xlu1 %v1818_v26  ;;  %1831 = vmax.xlane.f32.xlu0 %v1817_v50 }
 0x257   : > { %v4395_v1 = vpop.xlane.xlu0 %1819 }
 0x258   : > { %vm1851_vm5 = vcmp.eq.f32.partialorder %v1811_v56, %v4395_v1 }
 0x259   : > { %v1859_v39 = vsel %vm1851_vm5, -1.0, %v1811_v56 }
 0x25a   : > { %1867 = vmax.xlane.f32.xlu0 %v1859_v39 }
 0x25b   : > { %v4398_v21 = vpop.xlane.xlu1 %1821 }
 0x25c   : > { %vm1852_vm6 = vcmp.eq.f32.partialorder %v1812_v59, %v4398_v21 }
 0x25d   : > { %v1860_v55 = vsel %vm1852_vm6, -1.0, %v1812_v59 }
 0x25e   : > { %1869 = vmax.xlane.f32.xlu1 %v1860_v55 }
 0x25f   : > { %v4401_v32 = vpop.xlane.xlu1 %1825  ;;  %v4403_v2 = vpop.xlane.xlu0 %1823 }
 0x260   : > { %vm1854_vm7 = vcmp.eq.f32.partialorder %v1814_v18, %v4401_v32  ;;  %vm1853_vm8 = vcmp.eq.f32.partialorder %v1813_v45, %v4403_v2 }
 0x261   : > { %v1862_v49 = vsel %vm1854_vm7, -1.0, %v1814_v18  ;;  %v1861_v31 = vsel %vm1853_vm8, -1.0, %v1813_v45 }
 0x262   : > { %1873 = vmax.xlane.f32.xlu1 %v1862_v49  ;;  %1871 = vmax.xlane.f32.xlu0 %v1861_v31 }
 0x263   : > { %v4407_v40 = vpop.xlane.xlu1 %1829  ;;  %v4409_v54 = vpop.xlane.xlu0 %1827 }
 0x264   : > { %vm1856_vm9 = vcmp.eq.f32.partialorder %v1816_v24, %v4407_v40  ;;  %vm1855_vm0 = vcmp.eq.f32.partialorder %v1815_v5, %v4409_v54 }
 0x265   : > { %v1864_v20 = vsel %vm1856_vm9, -1.0, %v1816_v24  ;;  %v1863_v41 = vsel %vm1855_vm0, -1.0, %v1815_v5 }
 0x266   : > { %1877 = vmax.xlane.f32.xlu1 %v1864_v20  ;;  %1875 = vmax.xlane.f32.xlu0 %v1863_v41 }
 0x267   : > { %v4413_v23 = vpop.xlane.xlu1 %1833  ;;  %v4415_v51 = vpop.xlane.xlu0 %1831 }
 0x268   : > { %4958 = vst [vmem:[#allocation13_spill] sm:$0xff] %v4413_v23  ;;  %4959 = vst [vmem:[#allocation14_spill] sm:$0xff] %v4415_v51  ;;  %vm1858_vm10 = vcmp.eq.f32.partialorder %v1818_v26, %v4413_v23  ;;  %vm1857_vm11 = vcmp.eq.f32.partialorder %v1817_v50, %v4415_v51 }
 0x269   : > { %v1866_v58 = vsel %vm1858_vm10, -1.0, %v1818_v26  ;;  %v1865_v25 = vsel %vm1857_vm11, -1.0, %v1817_v50 }
 0x26a   : > { %1881 = vmax.xlane.f32.xlu1 %v1866_v58  ;;  %1879 = vmax.xlane.f32.xlu0 %v1865_v25 }
 0x2e7   : > { %v4419_v34 = vpop.xlane.xlu0 %1867 }
 0x2e8   : > { %vm1899_vm4 = vcmp.eq.f32.partialorder %v1859_v39, %v4419_v34 }
 0x2e9   : > { %v1907_v42 = vsel %vm1899_vm4, -1.0, %v1859_v39 }
 0x2ea   : > { %1915 = vmax.xlane.f32.xlu0 %v1907_v42 }
 0x2eb   : > { %v4422_v17 = vpop.xlane.xlu1 %1869 }
 0x2ec   : > { %vm1900_vm12 = vcmp.eq.f32.partialorder %v1860_v55, %v4422_v17 }
 0x2ed   : > { %v1908_v63 = vsel %vm1900_vm12, -1.0, %v1860_v55 }
 0x2ee   : > { %1917 = vmax.xlane.f32.xlu1 %v1908_v63 }
 0x2ef   : > { %v4425_v52 = vpop.xlane.xlu1 %1873  ;;  %v4427_v28 = vpop.xlane.xlu0 %1871 }
 0x2f0   : > { %vm1902_vm13 = vcmp.eq.f32.partialorder %v1862_v49, %v4425_v52  ;;  %vm1901_vm14 = vcmp.eq.f32.partialorder %v1861_v31, %v4427_v28 }
 0x2f1   : > { %v1910_v33 = vsel %vm1902_vm13, -1.0, %v1862_v49  ;;  %v1909_v60 = vsel %vm1901_vm14, -1.0, %v1861_v31 }
 0x2f2   : > { %1921 = vmax.xlane.f32.xlu1 %v1910_v33  ;;  %1919 = vmax.xlane.f32.xlu0 %v1909_v60 }
 0x2f3   : > { %v4431_v47 = vpop.xlane.xlu1 %1877  ;;  %v4433_v37 = vpop.xlane.xlu0 %1875 }
 0x2f4   : > { %vm1904_vm15 = vcmp.eq.f32.partialorder %v1864_v20, %v4431_v47  ;;  %vm1903_vm1 = vcmp.eq.f32.partialorder %v1863_v41, %v4433_v37 }
 0x2f5   : > { %v1912_v8 = vsel %vm1904_vm15, -1.0, %v1864_v20  ;;  %v1911_v61 = vsel %vm1903_vm1, -1.0, %v1863_v41 }
 0x2f6   : > { %1925 = vmax.xlane.f32.xlu1 %v1912_v8  ;;  %1923 = vmax.xlane.f32.xlu0 %v1911_v61 }
 0x2f7   : > { %v4437_v6 = vpop.xlane.xlu1 %1881  ;;  %v4439_v12 = vpop.xlane.xlu0 %1879 }
 0x2f8   : > { %4960 = vst [vmem:[#allocation15_spill] sm:$0xff] %v4437_v6  ;;  %4961 = vst [vmem:[#allocation16_spill] sm:$0xff] %v4439_v12  ;;  %vm1906_vm2 = vcmp.eq.f32.partialorder %v1866_v58, %v4437_v6  ;;  %vm1905_vm3 = vcmp.eq.f32.partialorder %v1865_v25, %v4439_v12 }
 0x2f9   : > { %v1914_v0 = vsel %vm1906_vm2, -1.0, %v1866_v58  ;;  %v1913_v16 = vsel %vm1905_vm3, -1.0, %v1865_v25 }
 0x2fa   : > { %1929 = vmax.xlane.f32.xlu1 %v1914_v0  ;;  %1927 = vmax.xlane.f32.xlu0 %v1913_v16 }
 0x377   : > { %v4443_v57 = vpop.xlane.xlu0 %1915 }
 0x378   : > { %vm1947_vm5 = vcmp.eq.f32.partialorder %v1907_v42, %v4443_v57 }
 0x379   : > { %v1955_v3 = vsel %vm1947_vm5, -1.0, %v1907_v42 }
 0x37a   : > { %1963 = vmax.xlane.f32.xlu0 %v1955_v3 }
 0x37b   : > { %v4446_v46 = vpop.xlane.xlu1 %1917 }
 0x37c   : > { %vm1948_vm6 = vcmp.eq.f32.partialorder %v1908_v63, %v4446_v46 }
 0x37d   : > { %v1956_v4 = vsel %vm1948_vm6, -1.0, %v1908_v63 }
 0x37e   : > { %1965 = vmax.xlane.f32.xlu1 %v1956_v4 }
 0x37f   : > { %v4449_v15 = vpop.xlane.xlu1 %1921  ;;  %v4451_v13 = vpop.xlane.xlu0 %1919 }
 0x380   : > { %vm1950_vm7 = vcmp.eq.f32.partialorder %v1910_v33, %v4449_v15  ;;  %vm1949_vm8 = vcmp.eq.f32.partialorder %v1909_v60, %v4451_v13 }
 0x381   : > { %v1958_v38 = vsel %vm1950_vm7, -1.0, %v1910_v33  ;;  %v1957_v48 = vsel %vm1949_vm8, -1.0, %v1909_v60 }
 0x382   : > { %1969 = vmax.xlane.f32.xlu1 %v1958_v38  ;;  %1967 = vmax.xlane.f32.xlu0 %v1957_v48 }
 0x383   : > { %v4455_v27 = vpop.xlane.xlu1 %1925  ;;  %v4457_v36 = vpop.xlane.xlu0 %1923 }
 0x384   : > { %vm1952_vm9 = vcmp.eq.f32.partialorder %v1912_v8, %v4455_v27  ;;  %vm1951_vm0 = vcmp.eq.f32.partialorder %v1911_v61, %v4457_v36 }
 0x385   : > { %v1960_v43 = vsel %vm1952_vm9, -1.0, %v1912_v8  ;;  %v1959_v19 = vsel %vm1951_vm0, -1.0, %v1911_v61 }
 0x386   : > { %1973 = vmax.xlane.f32.xlu1 %v1960_v43  ;;  %1971 = vmax.xlane.f32.xlu0 %v1959_v19 }
 0x387   : > { %v4461_v29 = vpop.xlane.xlu1 %1929  ;;  %v4463_v62 = vpop.xlane.xlu0 %1927 }
 0x388   : > { %4962 = vst [vmem:[#allocation17_spill] sm:$0xff] %v4461_v29  ;;  %4963 = vst [vmem:[#allocation18_spill] sm:$0xff] %v4463_v62  ;;  %vm1954_vm10 = vcmp.eq.f32.partialorder %v1914_v0, %v4461_v29  ;;  %vm1953_vm11 = vcmp.eq.f32.partialorder %v1913_v16, %v4463_v62 }
 0x389   : > { %v1962_v14 = vsel %vm1954_vm10, -1.0, %v1914_v0  ;;  %v1961_v9 = vsel %vm1953_vm11, -1.0, %v1913_v16 }
 0x38a   : > { %1977 = vmax.xlane.f32.xlu1 %v1962_v14  ;;  %1975 = vmax.xlane.f32.xlu0 %v1961_v9 }
 0x407   : > { %v4467_v56 = vpop.xlane.xlu0 %1963 }
 0x408   : > { %vm1995_vm4 = vcmp.eq.f32.partialorder %v1955_v3, %v4467_v56 }
 0x409   : > { %v2003_v59 = vsel %vm1995_vm4, -1.0, %v1955_v3 }
 0x40a   : > { %2011 = vmax.xlane.f32.xlu0 %v2003_v59 }
 0x40b   : > { %v4470_v18 = vpop.xlane.xlu1 %1965 }
 0x40c   : > { %vm1996_vm12 = vcmp.eq.f32.partialorder %v1956_v4, %v4470_v18 }
 0x40d   : > { %v2004_v45 = vsel %vm1996_vm12, -1.0, %v1956_v4 }
 0x40e   : > { %2013 = vmax.xlane.f32.xlu1 %v2004_v45 }
 0x40f   : > { %v4473_v24 = vpop.xlane.xlu1 %1969  ;;  %v4475_v5 = vpop.xlane.xlu0 %1967 }
 0x410   : > { %vm1998_vm13 = vcmp.eq.f32.partialorder %v1958_v38, %v4473_v24  ;;  %vm1997_vm14 = vcmp.eq.f32.partialorder %v1957_v48, %v4475_v5 }
 0x411   : > { %v2006_v26 = vsel %vm1998_vm13, -1.0, %v1958_v38  ;;  %v2005_v50 = vsel %vm1997_vm14, -1.0, %v1957_v48 }
 0x412   : > { %2017 = vmax.xlane.f32.xlu1 %v2006_v26  ;;  %2015 = vmax.xlane.f32.xlu0 %v2005_v50 }
 0x413   : > { %v4479_v39 = vpop.xlane.xlu1 %1973  ;;  %v4481_v55 = vpop.xlane.xlu0 %1971 }
 0x414   : > { %vm2000_vm15 = vcmp.eq.f32.partialorder %v1960_v43, %v4479_v39  ;;  %vm1999_vm1 = vcmp.eq.f32.partialorder %v1959_v19, %v4481_v55 }
 0x415   : > { %v2008_v49 = vsel %vm2000_vm15, -1.0, %v1960_v43  ;;  %v2007_v31 = vsel %vm1999_vm1, -1.0, %v1959_v19 }
 0x416   : > { %2021 = vmax.xlane.f32.xlu1 %v2008_v49  ;;  %2019 = vmax.xlane.f32.xlu0 %v2007_v31 }
 0x417   : > { %v4485_v20 = vpop.xlane.xlu1 %1977  ;;  %v4487_v41 = vpop.xlane.xlu0 %1975 }
 0x418   : > { %4964 = vst [vmem:[#allocation19_spill] sm:$0xff] %v4485_v20  ;;  %4965 = vst [vmem:[#allocation20_spill] sm:$0xff] %v4487_v41  ;;  %vm2002_vm2 = vcmp.eq.f32.partialorder %v1962_v14, %v4485_v20  ;;  %vm2001_vm3 = vcmp.eq.f32.partialorder %v1961_v9, %v4487_v41 }
 0x419   : > { %v2010_v58 = vsel %vm2002_vm2, -1.0, %v1962_v14  ;;  %v2009_v25 = vsel %vm2001_vm3, -1.0, %v1961_v9 }
 0x41a   : > { %2025 = vmax.xlane.f32.xlu1 %v2010_v58  ;;  %2023 = vmax.xlane.f32.xlu0 %v2009_v25 }
 0x497   : > { %v4491_v42 = vpop.xlane.xlu0 %2011 }
 0x498   : > { %vm2043_vm5 = vcmp.eq.f32.partialorder %v2003_v59, %v4491_v42 }
 0x499   : > { %v2051_v63 = vsel %vm2043_vm5, -1.0, %v2003_v59 }
 0x49a   : > { %2059 = vmax.xlane.f32.xlu0 %v2051_v63 }
 0x49b   : > { %v4494_v33 = vpop.xlane.xlu1 %2013 }
 0x49c   : > { %vm2044_vm6 = vcmp.eq.f32.partialorder %v2004_v45, %v4494_v33 }
 0x49d   : > { %v2052_v60 = vsel %vm2044_vm6, -1.0, %v2004_v45 }
 0x49e   : > { %2061 = vmax.xlane.f32.xlu1 %v2052_v60 }
 0x49f   : > { %v4497_v8 = vpop.xlane.xlu1 %2017  ;;  %v4499_v61 = vpop.xlane.xlu0 %2015 }
 0x4a0   : > { %vm2046_vm7 = vcmp.eq.f32.partialorder %v2006_v26, %v4497_v8  ;;  %vm2045_vm8 = vcmp.eq.f32.partialorder %v2005_v50, %v4499_v61 }
 0x4a1   : > { %v2054_v0 = vsel %vm2046_vm7, -1.0, %v2006_v26  ;;  %v2053_v16 = vsel %vm2045_vm8, -1.0, %v2005_v50 }
 0x4a2   : > { %2065 = vmax.xlane.f32.xlu1 %v2054_v0  ;;  %2063 = vmax.xlane.f32.xlu0 %v2053_v16 }
 0x4a3   : > { %v4503_v3 = vpop.xlane.xlu1 %2021  ;;  %v4505_v4 = vpop.xlane.xlu0 %2019 }
 0x4a4   : > { %vm2048_vm9 = vcmp.eq.f32.partialorder %v2008_v49, %v4503_v3  ;;  %vm2047_vm0 = vcmp.eq.f32.partialorder %v2007_v31, %v4505_v4 }
 0x4a5   : > { %v2056_v38 = vsel %vm2048_vm9, -1.0, %v2008_v49  ;;  %v2055_v48 = vsel %vm2047_vm0, -1.0, %v2007_v31 }
 0x4a6   : > { %2069 = vmax.xlane.f32.xlu1 %v2056_v38  ;;  %2067 = vmax.xlane.f32.xlu0 %v2055_v48 }
 0x4a7   : > { %v4509_v43 = vpop.xlane.xlu1 %2025  ;;  %v4511_v19 = vpop.xlane.xlu0 %2023 }
 0x4a8   : > { %4966 = vst [vmem:[#allocation21_spill] sm:$0xff] %v4509_v43  ;;  %4967 = vst [vmem:[#allocation22_spill] sm:$0xff] %v4511_v19  ;;  %vm2050_vm10 = vcmp.eq.f32.partialorder %v2010_v58, %v4509_v43  ;;  %vm2049_vm11 = vcmp.eq.f32.partialorder %v2009_v25, %v4511_v19 }
 0x4a9   : > { %v2058_v14 = vsel %vm2050_vm10, -1.0, %v2010_v58  ;;  %v2057_v9 = vsel %vm2049_vm11, -1.0, %v2009_v25 }
 0x4aa   : > { %2073 = vmax.xlane.f32.xlu1 %v2058_v14  ;;  %2071 = vmax.xlane.f32.xlu0 %v2057_v9 }
 0x527   : > { %v4515_v59 = vpop.xlane.xlu0 %2059 }
 0x528   : > { %vm2091_vm4 = vcmp.eq.f32.partialorder %v2051_v63, %v4515_v59 }
 0x529   : > { %v2099_v45 = vsel %vm2091_vm4, -1.0, %v2051_v63 }
 0x52a   : > { %2107 = vmax.xlane.f32.xlu0 %v2099_v45 }
 0x52b   : > { %v4518_v26 = vpop.xlane.xlu1 %2061 }
 0x52c   : > { %vm2092_vm12 = vcmp.eq.f32.partialorder %v2052_v60, %v4518_v26 }
 0x52d   : > { %v2100_v50 = vsel %vm2092_vm12, -1.0, %v2052_v60 }
 0x52e   : > { %2109 = vmax.xlane.f32.xlu1 %v2100_v50 }
 0x52f   : > { %v4521_v49 = vpop.xlane.xlu1 %2065  ;;  %v4523_v31 = vpop.xlane.xlu0 %2063 }
 0x530   : > { %vm2094_vm13 = vcmp.eq.f32.partialorder %v2054_v0, %v4521_v49  ;;  %vm2093_vm14 = vcmp.eq.f32.partialorder %v2053_v16, %v4523_v31 }
 0x531   : > { %v2102_v58 = vsel %vm2094_vm13, -1.0, %v2054_v0  ;;  %v2101_v25 = vsel %vm2093_vm14, -1.0, %v2053_v16 }
 0x532   : > { %2113 = vmax.xlane.f32.xlu1 %v2102_v58  ;;  %2111 = vmax.xlane.f32.xlu0 %v2101_v25 }
 0x533   : > { %v4527_v63 = vpop.xlane.xlu1 %2069  ;;  %v4529_v19 = vpop.xlane.xlu0 %2067 }
 0x534   : > { %vm2096_vm15 = vcmp.eq.f32.partialorder %v2056_v38, %v4527_v63  ;;  %vm2095_vm1 = vcmp.eq.f32.partialorder %v2055_v48, %v4529_v19 }
 0x535   : > { %v2104_v60 = vsel %vm2096_vm15, -1.0, %v2056_v38  ;;  %v2103_v43 = vsel %vm2095_vm1, -1.0, %v2055_v48 }
 0x536   : > { %2117 = vmax.xlane.f32.xlu1 %v2104_v60  ;;  %2115 = vmax.xlane.f32.xlu0 %v2103_v43 }
 0x537   : > { %v4533_v41 = vpop.xlane.xlu1 %2073  ;;  %v4535_v20 = vpop.xlane.xlu0 %2071 }
 0x538   : > { %4968 = vst [vmem:[#allocation23_spill] sm:$0xff] %v4533_v41  ;;  %4969 = vst [vmem:[#allocation24_spill] sm:$0xff] %v4535_v20  ;;  %vm2098_vm2 = vcmp.eq.f32.partialorder %v2058_v14, %v4533_v41  ;;  %vm2097_vm3 = vcmp.eq.f32.partialorder %v2057_v9, %v4535_v20 }
 0x539   : > { %v2106_v0 = vsel %vm2098_vm2, -1.0, %v2058_v14  ;;  %v2105_v16 = vsel %vm2097_vm3, -1.0, %v2057_v9 }
 0x53a   : > { %2121 = vmax.xlane.f32.xlu1 %v2106_v0  ;;  %2119 = vmax.xlane.f32.xlu0 %v2105_v16 }
 0x5b7   : > { %v4539_v62 = vpop.xlane.xlu0 %2107 }
 0x5b8   : > { %vm2139_vm5 = vcmp.eq.f32.partialorder %v2099_v45, %v4539_v62 }
 0x5b9   : > { %v2147_v38 = vsel %vm2139_vm5, -1.0, %v2099_v45 }
 0x5ba   : > { %2155 = vmax.xlane.f32.xlu0 %v2147_v38 }
 0x5bb   : > { %v4542_v48 = vpop.xlane.xlu1 %2109 }
 0x5bc   : > { %vm2140_vm6 = vcmp.eq.f32.partialorder %v2100_v50, %v4542_v48 }
 0x5bd   : > { %v2148_v29 = vsel %vm2140_vm6, -1.0, %v2100_v50 }
 0x5be   : > { %2157 = vmax.xlane.f32.xlu1 %v2148_v29 }
 0x5bf   : > { %v4545_v12 = vpop.xlane.xlu1 %2113  ;;  %v4547_v41 = vpop.xlane.xlu0 %2111 }
 0x5c0   : > { %vm2142_vm7 = vcmp.eq.f32.partialorder %v2102_v58, %v4545_v12  ;;  %vm2141_vm8 = vcmp.eq.f32.partialorder %v2101_v25, %v4547_v41 }
 0x5c1   : > { %v2150_v14 = vsel %vm2142_vm7, -1.0, %v2102_v58  ;;  %v2149_v9 = vsel %vm2141_vm8, -1.0, %v2101_v25 }
 0x5c2   : > { %2161 = vmax.xlane.f32.xlu1 %v2150_v14  ;;  %2159 = vmax.xlane.f32.xlu0 %v2149_v9 }
 0x5c3   : > { %v4551_v45 = vpop.xlane.xlu1 %2117  ;;  %v4553_v20 = vpop.xlane.xlu0 %2115 }
 0x5c4   : > { %4970 = vst [vmem:[#allocation25_spill] sm:$0xff] %v4551_v45  ;;  %4971 = vst [vmem:[#allocation26_spill] sm:$0xff] %v4553_v20  ;;  %vm2144_vm9 = vcmp.eq.f32.partialorder %v2104_v60, %v4551_v45  ;;  %vm2143_vm0 = vcmp.eq.f32.partialorder %v2103_v43, %v4553_v20 }
 0x5c5   : > { %v2152_v50 = vsel %vm2144_vm9, -1.0, %v2104_v60  ;;  %v2151_v44 = vsel %vm2143_vm0, -1.0, %v2103_v43 }
 0x5c6   : > { %2165 = vmax.xlane.f32.xlu1 %v2152_v50  ;;  %2163 = vmax.xlane.f32.xlu0 %v2151_v44 }
 0x5c7   : > { %v4557_v6 = vpop.xlane.xlu1 %2121  ;;  %v4559_v53 = vpop.xlane.xlu0 %2119 }
 0x5c8   : > { %4972 = vst [vmem:[#allocation27_spill] sm:$0xff] %v4557_v6  ;;  %4973 = vst [vmem:[#allocation28_spill] sm:$0xff] %v4559_v53  ;;  %vm2146_vm10 = vcmp.eq.f32.partialorder %v2106_v0, %v4557_v6  ;;  %vm2145_vm11 = vcmp.eq.f32.partialorder %v2105_v16, %v4559_v53 }
 0x5c9   : > { %v2154_v58 = vsel %vm2146_vm10, -1.0, %v2106_v0  ;;  %v2153_v25 = vsel %vm2145_vm11, -1.0, %v2105_v16 }
 0x5ca   : > { %2169 = vmax.xlane.f32.xlu1 %v2154_v58  ;;  %2167 = vmax.xlane.f32.xlu0 %v2153_v25 }
 0x647   : > { %v4563_v51 = vpop.xlane.xlu0 %2155 }
 0x648   : > { %vm2187_vm4 = vcmp.eq.f32.partialorder %v2147_v38, %v4563_v51 }
 0x649   : > { %v4566_v60 = vsel %vm2187_vm4, -1.0, %v2147_v38 }
 0x64a   : > { %2203 = vmax.xlane.f32.xlu0 %v4566_v60 }
 0x64b   : > { %v4569_v43 = vpop.xlane.xlu1 %2157 }
 0x64c   : > { %vm2188_vm12 = vcmp.eq.f32.partialorder %v2148_v29, %v4569_v43 }
 0x64d   : > { %v4572_v23 = vsel %vm2188_vm12, -1.0, %v2148_v29 }
 0x64e   : > { %4974 = vst [vmem:[#allocation29_spill] sm:$0xff] %v4572_v23  ;;  %2205 = vmax.xlane.f32.xlu1 %v4572_v23 }
 0x64f   : > { %v4575_v0 = vpop.xlane.xlu1 %2161  ;;  %v4577_v16 = vpop.xlane.xlu0 %2159 }
 0x650   : > { %4975 = vst [vmem:[#allocation30_spill] sm:$0xff] %v4577_v16  ;;  %vm2190_vm13 = vcmp.eq.f32.partialorder %v2150_v14, %v4575_v0  ;;  %vm2189_vm14 = vcmp.eq.f32.partialorder %v2149_v9, %v4577_v16 }
 0x651   : > { %v4581_v38 = vsel %vm2190_vm13, -1.0, %v2150_v14  ;;  %v4583_v53 = vsel %vm2189_vm14, -1.0, %v2149_v9 }
 0x652   : > { %4976 = vst [vmem:[#allocation31_spill] sm:$0xff] %v4581_v38  ;;  %4977 = vst [vmem:[#allocation32_spill] sm:$0xff] %v4583_v53  ;;  %2209 = vmax.xlane.f32.xlu1 %v4581_v38  ;;  %2207 = vmax.xlane.f32.xlu0 %v4583_v53 }
 0x653   : > { %v4587_v29 = vpop.xlane.xlu1 %2165  ;;  %v4589_v6 = vpop.xlane.xlu0 %2163 }
 0x654   : > { %4978 = vst [vmem:[#allocation33_spill] sm:$0xff] %v4587_v29  ;;  %4979 = vst [vmem:[#allocation34_spill] sm:$0xff] %v4589_v6  ;;  %vm2192_vm15 = vcmp.eq.f32.partialorder %v2152_v50, %v4587_v29  ;;  %vm2191_vm1 = vcmp.eq.f32.partialorder %v2151_v44, %v4589_v6 }
 0x655   : > { %v4593_v20 = vsel %vm2192_vm15, -1.0, %v2152_v50  ;;  %v4595_v45 = vsel %vm2191_vm1, -1.0, %v2151_v44  ;;  %v1787_v44 = vmax.f32 %v4355_v11, 0.0  ;;  %v1835_v50 = vmax.f32 %v4395_v1, 0.0 }
 0x656   : > { %4980 = vst [vmem:[#allocation35_spill] sm:$0xff] %v4593_v20  ;;  %4981 = vst [vmem:[#allocation36_spill] sm:$0xff] %v4595_v45  ;;  %2213 = vmax.xlane.f32.xlu1 %v4593_v20  ;;  %2211 = vmax.xlane.f32.xlu0 %v4595_v45  ;;  %v1836_v45 = vmax.f32 %v4398_v21, 0.0  ;;  %v1788_v20 = vmax.f32 %v4360_v35, 0.0  ;;  %v1839_v11 = vmax.f32 %v4409_v54, 0.0  ;;  %v1791_v1 = vmax.f32 %v4377_v22, 0.0 }
 0x657   : > { %v4599_v14 = vpop.xlane.xlu1 %2169  ;;  %v4601_v9 = vpop.xlane.xlu0 %2167  ;;  %v1883_v21 = vmax.f32 %v4419_v34, 0.0  ;;  %v1884_v35 = vmax.f32 %v4422_v17, 0.0  ;;  %v1843_v6 = vadd.f32 %v1835_v50, %v1787_v44  ;;  %v1932_v54 = vmax.f32 %v4446_v46, 0.0 }
 0x658   : > { %4982 = vst [vmem:[#allocation37_spill] sm:$0xff] %v4599_v14  ;;  %4983 = vst [vmem:[#allocation38_spill] sm:$0xff] %v4601_v9  ;;  %vm2194_vm2 = vcmp.eq.f32.partialorder %v2154_v58, %v4599_v14  ;;  %vm2193_vm3 = vcmp.eq.f32.partialorder %v2153_v25, %v4601_v9  ;;  %v1790_v14 = vmax.f32 %v4365_v7, 0.0  ;;  %v1789_v9 = vmax.f32 %v4367_v30, 0.0 }
 0x659   : > { %v4605_v53 = vsel %vm2194_vm2, -1.0, %v2154_v58  ;;  %v4607_v38 = vsel %vm2193_vm3, -1.0, %v2153_v25  ;;  %v1838_v58 = vmax.f32 %v4401_v32, 0.0  ;;  %v1792_v25 = vmax.f32 %v4375_v10, 0.0 }
 0x65a   : > { %4984 = vst [vmem:[#allocation39_spill] sm:$0xff] %v4605_v53  ;;  %4985 = vst [vmem:[#allocation40_spill] sm:$0xff] %v4607_v38  ;;  %2217 = vmax.xlane.f32.xlu1 %v4605_v53  ;;  %2215 = vmax.xlane.f32.xlu0 %v4607_v38  ;;  %v1837_v53 = vmax.f32 %v4403_v2, 0.0  ;;  %v1840_v38 = vmax.f32 %v4407_v40, 0.0  ;;  %v1886_v7 = vmax.f32 %v4425_v52, 0.0  ;;  %v1844_v30 = vadd.f32 %v1836_v45, %v1788_v20 }
 0x65b   : > { %v1885_v32 = vmax.f32 %v4427_v28, 0.0  ;;  %v1888_v10 = vmax.f32 %v4431_v47, 0.0  ;;  %v1846_v29 = vadd.f32 %v1838_v58, %v1790_v14  ;;  %v1887_v2 = vmax.f32 %v4433_v37, 0.0 }
 0x65c   : > { %v1931_v40 = vmax.f32 %v4443_v57, 0.0  ;;  %v1845_v22 = vadd.f32 %v1837_v53, %v1789_v9  ;;  %v1848_v23 = vadd.f32 %v1840_v38, %v1792_v25  ;;  %v1847_v34 = vadd.f32 %v1839_v11, %v1791_v1 }
 0x65d   : > { %v1934_v17 = vmax.f32 %v4449_v15, 0.0  ;;  %v1891_v16 = vadd.f32 %v1883_v21, %v1843_v6  ;;  %v1892_v52 = vadd.f32 %v1884_v35, %v1844_v30  ;;  %v1894_v44 = vadd.f32 %v1886_v7, %v1846_v29 }
 0x65e   : > { %v1979_v20 = vmax.f32 %v4467_v56, 0.0  ;;  %v1893_v28 = vadd.f32 %v1885_v32, %v1845_v22  ;;  %v1896_v45 = vadd.f32 %v1888_v10, %v1848_v23  ;;  %v1933_v47 = vmax.f32 %v4451_v13, 0.0 }
 0x65f   : > { %v1936_v37 = vmax.f32 %v4455_v27, 0.0  ;;  %v1895_v14 = vadd.f32 %v1887_v2, %v1847_v34  ;;  %v1939_v57 = vadd.f32 %v1931_v40, %v1891_v16  ;;  %v1940_v50 = vadd.f32 %v1932_v54, %v1892_v52 }
 0x660   : > { %v2027_v53 = vmax.f32 %v4491_v42, 0.0  ;;  %v1942_v46 = vadd.f32 %v1934_v17, %v1894_v44  ;;  %v1935_v38 = vmax.f32 %v4457_v36, 0.0  ;;  %v1980_v6 = vmax.f32 %v4470_v18, 0.0 }
 0x661   : > { %v1982_v15 = vmax.f32 %v4473_v24, 0.0  ;;  %v1987_v29 = vadd.f32 %v1979_v20, %v1939_v57  ;;  %v1981_v56 = vmax.f32 %v4475_v5, 0.0  ;;  %v1984_v23 = vmax.f32 %v4479_v39, 0.0  ;;  %v4988_v57 = vld [vmem:[#allocation25_spill] sm:$0xff] }
 0x662   : > { %v2075_v13 = vmax.f32 %v4515_v59, 0.0  ;;  %v1941_v27 = vadd.f32 %v1933_v47, %v1893_v28  ;;  %v1944_v9 = vadd.f32 %v1936_v37, %v1896_v45  ;;  %v1983_v16 = vmax.f32 %v4481_v55, 0.0  ;;  %v4986_v28 = vld [vmem:[#allocation30_spill] sm:$0xff] }
 0x663   : > { %v2028_v42 = vmax.f32 %v4494_v33, 0.0  ;;  %v2035_v58 = vadd.f32 %v2027_v53, %v1987_v29  ;;  %v2030_v36 = vmax.f32 %v4497_v8, 0.0  ;;  %v2029_v18 = vmax.f32 %v4499_v61, 0.0 }
 0x664   : > { %v2123_v24 = vmax.f32 %v4539_v62, 0.0  ;;  %v1943_v25 = vadd.f32 %v1935_v38, %v1895_v14  ;;  %v1988_v11 = vadd.f32 %v1980_v6, %v1940_v50  ;;  %v1990_v5 = vadd.f32 %v1982_v15, %v1942_v46  ;;  %v4987_v14 = vld [vmem:[#allocation29_spill] sm:$0xff]  ;;  %v4989_v50 = vld [vmem:[#allocation26_spill] sm:$0xff] }
 0x665   : > { %v2076_v39 = vmax.f32 %v4518_v26, 0.0  ;;  %v1989_v1 = vadd.f32 %v1981_v56, %v1941_v27  ;;  %v1992_v59 = vadd.f32 %v1984_v23, %v1944_v9  ;;  %v2083_v21 = vadd.f32 %v2075_v13, %v2035_v58  ;;  %v4990_v56 = vld [vmem:[#allocation33_spill] sm:$0xff]  ;;  %v4991_v13 = vld [vmem:[#allocation34_spill] sm:$0xff]  ;;  %v4992_v58 = vld [vmem:[#allocation31_spill] sm:$0xff] }
 0x666   : > { %v2171_v35 = vmax.f32 %v4563_v51, 0.0  ;;  %v1991_v55 = vadd.f32 %v1983_v16, %v1943_v25  ;;  %v2036_v7 = vadd.f32 %v2028_v42, %v1988_v11  ;;  %v2032_v33 = vmax.f32 %v4503_v3, 0.0 }
 0x667   : > { %v2078_v8 = vmax.f32 %v4521_v49, 0.0  ;;  %v2038_v30 = vadd.f32 %v2030_v36, %v1990_v5  ;;  %v2037_v61 = vadd.f32 %v2029_v18, %v1989_v1  ;;  %v2131_v32 = vadd.f32 %v2123_v24, %v2083_v21  ;;  %v4993_v18 = vld [vmem:[#allocation32_spill] sm:$0xff] }
 0x668   : > { %v2124_v62 = vmax.f32 %v4542_v48, 0.0  ;;  %v2031_v10 = vmax.f32 %v4505_v4, 0.0  ;;  %v2084_v2 = vadd.f32 %v2076_v39, %v2036_v7  ;;  %v2077_v26 = vmax.f32 %v4523_v31, 0.0 }
 0x669   : > { %v2126_v40 = vmax.f32 %v4545_v12, 0.0  ;;  %v2179_v51 = vadd.f32 %v2171_v35, %v2131_v32  ;;  %v2172_v22 = vmax.f32 %v4569_v43, 0.0  ;;  %v2040_v3 = vadd.f32 %v2032_v33, %v1992_v59  ;;  %v4994_v33 = vld [vmem:[#allocation35_spill] sm:$0xff] }
 0x66a   : > { %v2086_v49 = vadd.f32 %v2078_v8, %v2038_v30  ;;  %v2125_v17 = vmax.f32 %v4547_v41, 0.0  ;;  %v2080_v4 = vmax.f32 %v4527_v63, 0.0  ;;  %v2079_v31 = vmax.f32 %v4529_v19, 0.0  ;;  %v4995_v30 = vld [vmem:[#allocation36_spill] sm:$0xff] }
 0x66b   : > { %v2132_v52 = vadd.f32 %v2124_v62, %v2084_v2  ;;  %v2039_v43 = vadd.f32 %v2031_v10, %v1991_v55  ;;  %v2085_v44 = vadd.f32 %v2077_v26, %v2037_v61  ;;  %v2174_v20 = vmax.f32 %v4575_v0, 0.0 }
 0x66c   : > { %v2173_v45 = vmax.f32 %v4986_v28, 0.0  ;;  %v2134_v41 = vadd.f32 %v2126_v40, %v2086_v49  ;;  %v2128_v19 = vmax.f32 %v4988_v57, 0.0  ;;  %v2127_v53 = vmax.f32 %v4989_v50, 0.0  ;;  %v4996_v40 = vld [vmem:[#allocation39_spill] sm:$0xff] }
 0x66d   : > { %v2180_v37 = vadd.f32 %v2172_v22, %v2132_v52  ;;  %v2133_v63 = vadd.f32 %v2125_v17, %v2085_v44  ;;  %v2088_v38 = vadd.f32 %v2080_v4, %v2040_v3  ;;  %v2087_v6 = vadd.f32 %v2079_v31, %v2039_v43 }
 0x66e   : > { %v2182_v0 = vadd.f32 %v2174_v20, %v2134_v41  ;;  %v2176_v23 = vmax.f32 %v4990_v56, 0.0  ;;  %v2175_v27 = vmax.f32 %v4991_v13, 0.0 }
 0x66f   : > { %v2181_v29 = vadd.f32 %v2173_v45, %v2133_v63  ;;  %v2136_v24 = vadd.f32 %v2128_v19, %v2088_v38  ;;  %v2135_v25 = vadd.f32 %v2127_v53, %v2087_v6 }
 0x671   : > { %v2184_v59 = vadd.f32 %v2176_v23, %v2136_v24  ;;  %v2183_v21 = vadd.f32 %v2175_v27, %v2135_v25 }
 0x6d7   : > { %v2204_v54 = vpop.xlane.xlu0 %2203 }
 0x6d8   : > { %v2219_v34 = vmax.f32 %v2204_v54, 0.0  ;;  %vm2235_vm5 = vcmp.eq.f32.partialorder %v4566_v60, %v2204_v54  ;;  %v4997_v54 = vld [vmem:[#allocation40_spill] sm:$0xff] }
 0x6d9   : > { %v4659_v48 = vsel %vm2235_vm5, -1.0, %v4566_v60 }
 0x6da   : > { %v4663_v12 = vadd.f32 %v2219_v34, %v2179_v51  ;;  %2251 = vmax.xlane.f32.xlu0 %v4659_v48 }
 0x6db   : > { %v2206_v47 = vpop.xlane.xlu1 %2205 }
 0x6dc   : > { %v2220_v60 = vmax.f32 %v2206_v47, 0.0  ;;  %vm2236_vm6 = vcmp.eq.f32.partialorder %v4987_v14, %v2206_v47 }
 0x6dd   : > { %v2244_v46 = vsel %vm2236_vm6, -1.0, %v4987_v14 }
 0x6de   : > { %v2228_v15 = vadd.f32 %v2220_v60, %v2180_v37  ;;  %2253 = vmax.xlane.f32.xlu1 %v2244_v46 }
 0x6df   : > { %v2210_v9 = vpop.xlane.xlu1 %2209  ;;  %v2208_v16 = vpop.xlane.xlu0 %2207 }
 0x6e0   : > { %v2222_v42 = vmax.f32 %v2210_v9, 0.0  ;;  %vm2238_vm7 = vcmp.eq.f32.partialorder %v4992_v58, %v2210_v9  ;;  %v2221_v36 = vmax.f32 %v2208_v16, 0.0  ;;  %vm2237_vm8 = vcmp.eq.f32.partialorder %v4993_v18, %v2208_v16 }
 0x6e1   : > { %v2246_v11 = vsel %vm2238_vm7, -1.0, %v4992_v58  ;;  %v2245_v5 = vsel %vm2237_vm8, -1.0, %v4993_v18 }
 0x6e2   : > { %v2230_v39 = vadd.f32 %v2222_v42, %v2182_v0  ;;  %v2229_v1 = vadd.f32 %v2221_v36, %v2181_v29  ;;  %2257 = vmax.xlane.f32.xlu1 %v2246_v11  ;;  %2255 = vmax.xlane.f32.xlu0 %v2245_v5 }
 0x6e3   : > { %v2214_v35 = vpop.xlane.xlu1 %2213  ;;  %v2212_v55 = vpop.xlane.xlu0 %2211 }
 0x6e4   : > { %v2224_v7 = vmax.f32 %v2214_v35, 0.0  ;;  %vm2240_vm9 = vcmp.eq.f32.partialorder %v4994_v33, %v2214_v35  ;;  %v2223_v8 = vmax.f32 %v2212_v55, 0.0  ;;  %vm2239_vm0 = vcmp.eq.f32.partialorder %v4995_v30, %v2212_v55 }
 0x6e5   : > { %v2248_v61 = vsel %vm2240_vm9, -1.0, %v4994_v33  ;;  %v2247_v32 = vsel %vm2239_vm0, -1.0, %v4995_v30 }
 0x6e6   : > { %v2232_v62 = vadd.f32 %v2224_v7, %v2184_v59  ;;  %v2231_v10 = vadd.f32 %v2223_v8, %v2183_v21  ;;  %2261 = vmax.xlane.f32.xlu1 %v2248_v61  ;;  %2259 = vmax.xlane.f32.xlu0 %v2247_v32 }
 0x6e7   : > { %v4682_v2 = vpop.xlane.xlu1 %2217  ;;  %v4684_v26 = vpop.xlane.xlu0 %2215 }
 0x6e8   : > { %vm2242_vm10 = vcmp.eq.f32.partialorder %v4996_v40, %v4682_v2  ;;  %vm2241_vm11 = vcmp.eq.f32.partialorder %v4997_v54, %v4684_v26 }
 0x6e9   : > { %v2250_v51 = vsel %vm2242_vm10, -1.0, %v4996_v40  ;;  %v2249_v22 = vsel %vm2241_vm11, -1.0, %v4997_v54 }
 0x6ea   : > { %2265 = vmax.xlane.f32.xlu1 %v2250_v51  ;;  %2263 = vmax.xlane.f32.xlu0 %v2249_v22 }
 0x767   : > { %v2252_v34 = vpop.xlane.xlu0 %2251 }
 0x768   : > { %v2267_v3 = vmax.f32 %v2252_v34, 0.0  ;;  %vm2283_vm4 = vcmp.eq.f32.partialorder %v4659_v48, %v2252_v34 }
 0x769   : > { %v2291_v49 = vsel %vm2283_vm4, -1.0, %v4659_v48 }
 0x76a   : > { %v2275_v17 = vadd.f32 %v2267_v3, %v4663_v12  ;;  %2299 = vmax.xlane.f32.xlu0 %v2291_v49 }
 0x76b   : > { %v2254_v4 = vpop.xlane.xlu1 %2253 }
 0x76c   : > { %v2268_v31 = vmax.f32 %v2254_v4, 0.0  ;;  %vm2284_vm12 = vcmp.eq.f32.partialorder %v2244_v46, %v2254_v4 }
 0x76d   : > { %v2292_v52 = vsel %vm2284_vm12, -1.0, %v2244_v46 }
 0x76e   : > { %v2276_v43 = vadd.f32 %v2268_v31, %v2228_v15  ;;  %2301 = vmax.xlane.f32.xlu1 %v2292_v52 }
 0x76f   : > { %v2258_v44 = vpop.xlane.xlu1 %2257  ;;  %v2256_v20 = vpop.xlane.xlu0 %2255 }
 0x770   : > { %v2270_v28 = vmax.f32 %v2258_v44, 0.0  ;;  %vm2286_vm13 = vcmp.eq.f32.partialorder %v2246_v11, %v2258_v44  ;;  %v2269_v45 = vmax.f32 %v2256_v20, 0.0  ;;  %vm2285_vm14 = vcmp.eq.f32.partialorder %v2245_v5, %v2256_v20 }
 0x771   : > { %v2294_v47 = vsel %vm2286_vm13, -1.0, %v2246_v11  ;;  %v2293_v41 = vsel %vm2285_vm14, -1.0, %v2245_v5 }
 0x772   : > { %v2278_v37 = vadd.f32 %v2270_v28, %v2230_v39  ;;  %v2277_v60 = vadd.f32 %v2269_v45, %v2229_v1  ;;  %2305 = vmax.xlane.f32.xlu1 %v2294_v47  ;;  %2303 = vmax.xlane.f32.xlu0 %v2293_v41 }
 0x773   : > { %v2262_v48 = vpop.xlane.xlu1 %2261  ;;  %v2260_v12 = vpop.xlane.xlu0 %2259 }
 0x774   : > { %v2272_v14 = vmax.f32 %v2262_v48, 0.0  ;;  %vm2288_vm15 = vcmp.eq.f32.partialorder %v2248_v61, %v2262_v48  ;;  %v2271_v63 = vmax.f32 %v2260_v12, 0.0  ;;  %vm2287_vm1 = vcmp.eq.f32.partialorder %v2247_v32, %v2260_v12 }
 0x775   : > { %v2296_v57 = vsel %vm2288_vm15, -1.0, %v2248_v61  ;;  %v2295_v19 = vsel %vm2287_vm1, -1.0, %v2247_v32 }
 0x776   : > { %v2280_v50 = vadd.f32 %v2272_v14, %v2232_v62  ;;  %v2279_v53 = vadd.f32 %v2271_v63, %v2231_v10  ;;  %2309 = vmax.xlane.f32.xlu1 %v2296_v57  ;;  %2307 = vmax.xlane.f32.xlu0 %v2295_v19 }
 0x777   : > { %v4695_v46 = vpop.xlane.xlu1 %2265  ;;  %v4697_v38 = vpop.xlane.xlu0 %2263 }
 0x778   : > { %vm2290_vm2 = vcmp.eq.f32.partialorder %v2250_v51, %v4695_v46  ;;  %vm2289_vm3 = vcmp.eq.f32.partialorder %v2249_v22, %v4697_v38 }
 0x779   : > { %v2298_v6 = vsel %vm2290_vm2, -1.0, %v2250_v51  ;;  %v2297_v15 = vsel %vm2289_vm3, -1.0, %v2249_v22 }
 0x77a   : > { %2313 = vmax.xlane.f32.xlu1 %v2298_v6  ;;  %2311 = vmax.xlane.f32.xlu0 %v2297_v15 }
 0x7f7   : > { %v2300_v0 = vpop.xlane.xlu0 %2299 }
 0x7f8   : > { %v2315_v29 = vmax.f32 %v2300_v0, 0.0  ;;  %vm2331_vm5 = vcmp.eq.f32.partialorder %v2291_v49, %v2300_v0 }
 0x7f9   : > { %v2339_v56 = vsel %vm2331_vm5, -1.0, %v2291_v49 }
 0x7fa   : > { %v2323_v23 = vadd.f32 %v2315_v29, %v2275_v17  ;;  %2347 = vmax.xlane.f32.xlu0 %v2339_v56 }
 0x7fb   : > { %v2302_v13 = vpop.xlane.xlu1 %2301 }
 0x7fc   : > { %v2316_v27 = vmax.f32 %v2302_v13, 0.0  ;;  %vm2332_vm6 = vcmp.eq.f32.partialorder %v2292_v52, %v2302_v13 }
 0x7fd   : > { %v2340_v9 = vsel %vm2332_vm6, -1.0, %v2292_v52 }
 0x7fe   : > { %v2324_v16 = vadd.f32 %v2316_v27, %v2276_v43  ;;  %2349 = vmax.xlane.f32.xlu1 %v2340_v9 }
 0x7ff   : > { %v2306_v42 = vpop.xlane.xlu1 %2305  ;;  %v2304_v58 = vpop.xlane.xlu0 %2303 }
 0x800   : > { %v2318_v36 = vmax.f32 %v2306_v42, 0.0  ;;  %vm2334_vm7 = vcmp.eq.f32.partialorder %v2294_v47, %v2306_v42  ;;  %v2317_v18 = vmax.f32 %v2304_v58, 0.0  ;;  %vm2333_vm8 = vcmp.eq.f32.partialorder %v2293_v41, %v2304_v58 }
 0x801   : > { %v2342_v24 = vsel %vm2334_vm7, -1.0, %v2294_v47  ;;  %v2341_v25 = vsel %vm2333_vm8, -1.0, %v2293_v41 }
 0x802   : > { %v2326_v11 = vadd.f32 %v2318_v36, %v2278_v37  ;;  %v2325_v5 = vadd.f32 %v2317_v18, %v2277_v60  ;;  %2353 = vmax.xlane.f32.xlu1 %v2342_v24  ;;  %2351 = vmax.xlane.f32.xlu0 %v2341_v25 }
 0x803   : > { %v2310_v39 = vpop.xlane.xlu1 %2309  ;;  %v2308_v1 = vpop.xlane.xlu0 %2307 }
 0x804   : > { %v2320_v59 = vmax.f32 %v2310_v39, 0.0  ;;  %vm2336_vm9 = vcmp.eq.f32.partialorder %v2296_v57, %v2310_v39  ;;  %v2319_v21 = vmax.f32 %v2308_v1, 0.0  ;;  %vm2335_vm0 = vcmp.eq.f32.partialorder %v2295_v19, %v2308_v1 }
 0x805   : > { %v2344_v35 = vsel %vm2336_vm9, -1.0, %v2296_v57  ;;  %v2343_v55 = vsel %vm2335_vm0, -1.0, %v2295_v19 }
 0x806   : > { %v2328_v7 = vadd.f32 %v2320_v59, %v2280_v50  ;;  %v2327_v33 = vadd.f32 %v2319_v21, %v2279_v53  ;;  %2357 = vmax.xlane.f32.xlu1 %v2344_v35  ;;  %2355 = vmax.xlane.f32.xlu0 %v2343_v55 }
 0x807   : > { %v4701_v8 = vpop.xlane.xlu1 %2313  ;;  %v4703_v30 = vpop.xlane.xlu0 %2311 }
 0x808   : > { %vm2338_vm10 = vcmp.eq.f32.partialorder %v2298_v6, %v4701_v8  ;;  %vm2337_vm11 = vcmp.eq.f32.partialorder %v2297_v15, %v4703_v30 }
 0x809   : > { %v2346_v61 = vsel %vm2338_vm10, -1.0, %v2298_v6  ;;  %v2345_v32 = vsel %vm2337_vm11, -1.0, %v2297_v15 }
 0x80a   : > { %2361 = vmax.xlane.f32.xlu1 %v2346_v61  ;;  %2359 = vmax.xlane.f32.xlu0 %v2345_v32 }
 0x887   : > { %v2348_v62 = vpop.xlane.xlu0 %2347 }
 0x888   : > { %v2363_v10 = vmax.f32 %v2348_v62, 0.0  ;;  %vm2379_vm4 = vcmp.eq.f32.partialorder %v2339_v56, %v2348_v62 }
 0x889   : > { %v2387_v40 = vsel %vm2379_vm4, -1.0, %v2339_v56 }
 0x88a   : > { %v2371_v54 = vadd.f32 %v2363_v10, %v2323_v23  ;;  %2395 = vmax.xlane.f32.xlu0 %v2387_v40 }
 0x88b   : > { %v2350_v51 = vpop.xlane.xlu1 %2349 }
 0x88c   : > { %v2364_v22 = vmax.f32 %v2350_v51, 0.0  ;;  %vm2380_vm12 = vcmp.eq.f32.partialorder %v2340_v9, %v2350_v51 }
 0x88d   : > { %v2388_v34 = vsel %vm2380_vm12, -1.0, %v2340_v9 }
 0x88e   : > { %v2372_v3 = vadd.f32 %v2364_v22, %v2324_v16  ;;  %2397 = vmax.xlane.f32.xlu1 %v2388_v34 }
 0x88f   : > { %v2354_v49 = vpop.xlane.xlu1 %2353  ;;  %v2352_v17 = vpop.xlane.xlu0 %2351 }
 0x890   : > { %v2366_v4 = vmax.f32 %v2354_v49, 0.0  ;;  %vm2382_vm13 = vcmp.eq.f32.partialorder %v2342_v24, %v2354_v49  ;;  %v2365_v31 = vmax.f32 %v2352_v17, 0.0  ;;  %vm2381_vm14 = vcmp.eq.f32.partialorder %v2341_v25, %v2352_v17 }
 0x891   : > { %v2390_v52 = vsel %vm2382_vm13, -1.0, %v2342_v24  ;;  %v2389_v43 = vsel %vm2381_vm14, -1.0, %v2341_v25 }
 0x892   : > { %v2374_v44 = vadd.f32 %v2366_v4, %v2326_v11  ;;  %v2373_v20 = vadd.f32 %v2365_v31, %v2325_v5  ;;  %2401 = vmax.xlane.f32.xlu1 %v2390_v52  ;;  %2399 = vmax.xlane.f32.xlu0 %v2389_v43 }
 0x893   : > { %v2358_v28 = vpop.xlane.xlu1 %2357  ;;  %v2356_v45 = vpop.xlane.xlu0 %2355 }
 0x894   : > { %v2368_v47 = vmax.f32 %v2358_v28, 0.0  ;;  %vm2384_vm15 = vcmp.eq.f32.partialorder %v2344_v35, %v2358_v28  ;;  %v2367_v41 = vmax.f32 %v2356_v45, 0.0  ;;  %vm2383_vm1 = vcmp.eq.f32.partialorder %v2343_v55, %v2356_v45 }
 0x895   : > { %v2392_v37 = vsel %vm2384_vm15, -1.0, %v2344_v35  ;;  %v2391_v60 = vsel %vm2383_vm1, -1.0, %v2343_v55 }
 0x896   : > { %v2376_v48 = vadd.f32 %v2368_v47, %v2328_v7  ;;  %v2375_v12 = vadd.f32 %v2367_v41, %v2327_v33  ;;  %2405 = vmax.xlane.f32.xlu1 %v2392_v37  ;;  %2403 = vmax.xlane.f32.xlu0 %v2391_v60 }
 0x897   : > { %v4707_v14 = vpop.xlane.xlu1 %2361  ;;  %v4709_v63 = vpop.xlane.xlu0 %2359 }
 0x898   : > { %vm2386_vm2 = vcmp.eq.f32.partialorder %v2346_v61, %v4707_v14  ;;  %vm2385_vm3 = vcmp.eq.f32.partialorder %v2345_v32, %v4709_v63 }
 0x899   : > { %v2394_v57 = vsel %vm2386_vm2, -1.0, %v2346_v61  ;;  %v2393_v19 = vsel %vm2385_vm3, -1.0, %v2345_v32 }
 0x89a   : > { %2409 = vmax.xlane.f32.xlu1 %v2394_v57  ;;  %2407 = vmax.xlane.f32.xlu0 %v2393_v19 }
 0x917   : > { %v2396_v50 = vpop.xlane.xlu0 %2395 }
 0x918   : > { %v2411_v53 = vmax.f32 %v2396_v50, 0.0  ;;  %vm2427_vm5 = vcmp.eq.f32.partialorder %v2387_v40, %v2396_v50 }
 0x919   : > { %v2435_v6 = vsel %vm2427_vm5, -1.0, %v2387_v40 }
 0x91a   : > { %v2419_v15 = vadd.f32 %v2411_v53, %v2371_v54  ;;  %2443 = vmax.xlane.f32.xlu0 %v2435_v6 }
 0x91b   : > { %v2398_v0 = vpop.xlane.xlu1 %2397 }
 0x91c   : > { %v2412_v29 = vmax.f32 %v2398_v0, 0.0  ;;  %vm2428_vm6 = vcmp.eq.f32.partialorder %v2388_v34, %v2398_v0 }
 0x91d   : > { %v2436_v56 = vsel %vm2428_vm6, -1.0, %v2388_v34 }
 0x91e   : > { %v2420_v23 = vadd.f32 %v2412_v29, %v2372_v3  ;;  %2445 = vmax.xlane.f32.xlu1 %v2436_v56 }
 0x91f   : > { %v2402_v13 = vpop.xlane.xlu1 %2401  ;;  %v2400_v27 = vpop.xlane.xlu0 %2399 }
 0x920   : > { %v2414_v9 = vmax.f32 %v2402_v13, 0.0  ;;  %vm2430_vm7 = vcmp.eq.f32.partialorder %v2390_v52, %v2402_v13  ;;  %v2413_v16 = vmax.f32 %v2400_v27, 0.0  ;;  %vm2429_vm8 = vcmp.eq.f32.partialorder %v2389_v43, %v2400_v27 }
 0x921   : > { %v2438_v42 = vsel %vm2430_vm7, -1.0, %v2390_v52  ;;  %v2437_v58 = vsel %vm2429_vm8, -1.0, %v2389_v43 }
 0x922   : > { %v2422_v36 = vadd.f32 %v2414_v9, %v2374_v44  ;;  %v2421_v18 = vadd.f32 %v2413_v16, %v2373_v20  ;;  %2449 = vmax.xlane.f32.xlu1 %v2438_v42  ;;  %2447 = vmax.xlane.f32.xlu0 %v2437_v58 }
 0x923   : > { %v2406_v24 = vpop.xlane.xlu1 %2405  ;;  %v2404_v25 = vpop.xlane.xlu0 %2403 }
 0x924   : > { %v2416_v11 = vmax.f32 %v2406_v24, 0.0  ;;  %vm2432_vm9 = vcmp.eq.f32.partialorder %v2392_v37, %v2406_v24  ;;  %v2415_v5 = vmax.f32 %v2404_v25, 0.0  ;;  %vm2431_vm0 = vcmp.eq.f32.partialorder %v2391_v60, %v2404_v25 }
 0x925   : > { %v2440_v39 = vsel %vm2432_vm9, -1.0, %v2392_v37  ;;  %v2439_v1 = vsel %vm2431_vm0, -1.0, %v2391_v60 }
 0x926   : > { %v2424_v59 = vadd.f32 %v2416_v11, %v2376_v48  ;;  %v2423_v21 = vadd.f32 %v2415_v5, %v2375_v12  ;;  %2453 = vmax.xlane.f32.xlu1 %v2440_v39  ;;  %2451 = vmax.xlane.f32.xlu0 %v2439_v1 }
 0x927   : > { %v4713_v35 = vpop.xlane.xlu1 %2409  ;;  %v4715_v55 = vpop.xlane.xlu0 %2407 }
 0x928   : > { %vm2434_vm10 = vcmp.eq.f32.partialorder %v2394_v57, %v4713_v35  ;;  %vm2433_vm11 = vcmp.eq.f32.partialorder %v2393_v19, %v4715_v55 }
 0x929   : > { %v2442_v7 = vsel %vm2434_vm10, -1.0, %v2394_v57  ;;  %v2441_v33 = vsel %vm2433_vm11, -1.0, %v2393_v19 }
 0x92a   : > { %2457 = vmax.xlane.f32.xlu1 %v2442_v7  ;;  %2455 = vmax.xlane.f32.xlu0 %v2441_v33 }
 0x9a7   : > { %v2444_v61 = vpop.xlane.xlu0 %2443 }
 0x9a8   : > { %v2459_v32 = vmax.f32 %v2444_v61, 0.0  ;;  %vm2475_vm4 = vcmp.eq.f32.partialorder %v2435_v6, %v2444_v61 }
 0x9a9   : > { %v2483_v62 = vsel %vm2475_vm4, -1.0, %v2435_v6 }
 0x9aa   : > { %v2467_v10 = vadd.f32 %v2459_v32, %v2419_v15  ;;  %2491 = vmax.xlane.f32.xlu0 %v2483_v62 }
 0x9ab   : > { %v2446_v40 = vpop.xlane.xlu1 %2445 }
 0x9ac   : > { %v2460_v54 = vmax.f32 %v2446_v40, 0.0  ;;  %vm2476_vm12 = vcmp.eq.f32.partialorder %v2436_v56, %v2446_v40 }
 0x9ad   : > { %v2484_v51 = vsel %vm2476_vm12, -1.0, %v2436_v56 }
 0x9ae   : > { %v2468_v22 = vadd.f32 %v2460_v54, %v2420_v23  ;;  %2493 = vmax.xlane.f32.xlu1 %v2484_v51 }
 0x9af   : > { %v2450_v34 = vpop.xlane.xlu1 %2449  ;;  %v2448_v3 = vpop.xlane.xlu0 %2447 }
 0x9b0   : > { %v2462_v49 = vmax.f32 %v2450_v34, 0.0  ;;  %vm2478_vm13 = vcmp.eq.f32.partialorder %v2438_v42, %v2450_v34  ;;  %v2461_v17 = vmax.f32 %v2448_v3, 0.0  ;;  %vm2477_vm14 = vcmp.eq.f32.partialorder %v2437_v58, %v2448_v3 }
 0x9b1   : > { %v2486_v4 = vsel %vm2478_vm13, -1.0, %v2438_v42  ;;  %v2485_v31 = vsel %vm2477_vm14, -1.0, %v2437_v58 }
 0x9b2   : > { %v2470_v52 = vadd.f32 %v2462_v49, %v2422_v36  ;;  %v2469_v43 = vadd.f32 %v2461_v17, %v2421_v18  ;;  %2497 = vmax.xlane.f32.xlu1 %v2486_v4  ;;  %2495 = vmax.xlane.f32.xlu0 %v2485_v31 }
 0x9b3   : > { %v2454_v44 = vpop.xlane.xlu1 %2453  ;;  %v2452_v20 = vpop.xlane.xlu0 %2451 }
 0x9b4   : > { %v2464_v28 = vmax.f32 %v2454_v44, 0.0  ;;  %vm2480_vm15 = vcmp.eq.f32.partialorder %v2440_v39, %v2454_v44  ;;  %v2463_v45 = vmax.f32 %v2452_v20, 0.0  ;;  %vm2479_vm1 = vcmp.eq.f32.partialorder %v2439_v1, %v2452_v20 }
 0x9b5   : > { %v2488_v47 = vsel %vm2480_vm15, -1.0, %v2440_v39  ;;  %v2487_v41 = vsel %vm2479_vm1, -1.0, %v2439_v1 }
 0x9b6   : > { %v2472_v37 = vadd.f32 %v2464_v28, %v2424_v59  ;;  %v2471_v60 = vadd.f32 %v2463_v45, %v2423_v21  ;;  %2501 = vmax.xlane.f32.xlu1 %v2488_v47  ;;  %2499 = vmax.xlane.f32.xlu0 %v2487_v41 }
 0x9b7   : > { %v4719_v48 = vpop.xlane.xlu1 %2457  ;;  %v4721_v12 = vpop.xlane.xlu0 %2455 }
 0x9b8   : > { %vm2482_vm2 = vcmp.eq.f32.partialorder %v2442_v7, %v4719_v48  ;;  %vm2481_vm3 = vcmp.eq.f32.partialorder %v2441_v33, %v4721_v12 }
 0x9b9   : > { %v2490_v57 = vsel %vm2482_vm2, -1.0, %v2442_v7  ;;  %v2489_v19 = vsel %vm2481_vm3, -1.0, %v2441_v33 }
 0x9ba   : > { %2505 = vmax.xlane.f32.xlu1 %v2490_v57  ;;  %2503 = vmax.xlane.f32.xlu0 %v2489_v19 }
 0xa37   : > { %v2492_v50 = vpop.xlane.xlu0 %2491 }
 0xa38   : > { %v2507_v53 = vmax.f32 %v2492_v50, 0.0  ;;  %vm2523_vm5 = vcmp.eq.f32.partialorder %v2483_v62, %v2492_v50 }
 0xa39   : > { %v2531_v6 = vsel %vm2523_vm5, -1.0, %v2483_v62 }
 0xa3a   : > { %v2515_v15 = vadd.f32 %v2507_v53, %v2467_v10  ;;  %2539 = vmax.xlane.f32.xlu0 %v2531_v6 }
 0xa3b   : > { %v2494_v0 = vpop.xlane.xlu1 %2493 }
 0xa3c   : > { %v2508_v29 = vmax.f32 %v2494_v0, 0.0  ;;  %vm2524_vm6 = vcmp.eq.f32.partialorder %v2484_v51, %v2494_v0 }
 0xa3d   : > { %v2532_v56 = vsel %vm2524_vm6, -1.0, %v2484_v51 }
 0xa3e   : > { %v2516_v23 = vadd.f32 %v2508_v29, %v2468_v22  ;;  %2541 = vmax.xlane.f32.xlu1 %v2532_v56 }
 0xa3f   : > { %v2498_v13 = vpop.xlane.xlu1 %2497  ;;  %v2496_v27 = vpop.xlane.xlu0 %2495 }
 0xa40   : > { %v2510_v9 = vmax.f32 %v2498_v13, 0.0  ;;  %vm2526_vm7 = vcmp.eq.f32.partialorder %v2486_v4, %v2498_v13  ;;  %v2509_v16 = vmax.f32 %v2496_v27, 0.0  ;;  %vm2525_vm8 = vcmp.eq.f32.partialorder %v2485_v31, %v2496_v27 }
 0xa41   : > { %v2534_v42 = vsel %vm2526_vm7, -1.0, %v2486_v4  ;;  %v2533_v58 = vsel %vm2525_vm8, -1.0, %v2485_v31 }
 0xa42   : > { %v2518_v36 = vadd.f32 %v2510_v9, %v2470_v52  ;;  %v2517_v18 = vadd.f32 %v2509_v16, %v2469_v43  ;;  %2545 = vmax.xlane.f32.xlu1 %v2534_v42  ;;  %2543 = vmax.xlane.f32.xlu0 %v2533_v58 }
 0xa43   : > { %v2502_v24 = vpop.xlane.xlu1 %2501  ;;  %v2500_v25 = vpop.xlane.xlu0 %2499 }
 0xa44   : > { %v2512_v11 = vmax.f32 %v2502_v24, 0.0  ;;  %vm2528_vm9 = vcmp.eq.f32.partialorder %v2488_v47, %v2502_v24  ;;  %v2511_v5 = vmax.f32 %v2500_v25, 0.0  ;;  %vm2527_vm0 = vcmp.eq.f32.partialorder %v2487_v41, %v2500_v25 }
 0xa45   : > { %v2536_v39 = vsel %vm2528_vm9, -1.0, %v2488_v47  ;;  %v2535_v1 = vsel %vm2527_vm0, -1.0, %v2487_v41 }
 0xa46   : > { %v2520_v59 = vadd.f32 %v2512_v11, %v2472_v37  ;;  %v2519_v21 = vadd.f32 %v2511_v5, %v2471_v60  ;;  %2549 = vmax.xlane.f32.xlu1 %v2536_v39  ;;  %2547 = vmax.xlane.f32.xlu0 %v2535_v1 }
 0xa47   : > { %v4725_v7 = vpop.xlane.xlu1 %2505  ;;  %v4727_v33 = vpop.xlane.xlu0 %2503 }
 0xa48   : > { %vm2530_vm10 = vcmp.eq.f32.partialorder %v2490_v57, %v4725_v7  ;;  %vm2529_vm11 = vcmp.eq.f32.partialorder %v2489_v19, %v4727_v33 }
 0xa49   : > { %v2538_v61 = vsel %vm2530_vm10, -1.0, %v2490_v57  ;;  %v2537_v32 = vsel %vm2529_vm11, -1.0, %v2489_v19 }
 0xa4a   : > { %2553 = vmax.xlane.f32.xlu1 %v2538_v61  ;;  %2551 = vmax.xlane.f32.xlu0 %v2537_v32 }
 0xac7   : > { %v2540_v62 = vpop.xlane.xlu0 %2539 }
 0xac8   : > { %v2555_v10 = vmax.f32 %v2540_v62, 0.0  ;;  %vm2571_vm4 = vcmp.eq.f32.partialorder %v2531_v6, %v2540_v62 }
 0xac9   : > { %v2579_v40 = vsel %vm2571_vm4, -1.0, %v2531_v6 }
 0xaca   : > { %v2563_v54 = vadd.f32 %v2555_v10, %v2515_v15  ;;  %2587 = vmax.xlane.f32.xlu0 %v2579_v40 }
 0xacb   : > { %v2542_v51 = vpop.xlane.xlu1 %2541 }
 0xacc   : > { %v2556_v22 = vmax.f32 %v2542_v51, 0.0  ;;  %vm2572_vm12 = vcmp.eq.f32.partialorder %v2532_v56, %v2542_v51 }
 0xacd   : > { %v2580_v34 = vsel %vm2572_vm12, -1.0, %v2532_v56 }
 0xace   : > { %v2564_v3 = vadd.f32 %v2556_v22, %v2516_v23  ;;  %2589 = vmax.xlane.f32.xlu1 %v2580_v34 }
 0xacf   : > { %v2546_v49 = vpop.xlane.xlu1 %2545  ;;  %v2544_v17 = vpop.xlane.xlu0 %2543 }
 0xad0   : > { %v2558_v4 = vmax.f32 %v2546_v49, 0.0  ;;  %vm2574_vm13 = vcmp.eq.f32.partialorder %v2534_v42, %v2546_v49  ;;  %v2557_v31 = vmax.f32 %v2544_v17, 0.0  ;;  %vm2573_vm14 = vcmp.eq.f32.partialorder %v2533_v58, %v2544_v17 }
 0xad1   : > { %v2582_v52 = vsel %vm2574_vm13, -1.0, %v2534_v42  ;;  %v2581_v43 = vsel %vm2573_vm14, -1.0, %v2533_v58 }
 0xad2   : > { %v2566_v44 = vadd.f32 %v2558_v4, %v2518_v36  ;;  %v2565_v20 = vadd.f32 %v2557_v31, %v2517_v18  ;;  %2593 = vmax.xlane.f32.xlu1 %v2582_v52  ;;  %2591 = vmax.xlane.f32.xlu0 %v2581_v43 }
 0xad3   : > { %v2550_v28 = vpop.xlane.xlu1 %2549  ;;  %v2548_v45 = vpop.xlane.xlu0 %2547 }
 0xad4   : > { %v2560_v47 = vmax.f32 %v2550_v28, 0.0  ;;  %vm2576_vm15 = vcmp.eq.f32.partialorder %v2536_v39, %v2550_v28  ;;  %v2559_v41 = vmax.f32 %v2548_v45, 0.0  ;;  %vm2575_vm1 = vcmp.eq.f32.partialorder %v2535_v1, %v2548_v45 }
 0xad5   : > { %v2584_v37 = vsel %vm2576_vm15, -1.0, %v2536_v39  ;;  %v2583_v60 = vsel %vm2575_vm1, -1.0, %v2535_v1 }
 0xad6   : > { %v2568_v57 = vadd.f32 %v2560_v47, %v2520_v59  ;;  %v2567_v19 = vadd.f32 %v2559_v41, %v2519_v21  ;;  %2597 = vmax.xlane.f32.xlu1 %v2584_v37  ;;  %2595 = vmax.xlane.f32.xlu0 %v2583_v60 }
 0xad7   : > { %v4731_v50 = vpop.xlane.xlu1 %2553  ;;  %v4733_v53 = vpop.xlane.xlu0 %2551 }
 0xad8   : > { %vm2578_vm2 = vcmp.eq.f32.partialorder %v2538_v61, %v4731_v50  ;;  %vm2577_vm3 = vcmp.eq.f32.partialorder %v2537_v32, %v4733_v53 }
 0xad9   : > { %v2586_v6 = vsel %vm2578_vm2, -1.0, %v2538_v61  ;;  %v2585_v15 = vsel %vm2577_vm3, -1.0, %v2537_v32 }
 0xada   : > { %2601 = vmax.xlane.f32.xlu1 %v2586_v6  ;;  %2599 = vmax.xlane.f32.xlu0 %v2585_v15 }
 0xb57   : > { %v2588_v0 = vpop.xlane.xlu0 %2587 }
 0xb58   : > { %v2603_v29 = vmax.f32 %v2588_v0, 0.0  ;;  %vm2619_vm5 = vcmp.eq.f32.partialorder %v2579_v40, %v2588_v0 }
 0xb59   : > { %v2627_v56 = vsel %vm2619_vm5, -1.0, %v2579_v40 }
 0xb5a   : > { %v2611_v23 = vadd.f32 %v2603_v29, %v2563_v54  ;;  %2635 = vmax.xlane.f32.xlu0 %v2627_v56 }
 0xb5b   : > { %v2590_v13 = vpop.xlane.xlu1 %2589 }
 0xb5c   : > { %v2604_v27 = vmax.f32 %v2590_v13, 0.0  ;;  %vm2620_vm6 = vcmp.eq.f32.partialorder %v2580_v34, %v2590_v13 }
 0xb5d   : > { %v2628_v9 = vsel %vm2620_vm6, -1.0, %v2580_v34 }
 0xb5e   : > { %v2612_v16 = vadd.f32 %v2604_v27, %v2564_v3  ;;  %2637 = vmax.xlane.f32.xlu1 %v2628_v9 }
 0xb5f   : > { %v2594_v42 = vpop.xlane.xlu1 %2593  ;;  %v2592_v58 = vpop.xlane.xlu0 %2591 }
 0xb60   : > { %v2606_v36 = vmax.f32 %v2594_v42, 0.0  ;;  %vm2622_vm7 = vcmp.eq.f32.partialorder %v2582_v52, %v2594_v42  ;;  %v2605_v18 = vmax.f32 %v2592_v58, 0.0  ;;  %vm2621_vm8 = vcmp.eq.f32.partialorder %v2581_v43, %v2592_v58 }
 0xb61   : > { %v2630_v24 = vsel %vm2622_vm7, -1.0, %v2582_v52  ;;  %v2629_v25 = vsel %vm2621_vm8, -1.0, %v2581_v43 }
 0xb62   : > { %v2614_v11 = vadd.f32 %v2606_v36, %v2566_v44  ;;  %v2613_v5 = vadd.f32 %v2605_v18, %v2565_v20  ;;  %2641 = vmax.xlane.f32.xlu1 %v2630_v24  ;;  %2639 = vmax.xlane.f32.xlu0 %v2629_v25 }
 0xb63   : > { %v2598_v39 = vpop.xlane.xlu1 %2597  ;;  %v2596_v1 = vpop.xlane.xlu0 %2595 }
 0xb64   : > { %v2608_v59 = vmax.f32 %v2598_v39, 0.0  ;;  %vm2624_vm9 = vcmp.eq.f32.partialorder %v2584_v37, %v2598_v39  ;;  %v2607_v21 = vmax.f32 %v2596_v1, 0.0  ;;  %vm2623_vm0 = vcmp.eq.f32.partialorder %v2583_v60, %v2596_v1 }
 0xb65   : > { %v2632_v61 = vsel %vm2624_vm9, -1.0, %v2584_v37  ;;  %v2631_v32 = vsel %vm2623_vm0, -1.0, %v2583_v60 }
 0xb66   : > { %v2616_v62 = vadd.f32 %v2608_v59, %v2568_v57  ;;  %v2615_v10 = vadd.f32 %v2607_v21, %v2567_v19  ;;  %2645 = vmax.xlane.f32.xlu1 %v2632_v61  ;;  %2643 = vmax.xlane.f32.xlu0 %v2631_v32 }
 0xb67   : > { %v4737_v40 = vpop.xlane.xlu1 %2601  ;;  %v4739_v54 = vpop.xlane.xlu0 %2599 }
 0xb68   : > { %vm2626_vm10 = vcmp.eq.f32.partialorder %v2586_v6, %v4737_v40  ;;  %vm2625_vm11 = vcmp.eq.f32.partialorder %v2585_v15, %v4739_v54 }
 0xb69   : > { %v2634_v51 = vsel %vm2626_vm10, -1.0, %v2586_v6  ;;  %v2633_v22 = vsel %vm2625_vm11, -1.0, %v2585_v15 }
 0xb6a   : > { %2649 = vmax.xlane.f32.xlu1 %v2634_v51  ;;  %2647 = vmax.xlane.f32.xlu0 %v2633_v22 }
 0xbe7   : > { %v2636_v34 = vpop.xlane.xlu0 %2635 }
 0xbe8   : > { %v2651_v3 = vmax.f32 %v2636_v34, 0.0  ;;  %vm2667_vm4 = vcmp.eq.f32.partialorder %v2627_v56, %v2636_v34 }
 0xbe9   : > { %v2675_v49 = vsel %vm2667_vm4, -1.0, %v2627_v56 }
 0xbea   : > { %v4743_v17 = vadd.f32 %v2651_v3, %v2611_v23  ;;  %2683 = vmax.xlane.f32.xlu0 %v2675_v49 }
 0xbeb   : > { %v2638_v4 = vpop.xlane.xlu1 %2637 }
 0xbec   : > { %v2652_v31 = vmax.f32 %v2638_v4, 0.0  ;;  %vm2668_vm12 = vcmp.eq.f32.partialorder %v2628_v9, %v2638_v4 }
 0xbed   : > { %v2676_v52 = vsel %vm2668_vm12, -1.0, %v2628_v9 }
 0xbee   : > { %v4745_v43 = vadd.f32 %v2652_v31, %v2612_v16  ;;  %2685 = vmax.xlane.f32.xlu1 %v2676_v52 }
 0xbef   : > { %v2642_v44 = vpop.xlane.xlu1 %2641  ;;  %v2640_v20 = vpop.xlane.xlu0 %2639 }
 0xbf0   : > { %v2654_v28 = vmax.f32 %v2642_v44, 0.0  ;;  %vm2670_vm13 = vcmp.eq.f32.partialorder %v2630_v24, %v2642_v44  ;;  %v2653_v45 = vmax.f32 %v2640_v20, 0.0  ;;  %vm2669_vm14 = vcmp.eq.f32.partialorder %v2629_v25, %v2640_v20 }
 0xbf1   : > { %v2678_v47 = vsel %vm2670_vm13, -1.0, %v2630_v24  ;;  %v2677_v41 = vsel %vm2669_vm14, -1.0, %v2629_v25 }
 0xbf2   : > { %v4747_v37 = vadd.f32 %v2654_v28, %v2614_v11  ;;  %v4749_v60 = vadd.f32 %v2653_v45, %v2613_v5  ;;  %2689 = vmax.xlane.f32.xlu1 %v2678_v47  ;;  %2687 = vmax.xlane.f32.xlu0 %v2677_v41 }
 0xbf3   : > { %v2646_v57 = vpop.xlane.xlu1 %2645  ;;  %v2644_v19 = vpop.xlane.xlu0 %2643 }
 0xbf4   : > { %v2656_v6 = vmax.f32 %v2646_v57, 0.0  ;;  %vm2672_vm15 = vcmp.eq.f32.partialorder %v2632_v61, %v2646_v57  ;;  %v2655_v15 = vmax.f32 %v2644_v19, 0.0  ;;  %vm2671_vm1 = vcmp.eq.f32.partialorder %v2631_v32, %v2644_v19 }
 0xbf5   : > { %v2680_v0 = vsel %vm2672_vm15, -1.0, %v2632_v61  ;;  %v2679_v29 = vsel %vm2671_vm1, -1.0, %v2631_v32 }
 0xbf6   : > { %v4751_v56 = vadd.f32 %v2656_v6, %v2616_v62  ;;  %v4753_v23 = vadd.f32 %v2655_v15, %v2615_v10  ;;  %2693 = vmax.xlane.f32.xlu1 %v2680_v0  ;;  %2691 = vmax.xlane.f32.xlu0 %v2679_v29 }
 0xbf7   : > { %v4755_v13 = vpop.xlane.xlu1 %2649  ;;  %v4757_v27 = vpop.xlane.xlu0 %2647 }
 0xbf8   : > { %vm2674_vm2 = vcmp.eq.f32.partialorder %v2634_v51, %v4755_v13  ;;  %vm2673_vm3 = vcmp.eq.f32.partialorder %v2633_v22, %v4757_v27 }
 0xbf9   : > { %v2682_v9 = vsel %vm2674_vm2, -1.0, %v2634_v51  ;;  %v2681_v16 = vsel %vm2673_vm3, -1.0, %v2633_v22 }
 0xbfa   : > { %2697 = vmax.xlane.f32.xlu1 %v2682_v9  ;;  %2695 = vmax.xlane.f32.xlu0 %v2681_v16 }
 0xbfb   : > { %3357 = shalt.err (!%p3354_p3)
}
 0xbfc   : > { %s3358_s22 = scalar_lea.hbm %s4768_s17, 1024  ;;  %s3362_s25 = scalar_lea.hbm %s4882_s4, 2048 }
 0xbfd   : > { %p3359_p8 = scmp.ne.s32.totalorder %s4768_s17, %s3358_s22  ;;  %p3363_p4 = scmp.lt.u32.totalorder %s4768_s17, %s4882_s4 }
 0xbfe   : > { %p3364_p6 = scmp.lt.u32.totalorder %s3362_s25, %s3358_s22  ;;  %p3366_p1 = scmp.lt.u32.totalorder %s3358_s22, %s4768_s17 }
 0xbff   : > { %p3360_p0 = pnand %p3359_p8, %p4998_p12 }
 0xc00   : > { %p3365_p13 = por %p3364_p6, %p3363_p4 }
 0xc01   : > { %p3361_p2 = pneg %p3360_p0 }
 0xc02   : > { %p3367_p10 = por %p3366_p1, %p3365_p13 }
 0xc04   : > { %p3368_p5 = pnand %p3367_p10, %p3361_p2 }
 0xc06   : > { %3371 = shalt.err (!%p3368_p5)
}
 0xc07   : > { %s3429_s28 = smov 128   ;;  %s3430_s7 = smov 8   ;;  %v4999_v42 = vld [vmem:[#allocation13_spill] sm:$0xff]  ;;  %v5000_v36 = vld [vmem:[#allocation14_spill] sm:$0xff]  ;;  %v5001_v24 = vld [vmem:[#allocation11_spill] sm:$0xff]  ;;  %vm2739_vm5 = vcmask 7168  }
 0xc08   : > { %3085 = dma.vmem_to_hbm [thread:$0]  (%p4998_p12), %s4762_s8, 1024, %s4768_s17, %s2749_s23, %s3429_s28, %s3429_s28, %s3430_s7   ;;  %v1842_v58 = vmax.f32 %v4999_v42, 0.0  ;;  %v1841_v18 = vmax.f32 %v5000_v36, 0.0  ;;  %v1794_v25 = vmax.f32 %v5001_v24, 0.0  ;;  %v5002_v11 = vld [vmem:[#allocation15_spill] sm:$0xff]  ;;  %v5003_v39 = vld [vmem:[#allocation12_spill] sm:$0xff] }
 0xc09   : > { %v1890_v5 = vmax.f32 %v5002_v11, 0.0  ;;  %v1793_v1 = vmax.f32 %v5003_v39, 0.0  ;;  %v5004_v59 = vld [vmem:[#allocation16_spill] sm:$0xff]  ;;  %v5005_v32 = vld [vmem:[#allocation17_spill] sm:$0xff]  ;;  %v5006_v51 = vld [vmem:[#allocation18_spill] sm:$0xff]  ;;  %s4834_s8 = scalar_lea.vmem %s4883_s5, %s3642_s29 }
 0xc0a   : > { %v1889_v21 = vmax.f32 %v5004_v59, 0.0  ;;  %v1850_v61 = vadd.f32 %v1842_v58, %v1794_v25  ;;  %v1938_v62 = vmax.f32 %v5005_v32, 0.0  ;;  %v1937_v22 = vmax.f32 %v5006_v51, 0.0  ;;  %v5007_v3 = vld [vmem:[#allocation19_spill] sm:$0xff]  ;;  %v5008_v31 = vld [vmem:[#allocation20_spill] sm:$0xff]  ;;  %v5009_v20 = vld [vmem:[#allocation21_spill] sm:$0xff] }
 0xc0b   : > { %v1849_v10 = vadd.f32 %v1841_v18, %v1793_v1  ;;  %v1986_v49 = vmax.f32 %v5007_v3, 0.0  ;;  %v1985_v52 = vmax.f32 %v5008_v31, 0.0  ;;  %v2034_v28 = vmax.f32 %v5009_v20, 0.0  ;;  %v5010_v47 = vld [vmem:[#allocation22_spill] sm:$0xff]  ;;  %v5011_v19 = vld [vmem:[#allocation23_spill] sm:$0xff]  ;;  %v5012_v0 = vld [vmem:[#allocation24_spill] sm:$0xff] }
 0xc0c   : > { %v1898_v34 = vadd.f32 %v1890_v5, %v1850_v61  ;;  %v2033_v41 = vmax.f32 %v5010_v47, 0.0  ;;  %v2082_v6 = vmax.f32 %v5011_v19, 0.0  ;;  %v2081_v29 = vmax.f32 %v5012_v0, 0.0  ;;  %v5013_v16 = vld [vmem:[#allocation27_spill] sm:$0xff]  ;;  %v5014_v36 = vld [vmem:[#allocation28_spill] sm:$0xff]  ;;  %v5015_v25 = vld [vmem:[#allocation37_spill] sm:$0xff] }
 0xc0d   : > { %v1897_v4 = vadd.f32 %v1889_v21, %v1849_v10  ;;  %v2130_v42 = vmax.f32 %v5013_v16, 0.0  ;;  %v2129_v18 = vmax.f32 %v5014_v36, 0.0  ;;  %v2178_v11 = vmax.f32 %v5015_v25, 0.0  ;;  %v5016_v39 = vld [vmem:[#allocation38_spill] sm:$0xff] }
 0xc0e   : > { %v1946_v44 = vadd.f32 %v1938_v62, %v1898_v34  ;;  %v2177_v1 = vmax.f32 %v5016_v39, 0.0  ;;  %v2226_v21 = vmax.f32 %v4682_v2, 0.0  ;;  %v2225_v32 = vmax.f32 %v4684_v26, 0.0 }
 0xc0f   : > { %v1945_v45 = vadd.f32 %v1937_v22, %v1897_v4  ;;  %v2274_v10 = vmax.f32 %v4695_v46, 0.0  ;;  %v2273_v22 = vmax.f32 %v4697_v38, 0.0  ;;  %v2322_v3 = vmax.f32 %v4701_v8, 0.0 }
 0xc10   : > { %v1994_v57 = vadd.f32 %v1986_v49, %v1946_v44  ;;  %v2321_v4 = vmax.f32 %v4703_v30, 0.0  ;;  %v2369_v2 = vmax.f32 %v4709_v63, 0.0  ;;  %v2418_v26 = vmax.f32 %v4713_v35, 0.0 }
 0xc11   : > { %v1993_v15 = vadd.f32 %v1985_v52, %v1945_v45  ;;  %v2370_v52 = vmax.f32 %v4707_v14, 0.0  ;;  %v2417_v45 = vmax.f32 %v4715_v55, 0.0  ;;  %v2466_v8 = vmax.f32 %v4719_v48, 0.0 }
 0xc12   : > { %v2042_v9 = vadd.f32 %v2034_v28, %v1994_v57  ;;  %v2465_v30 = vmax.f32 %v4721_v12, 0.0  ;;  %v2514_v63 = vmax.f32 %v4725_v7, 0.0  ;;  %v2513_v55 = vmax.f32 %v4727_v33, 0.0 }
 0xc13   : > { %v2041_v58 = vadd.f32 %v2033_v41, %v1993_v15  ;;  %v2562_v12 = vmax.f32 %v4731_v50, 0.0  ;;  %v2609_v50 = vmax.f32 %v4739_v54, 0.0 }
 0xc14   : > { %v2090_v24 = vadd.f32 %v2082_v6, %v2042_v9 }
 0xc15   : > { %v2089_v5 = vadd.f32 %v2081_v29, %v2041_v58 }
 0xc16   : > { %v2138_v59 = vadd.f32 %v2130_v42, %v2090_v24  ;;  %v2561_v42 = vmax.f32 %v4733_v53, 0.0 }
 0xc17   : > { %v2137_v61 = vadd.f32 %v2129_v18, %v2089_v5 }
 0xc18   : > { %v2186_v62 = vadd.f32 %v2178_v11, %v2138_v59  ;;  %v2657_v59 = vmax.f32 %v4757_v27, 0.0 }
 0xc19   : > { %v2185_v51 = vadd.f32 %v2177_v1, %v2137_v61  ;;  %v2658_v1 = vmax.f32 %v4755_v13, 0.0 }
 0xc1a   : > { %v2234_v34 = vadd.f32 %v2226_v21, %v2186_v62 }
 0xc1b   : > { %v2233_v49 = vadd.f32 %v2225_v32, %v2185_v51 }
 0xc1c   : > { %v2282_v31 = vadd.f32 %v2274_v10, %v2234_v34 }
 0xc1d   : > { %v2281_v44 = vadd.f32 %v2273_v22, %v2233_v49 }
 0xc1e   : > { %v2330_v20 = vadd.f32 %v2322_v3, %v2282_v31 }
 0xc1f   : > { %v2329_v46 = vadd.f32 %v2321_v4, %v2281_v44 }
 0xc20   : > { %v2378_v47 = vadd.f32 %v2370_v52, %v2330_v20 }
 0xc21   : > { %v2377_v41 = vadd.f32 %v2369_v2, %v2329_v46 }
 0xc22   : > { %v2426_v57 = vadd.f32 %v2418_v26, %v2378_v47 }
 0xc23   : > { %v2425_v6 = vadd.f32 %v2417_v45, %v2377_v41 }
 0xc24   : > { %v2474_v0 = vadd.f32 %v2466_v8, %v2426_v57 }
 0xc25   : > { %v2473_v29 = vadd.f32 %v2465_v30, %v2425_v6 }
 0xc26   : > { %v2522_v16 = vadd.f32 %v2514_v63, %v2474_v0 }
 0xc27   : > { %v2521_v18 = vadd.f32 %v2513_v55, %v2473_v29 }
 0xc28   : > { %v2570_v5 = vadd.f32 %v2562_v12, %v2522_v16 }
 0xc29   : > { %v2569_v39 = vadd.f32 %v2561_v42, %v2521_v18 }
 0xc2b   : > { %v2617_v10 = vadd.f32 %v2609_v50, %v2569_v39 }
 0xc2d   : > { %v2665_v49 = vadd.f32 %v2657_v59, %v2617_v10 }
 0xc77   : > { %v2684_v28 = vpop.xlane.xlu0 %2683 }
 0xc78   : > { %v2699_v38 = vmax.f32 %v2684_v28, 0.0 }
 0xc7a   : > { %v2707_v14 = vadd.f32 %v2699_v38, %v4743_v17 }
 0xc7b   : > { %v2686_v19 = vpop.xlane.xlu1 %2685 }
 0xc7c   : > { %v3065_v35 = vtrunc.f32 %v2707_v14  ;;  %v2700_v15 = vmax.f32 %v2686_v19, 0.0 }
 0xc7e   : > { %v3066_v9 = vcvt.f32.s32 %v3065_v35  ;;  %v2708_v48 = vadd.f32 %v2700_v15, %v4745_v43  ;;  %v2610_v43 = vmax.f32 %v4737_v40, 0.0 }
 0xc7f   : > { %v2690_v7 = vpop.xlane.xlu1 %2689  ;;  %v2688_v17 = vpop.xlane.xlu0 %2687 }
 0xc80   : > { %vm2723_vm6 = vcmp.gt.s32.totalorder %v3066_v9, 1  ;;  %v3067_v33 = vtrunc.f32 %v2708_v48  ;;  %v2702_v58 = vmax.f32 %v2690_v7, 0.0  ;;  %v2701_v36 = vmax.f32 %v2688_v17, 0.0 }
 0xc81   : > { %v2724_v24 = vsel %vm2723_vm6, %v3066_v9, 1  ;;  %v2618_v62 = vadd.f32 %v2610_v43, %v2570_v5 }
 0xc82   : > { %2740 = vst.msk [vmem:[%s4834_s8] sm:$0xff] %vm2739_vm5, %v2724_v24  ;;  %v3068_v53 = vcvt.f32.s32 %v3067_v33  ;;  %v2710_v25 = vadd.f32 %v2702_v58, %v4747_v37  ;;  %v2709_v11 = vadd.f32 %v2701_v36, %v4749_v60 }
 0xc83   : > { %v2694_v21 = vpop.xlane.xlu1 %2693  ;;  %v2692_v61 = vpop.xlane.xlu0 %2691  ;;  %v2666_v34 = vadd.f32 %v2658_v1, %v2618_v62 }
 0xc84   : > { %vm2725_vm7 = vcmp.gt.s32.totalorder %v3068_v53, 1  ;;  %v3071_v40 = vtrunc.f32 %v2710_v25  ;;  %v3069_v54 = vtrunc.f32 %v2709_v11  ;;  %v2704_v32 = vmax.f32 %v2694_v21, 0.0 }
 0xc85   : > { %v2726_v51 = vsel %vm2725_vm7, %v3068_v53, 1  ;;  %v2703_v22 = vmax.f32 %v2692_v61, 0.0 }
 0xc86   : > { %2741 = vst.msk [vmem:[%s4834_s8 + $0x8] sm:$0xff] %vm2739_vm5, %v2726_v51  ;;  %v3072_v37 = vcvt.f32.s32 %v3071_v40  ;;  %v3070_v60 = vcvt.f32.s32 %v3069_v54  ;;  %v2712_v13 = vadd.f32 %v2704_v32, %v4751_v56 }
 0xc87   : > { %v2711_v27 = vadd.f32 %v2703_v22, %v4753_v23  ;;  %v2698_v3 = vpop.xlane.xlu1 %2697  ;;  %v2696_v4 = vpop.xlane.xlu0 %2695 }
 0xc88   : > { %vm2729_vm8 = vcmp.gt.s32.totalorder %v3072_v37, 1  ;;  %vm2727_vm9 = vcmp.gt.s32.totalorder %v3070_v60, 1  ;;  %v3075_v31 = vtrunc.f32 %v2712_v13  ;;  %v2706_v52 = vmax.f32 %v2698_v3, 0.0 }
 0xc89   : > { %v2730_v44 = vsel %vm2729_vm8, %v3072_v37, 1  ;;  %v2728_v2 = vsel %vm2727_vm9, %v3070_v60, 1  ;;  %v3073_v20 = vtrunc.f32 %v2711_v27  ;;  %v2705_v26 = vmax.f32 %v2696_v4, 0.0 }
 0xc8a   : > { %2743 = vst.msk [vmem:[%s4834_s8 + $0x18] sm:$0xff] %vm2739_vm5, %v2730_v44  ;;  %2742 = vst.msk [vmem:[%s4834_s8 + $0x10] sm:$0xff] %vm2739_vm5, %v2728_v2  ;;  %v3076_v56 = vcvt.f32.s32 %v3075_v31  ;;  %v2714_v23 = vadd.f32 %v2706_v52, %v2666_v34 }
 0xc8b   : > { %v3074_v28 = vcvt.f32.s32 %v3073_v20  ;;  %v2713_v46 = vadd.f32 %v2705_v26, %v2665_v49 }
 0xc8c   : > { %vm2733_vm0 = vcmp.gt.s32.totalorder %v3076_v56, 1  ;;  %v3079_v45 = vtrunc.f32 %v2714_v23 }
 0xc8d   : > { %v2734_v38 = vsel %vm2733_vm0, %v3076_v56, 1  ;;  %vm2731_vm10 = vcmp.gt.s32.totalorder %v3074_v28, 1  ;;  %v3077_v47 = vtrunc.f32 %v2713_v46 }
 0xc8e   : > { %2745 = vst.msk [vmem:[%s4834_s8 + $0x28] sm:$0xff] %vm2739_vm5, %v2734_v38  ;;  %v2732_v8 = vsel %vm2731_vm10, %v3074_v28, 1  ;;  %v3080_v41 = vcvt.f32.s32 %v3079_v45 }
 0xc8f   : > { %2744 = vst.msk [vmem:[%s4834_s8 + $0x20] sm:$0xff] %vm2739_vm5, %v2732_v8  ;;  %v3078_v30 = vcvt.f32.s32 %v3077_v47 }
 0xc90   : > { %vm2737_vm11 = vcmp.gt.s32.totalorder %v3080_v41, 1 }
 0xc91   : > { %v2738_v14 = vsel %vm2737_vm11, %v3080_v41, 1  ;;  %vm2735_vm4 = vcmp.gt.s32.totalorder %v3078_v30, 1 }
 0xc92   : > { %2747 = vst.msk [vmem:[%s4834_s8 + $0x38] sm:$0xff] %vm2739_vm5, %v2738_v14  ;;  %v2736_v57 = vsel %vm2735_vm4, %v3078_v30, 1 }
 0xc93   : > { %2746 = vst.msk [vmem:[%s4834_s8 + $0x30] sm:$0xff] %vm2739_vm5, %v2736_v57 }
 0xc94 PF: > { %s2786_s29 = sand.u32 1, %s3402_s18   ;;  %p5017_p12 = scmp.ne.s32.totalorder %s4933_s6, 0 }
 0xc95   : > { %p5018_p7 = scmp.ge.s32.totalorder %s3414_s21, 2  ;;  %s2787_s17 = scalar_lea.sflag [#allocation4], %s2786_s29 }
 0xc97   : > { %p3095_p9 = pnand %p5018_p7, %p5017_p12 }
 0xc99   : > { %3397 = dma.done.wait (!%p3095_p9), %s2787_s17, 1024  }
 0xc9a   : > { %3399 = vsyncadd (!%p3095_p9), %s2787_s17, 4294966272  ;;  %p22_p11 = scmp.ge.s32.totalorder %s3486_s24, 4   ;;  %s5019_s18 = smov %s3406_s19 }
 0xc9b   : > { %s5020_s19 = smov %s3410_s20  ;;  %s5021_s20 = smov %s3498_s27 }
 0xc9c   : > { %s5022_s21 = smov %s3486_s24  ;;  %24 = sbr.rel (!%p22_p11) target bundleno = 7 (0x7), region = 112 }
 0xca3   :  { %2800 = vsyncpa [#allocation3], 1 }
 0xca4   :  { %2802 = vsyncpa [#allocation3 + $0x1], 1 }
 0xca5   :  { %2803 = vsyncpa [#allocation6], 1 }
 0xca6   :  { %2805 = vsyncpa [#allocation6 + $0x1], 1 }
 0xca7   :  { %2806 = vsyncpa [#allocation4], 1 }
 0xca8   :  { %2808 = vsyncpa [#allocation4 + $0x1], 1 }

</bundles_post_ra>
